<compile_context>
chip_gen: v7x
topology: tpu7x:2x2x1
jax: 0.10.0
libtpu: 0.0.40
codegen_flags: <defaults>
</compile_context>

<pallas_src>
import functools

import numpy as np
import jax
import jax.numpy as jnp
from jax import lax
from jax.experimental import pallas as pl
from jax.experimental.pallas import tpu as pltpu

# Hyper-parameters from DepthLoss.__init__ / sig_loss / gradient_loss defaults.
EPS = 1e-3
SIGMA = 0.85
MAX_DEPTH = 10.0
SIG_W = 10.0
GRAD_W = 0.5
_STRIDES = (1, 2, 4, 6)   # [depth] + [depth[::2*i, ::2*i] for i in 1..3]
_CR = 16                  # halo rows carried between blocks (>= 2*max stride, mult of 8)
_ROW_QUANT = 48           # lcm(16, 2, 4, 6): block starts aligned to every stride


def _stride_mask(idx_f32, s):
    """(idx % s == 0) as f32, using float ops only (no vector int div/mod)."""
    q = jnp.floor(idx_f32 * (1.0 / s) + 0.5) * float(s)
    return (jnp.abs(idx_f32 - q) < 0.5).astype(jnp.float32)


def _depth_loss_kernel(h, tb, need_row_mask,
                       pred_ref, target_ref, out_ref,
                       sum_v_ref, sum_g_ref, sum_g2_ref,
                       g0_ref, g1_ref, g2_ref, g3_ref,
                       n1_ref, n2_ref, n3_ref,
                       dext_ref, vext_ref):
    i = pl.program_id(0)
    w = pred_ref.shape[-1]

    @pl.when(i == 0)
    def _init():
        for r in (sum_v_ref, sum_g_ref, sum_g2_ref,
                  g0_ref, g1_ref, g2_ref, g3_ref,
                  n1_ref, n2_ref, n3_ref):
            r[...] = jnp.zeros_like(r)
        zero = jnp.zeros((_CR, w), jnp.float32)
        dext_ref[0:_CR, :] = zero
        vext_ref[0:_CR, :] = zero

    @pl.when(i > 0)
    def _carry():
        # Previous block's last _CR rows become this block's halo.  Same-ref
        # effects keep program order, so this happens before the overwrite below.
        dext_ref[0:_CR, :] = dext_ref[tb:tb + _CR, :]
        vext_ref[0:_CR, :] = vext_ref[tb:tb + _CR, :]

    pr = pred_ref[...].astype(jnp.float32)
    gt = target_ref[...].astype(jnp.float32)

    # Fused max-depth clamp + validity; the OOB-row mask for a partial last
    # block is skipped entirely (trace time) when h % tb == 0.
    valid = (gt > 0.0) & (gt <= MAX_DEPTH)
    if need_row_mask:
        rows_left = h - i * tb                                    # scalar ALU
        row_ok = lax.broadcasted_iota(jnp.int32, (tb, 1), 0) < rows_left
        valid = valid & row_ok
    v0 = valid.astype(jnp.float32)

    # Single transcendental per element: log((pr+eps)/(gt+eps)).  Invalid lanes
    # go through ratio=1.0, so the log is already exactly 0 there (no `* v0`).
    d0 = jnp.log(jnp.where(valid, (pr + EPS) / (gt + EPS), 1.0))

    # sig-loss statistics: sublane partial sums only (lane reduce at the end).
    sum_v_ref[...] += jnp.sum(v0, axis=0, keepdims=True)
    sum_g_ref[...] += jnp.sum(d0, axis=0, keepdims=True)
    sum_g2_ref[...] += jnp.sum(d0 * d0, axis=0, keepdims=True)

    # Halo buffers: rows [0,_CR) previous block's tail, [_CR,_CR+tb) this block.
    dext_ref[_CR:_CR + tb, :] = d0
    vext_ref[_CR:_CR + tb, :] = v0

    colf = lax.broadcasted_iota(jnp.int32, (1, w), 1).astype(jnp.float32)
    rowf = lax.broadcasted_iota(jnp.int32, (tb, 1), 0).astype(jnp.float32)

    grad_refs = (g0_ref, g1_ref, g2_ref, g3_ref)
    n_refs = (None, n1_ref, n2_ref, n3_ref)

    for lvl, s in enumerate(_STRIDES):
        sh = 2 * s

        # Level-s rows: local row % s == 0 (block starts are multiples of
        # lcm(2,4,6), so local residue == global residue).  The 0/1 row mask is
        # folded into exactly one factor of each product (idempotent).
        if s == 1:
            v0m = v0
        else:
            v0m = v0 * _stride_mask(rowf, s)
            n_refs[lvl][...] += jnp.sum(v0m, axis=0, keepdims=True)

        # Horizontal pairs: XLU lane roll; lane-only masks applied after the
        # sublane reduction (they are per-lane constants).
        d_r = pltpu.roll(d0, sh, axis=1)
        v_r = pltpu.roll(v0m, sh, axis=1)
        h_part = jnp.sum(jnp.abs(d0 - d_r) * (v0m * v_r), axis=0, keepdims=True)

        # Vertical pairs: second element in this block, first element 2*s rows
        # above, read through the halo (cross-block pairs come for free).
        d_up = dext_ref[_CR - sh:_CR - sh + tb, :]
        v_up = vext_ref[_CR - sh:_CR - sh + tb, :]
        v_part = jnp.sum(jnp.abs(d_up - d0) * (v_up * v0m), axis=0, keepdims=True)

        # Per-lane masks at (1, W) cost; pair_ok derived from the rolled iota,
        # so it is independent of the roll-direction convention.
        pair_ok = (jnp.abs(colf - pltpu.roll(colf, sh, axis=1))
                   == float(sh)).astype(jnp.float32)
        if s == 1:
            grad_refs[lvl][...] += h_part * pair_ok + v_part
        else:
            cmask = _stride_mask(colf, s)
            grad_refs[lvl][...] += h_part * (pair_ok * cmask) + v_part * cmask

    # ---- finalize: tiny (1, W) lane reduces + scalar math ------------------
    @pl.when(i == pl.num_programs(0) - 1)
    def _finalize():
        n0 = jnp.sum(sum_v_ref[...], keepdims=True)            # (1, 1)
        sg = jnp.sum(sum_g_ref[...], keepdims=True)
        sg2 = jnp.sum(sum_g2_ref[...], keepdims=True)
        mean_g = sg / n0
        var = sg2 / n0 - SIGMA * mean_g * mean_g
        loss_sig = jnp.sqrt(jnp.maximum(var, 0.0))              # clamp fp rounding

        loss_grad = jnp.sum(g0_ref[...], keepdims=True) / n0    # level 0 reuses n0
        for s, g_ref, n_ref in ((2, g1_ref, n1_ref),
                                (4, g2_ref, n2_ref),
                                (6, g3_ref, n3_ref)):
            cmask = _stride_mask(colf, s)
            n_s = jnp.sum(n_ref[...] * cmask, keepdims=True)
            loss_grad = loss_grad + jnp.sum(g_ref[...], keepdims=True) / n_s

        loss_s = SIG_W * loss_sig
        loss_g = GRAD_W * loss_grad
        loss = loss_s + loss_g

        lane = lax.broadcasted_iota(jnp.int32, out_ref.shape, 1)
        out_ref[...] = jnp.where(lane == 0, loss,
                                 jnp.where(lane == 1, loss_s,
                                           jnp.where(lane == 2, loss_g, 0.0)))


def depth_loss(pred, target, *, block_rows=240):
    """JAX/Pallas equivalent of DepthLoss().forward(pred, target).

    pred/target: 2-D depth maps (f32 or bf16; cast to f32 in-kernel).
    Returns (loss, {'loss_s': ..., 'loss_g': ...}) as f32 scalars.
    """
    if pred.ndim != 2 or target.ndim != 2:
        raise ValueError("DepthLoss operates on single 2-D depth maps")
    if pred.shape != target.shape:
        raise ValueError("pred / target shape mismatch")
    h, w = pred.shape

    # Lane-dense width: pad columns to a multiple of 128 with zeros (padded
    # target columns are invalid and contribute nothing).
    # TODO(synk): support ragged widths in-kernel to avoid this XLA pad copy.
    w_pad = ((w + 127) // 128) * 128
    if w_pad != w:
        pred = jnp.pad(pred, ((0, 0), (0, w_pad - w)))
        target = jnp.pad(target, ((0, 0), (0, w_pad - w)))

    # Row tile: multiple of 48 so every block start is aligned to every pyramid
    # stride (and to bf16 sublane tiling); no bigger than the row-quantized map.
    # v5e/v6e can raise block_rows (128 MiB VMEM); keep it modest on v7x.
    block_rows = max(_ROW_QUANT, (block_rows // _ROW_QUANT) * _ROW_QUANT)
    h_quant = ((h + _ROW_QUANT - 1) // _ROW_QUANT) * _ROW_QUANT
    tb = min(block_rows, h_quant)
    nblk = -(-h // tb)
    need_row_mask = (h % tb) != 0

    kernel = functools.partial(_depth_loss_kernel, h, tb, need_row_mask)

    out = pl.pallas_call(
        kernel,
        out_shape=jax.ShapeDtypeStruct((1, 128), jnp.float32),
        grid_spec=pltpu.PrefetchScalarGridSpec(
            num_scalar_prefetch=0,
            grid=(nblk,),
            in_specs=[pl.BlockSpec((tb, w_pad), lambda i: (i, 0)),
                      pl.BlockSpec((tb, w_pad), lambda i: (i, 0))],
            out_specs=pl.BlockSpec((1, 128), lambda i: (0, 0)),
            scratch_shapes=[
                pltpu.VMEM((1, w_pad), jnp.float32),          # sum valid (level 0)
                pltpu.VMEM((1, w_pad), jnp.float32),          # sum g
                pltpu.VMEM((1, w_pad), jnp.float32),          # sum g^2
                pltpu.VMEM((1, w_pad), jnp.float32),          # grad sum, level 0
                pltpu.VMEM((1, w_pad), jnp.float32),          # grad sum, level 1
                pltpu.VMEM((1, w_pad), jnp.float32),          # grad sum, level 2
                pltpu.VMEM((1, w_pad), jnp.float32),          # grad sum, level 3
                pltpu.VMEM((1, w_pad), jnp.float32),          # valid count, level 1
                pltpu.VMEM((1, w_pad), jnp.float32),          # valid count, level 2
                pltpu.VMEM((1, w_pad), jnp.float32),          # valid count, level 3
                pltpu.VMEM((_CR + tb, w_pad), jnp.float32),   # d halo buffer
                pltpu.VMEM((_CR + tb, w_pad), jnp.float32),   # v halo buffer
            ],
        ),
        compiler_params=pltpu.CompilerParams(
            dimension_semantics=("arbitrary",),
            vmem_limit_bytes=64 * 1024 * 1024,
        ),
    )(pred, target)

    loss, loss_s, loss_g = out[0, 0], out[0, 1], out[0, 2]
    return loss, {"loss_s": loss_s, "loss_g": loss_g}


# -------------------- pure-JAX reference (for verification) --------------------
def _reference(pred, target):
    pred = pred.astype(jnp.float32)
    target = target.astype(jnp.float32)
    target = jnp.where(target > MAX_DEPTH, 0.0, target)

    # sig_loss (masked-sum formulation of the boolean-indexed PyTorch version)
    valid = (target > 0).astype(jnp.float32)
    n = valid.sum()
    g = (jnp.log(pred + EPS)
         - jnp.log(jnp.where(valid > 0, target, 1.0) + EPS)) * valid
    loss_s = SIG_W * jnp.sqrt((g * g).sum() / n - SIGMA * (g.sum() / n) ** 2)

    # gradient_loss
    gl = 0.0
    for s in _STRIDES:
        pr = pred[::s, ::s]
        gt = target[::s, ::s]
        v = (gt > 0).astype(jnp.float32)
        ns = v.sum()
        d = (jnp.log(pr + EPS) - jnp.log(jnp.where(v > 0, gt, 1.0) + EPS)) * v
        vg = jnp.abs(d[:-2, :] - d[2:, :]) * v[:-2, :] * v[2:, :]
        hg = jnp.abs(d[:, :-2] - d[:, 2:]) * v[:, :-2] * v[:, 2:]
        gl = gl + (hg.sum() + vg.sum()) / ns
    loss_g = GRAD_W * gl
    return loss_s + loss_g, loss_s, loss_g


if __name__ == "__main__":
    key = jax.random.PRNGKey(0)
    k1, k2 = jax.random.split(key)
    H, W = 120, 256
    # Positive predicted depths; targets include zeros and values > max_depth so
    # both validity-mask branches are exercised at every pyramid level.
    pred = jax.random.uniform(k1, (H, W), jnp.float32, minval=0.1, maxval=12.0)
    target = jax.random.uniform(k2, (H, W), jnp.float32, minval=0.0, maxval=12.0)

    ref_loss, ref_s, ref_g = _reference(pred, target)

    # block_rows=48 -> 3 row blocks incl. a partial one (exercises the halo
    # carry and the OOB-row mask); block_rows=240 -> single full-height block.
    for br in (48, 240):
        loss, aux = depth_loss(pred, target, block_rows=br)
        jax.block_until_ready(loss)
        np.testing.assert_allclose(np.asarray(loss), np.asarray(ref_loss),
                                   rtol=2e-3, atol=1e-3)
        np.testing.assert_allclose(np.asarray(aux["loss_s"]), np.asarray(ref_s),
                                   rtol=2e-3, atol=1e-3)
        np.testing.assert_allclose(np.asarray(aux["loss_g"]), np.asarray(ref_g),
                                   rtol=2e-3, atol=1e-3)

    print("KERNEL_OK")
</pallas_src>

<mosaic_0001>
module attributes {stable_mosaic.version = 11 : i64} {
  func.func @_depth_loss_kernel(%arg0: i32, %arg1: memref<48x256xf32, #tpu.memory_space<vmem>>, %arg2: memref<48x256xf32, #tpu.memory_space<vmem>>, %arg3: memref<1x128xf32, #tpu.memory_space<vmem>>, %arg4: memref<1x256xf32, #tpu.memory_space<vmem>>, %arg5: memref<1x256xf32, #tpu.memory_space<vmem>>, %arg6: memref<1x256xf32, #tpu.memory_space<vmem>>, %arg7: memref<1x256xf32, #tpu.memory_space<vmem>>, %arg8: memref<1x256xf32, #tpu.memory_space<vmem>>, %arg9: memref<1x256xf32, #tpu.memory_space<vmem>>, %arg10: memref<1x256xf32, #tpu.memory_space<vmem>>, %arg11: memref<1x256xf32, #tpu.memory_space<vmem>>, %arg12: memref<1x256xf32, #tpu.memory_space<vmem>>, %arg13: memref<1x256xf32, #tpu.memory_space<vmem>>, %arg14: memref<64x256xf32, #tpu.memory_space<vmem>>, %arg15: memref<64x256xf32, #tpu.memory_space<vmem>>) attributes {dimension_semantics = [#tpu.dimension_semantics<arbitrary>], iteration_bounds = array<i64: 3>, scalar_prefetch = 0 : i64, scratch_operands = 12 : i64, tpu.core_type = #tpu.core_type<tc>, window_params = [{transform_indices = @transform_0, window_bounds = array<i64: 48, 256>}, {transform_indices = @transform_1, window_bounds = array<i64: 48, 256>}, {pipeline_mode = #tpu.pipeline_mode<synchronous>, transform_indices = @transform_2, window_bounds = array<i64: 1, 128>}]} {
    %c0_i32 = arith.constant 0 : i32
    %0 = arith.cmpi eq, %arg0, %c0_i32 : i32
    %1 = arith.extui %0 : i1 to i32
    %c0_i32_0 = arith.constant 0 : i32
    %2 = arith.cmpi ne, %1, %c0_i32_0 : i32
    scf.if %2 {
      %cst_117 = arith.constant 0.000000e+00 : f32
      %272 = vector.broadcast %cst_117 : f32 to vector<1x256xf32>
      %c0_118 = arith.constant 0 : index
      %c0_119 = arith.constant 0 : index
      %273 = vector.load %arg4[%c0_118, %c0_119] : memref<1x256xf32, #tpu.memory_space<vmem>>, vector<1x256xf32>
      tpu.vector_store %arg4[%c0_118, %c0_119], %272 {strides = array<i32>} : memref<1x256xf32, #tpu.memory_space<vmem>>, vector<1x256xf32>,
      %cst_120 = arith.constant 0.000000e+00 : f32
      %274 = vector.broadcast %cst_120 : f32 to vector<1x256xf32>
      %c0_121 = arith.constant 0 : index
      %c0_122 = arith.constant 0 : index
      %275 = vector.load %arg5[%c0_121, %c0_122] : memref<1x256xf32, #tpu.memory_space<vmem>>, vector<1x256xf32>
      tpu.vector_store %arg5[%c0_121, %c0_122], %274 {strides = array<i32>} : memref<1x256xf32, #tpu.memory_space<vmem>>, vector<1x256xf32>,
      %cst_123 = arith.constant 0.000000e+00 : f32
      %276 = vector.broadcast %cst_123 : f32 to vector<1x256xf32>
      %c0_124 = arith.constant 0 : index
      %c0_125 = arith.constant 0 : index
      %277 = vector.load %arg6[%c0_124, %c0_125] : memref<1x256xf32, #tpu.memory_space<vmem>>, vector<1x256xf32>
      tpu.vector_store %arg6[%c0_124, %c0_125], %276 {strides = array<i32>} : memref<1x256xf32, #tpu.memory_space<vmem>>, vector<1x256xf32>,
      %cst_126 = arith.constant 0.000000e+00 : f32
      %278 = vector.broadcast %cst_126 : f32 to vector<1x256xf32>
      %c0_127 = arith.constant 0 : index
      %c0_128 = arith.constant 0 : index
      %279 = vector.load %arg7[%c0_127, %c0_128] : memref<1x256xf32, #tpu.memory_space<vmem>>, vector<1x256xf32>
      tpu.vector_store %arg7[%c0_127, %c0_128], %278 {strides = array<i32>} : memref<1x256xf32, #tpu.memory_space<vmem>>, vector<1x256xf32>,
      %cst_129 = arith.constant 0.000000e+00 : f32
      %280 = vector.broadcast %cst_129 : f32 to vector<1x256xf32>
      %c0_130 = arith.constant 0 : index
      %c0_131 = arith.constant 0 : index
      %281 = vector.load %arg8[%c0_130, %c0_131] : memref<1x256xf32, #tpu.memory_space<vmem>>, vector<1x256xf32>
      tpu.vector_store %arg8[%c0_130, %c0_131], %280 {strides = array<i32>} : memref<1x256xf32, #tpu.memory_space<vmem>>, vector<1x256xf32>,
      %cst_132 = arith.constant 0.000000e+00 : f32
      %282 = vector.broadcast %cst_132 : f32 to vector<1x256xf32>
      %c0_133 = arith.constant 0 : index
      %c0_134 = arith.constant 0 : index
      %283 = vector.load %arg9[%c0_133, %c0_134] : memref<1x256xf32, #tpu.memory_space<vmem>>, vector<1x256xf32>
      tpu.vector_store %arg9[%c0_133, %c0_134], %282 {strides = array<i32>} : memref<1x256xf32, #tpu.memory_space<vmem>>, vector<1x256xf32>,
      %cst_135 = arith.constant 0.000000e+00 : f32
      %284 = vector.broadcast %cst_135 : f32 to vector<1x256xf32>
      %c0_136 = arith.constant 0 : index
      %c0_137 = arith.constant 0 : index
      %285 = vector.load %arg10[%c0_136, %c0_137] : memref<1x256xf32, #tpu.memory_space<vmem>>, vector<1x256xf32>
      tpu.vector_store %arg10[%c0_136, %c0_137], %284 {strides = array<i32>} : memref<1x256xf32, #tpu.memory_space<vmem>>, vector<1x256xf32>,
      %cst_138 = arith.constant 0.000000e+00 : f32
      %286 = vector.broadcast %cst_138 : f32 to vector<1x256xf32>
      %c0_139 = arith.constant 0 : index
      %c0_140 = arith.constant 0 : index
      %287 = vector.load %arg11[%c0_139, %c0_140] : memref<1x256xf32, #tpu.memory_space<vmem>>, vector<1x256xf32>
      tpu.vector_store %arg11[%c0_139, %c0_140], %286 {strides = array<i32>} : memref<1x256xf32, #tpu.memory_space<vmem>>, vector<1x256xf32>,
      %cst_141 = arith.constant 0.000000e+00 : f32
      %288 = vector.broadcast %cst_141 : f32 to vector<1x256xf32>
      %c0_142 = arith.constant 0 : index
      %c0_143 = arith.constant 0 : index
      %289 = vector.load %arg12[%c0_142, %c0_143] : memref<1x256xf32, #tpu.memory_space<vmem>>, vector<1x256xf32>
      tpu.vector_store %arg12[%c0_142, %c0_143], %288 {strides = array<i32>} : memref<1x256xf32, #tpu.memory_space<vmem>>, vector<1x256xf32>,
      %cst_144 = arith.constant 0.000000e+00 : f32
      %290 = vector.broadcast %cst_144 : f32 to vector<1x256xf32>
      %c0_145 = arith.constant 0 : index
      %c0_146 = arith.constant 0 : index
      %291 = vector.load %arg13[%c0_145, %c0_146] : memref<1x256xf32, #tpu.memory_space<vmem>>, vector<1x256xf32>
      tpu.vector_store %arg13[%c0_145, %c0_146], %290 {strides = array<i32>} : memref<1x256xf32, #tpu.memory_space<vmem>>, vector<1x256xf32>,
      %cst_147 = arith.constant 0.000000e+00 : f32
      %292 = vector.broadcast %cst_147 : f32 to vector<16x256xf32>
      %c0_148 = arith.constant 0 : index
      %c0_149 = arith.constant 0 : index
      %293 = vector.load %arg14[%c0_148, %c0_149] : memref<64x256xf32, #tpu.memory_space<vmem>>, vector<16x256xf32>
      tpu.vector_store %arg14[%c0_148, %c0_149], %292 {strides = array<i32>} : memref<64x256xf32, #tpu.memory_space<vmem>>, vector<16x256xf32>,
      %c0_150 = arith.constant 0 : index
      %c0_151 = arith.constant 0 : index
      %294 = vector.load %arg15[%c0_150, %c0_151] : memref<64x256xf32, #tpu.memory_space<vmem>>, vector<16x256xf32>
      tpu.vector_store %arg15[%c0_150, %c0_151], %292 {strides = array<i32>} : memref<64x256xf32, #tpu.memory_space<vmem>>, vector<16x256xf32>,
    } else {
    }
    %c0_i32_1 = arith.constant 0 : i32
    %3 = arith.cmpi sgt, %arg0, %c0_i32_1 : i32
    %4 = arith.extui %3 : i1 to i32
    %c0_i32_2 = arith.constant 0 : i32
    %5 = arith.cmpi ne, %4, %c0_i32_2 : i32
    scf.if %5 {
      %c48 = arith.constant 48 : index
      %c0_117 = arith.constant 0 : index
      %272 = vector.load %arg14[%c48, %c0_117] : memref<64x256xf32, #tpu.memory_space<vmem>>, vector<16x256xf32>
      %c0_118 = arith.constant 0 : index
      %c0_119 = arith.constant 0 : index
      %273 = vector.load %arg14[%c0_118, %c0_119] : memref<64x256xf32, #tpu.memory_space<vmem>>, vector<16x256xf32>
      tpu.vector_store %arg14[%c0_118, %c0_119], %272 {strides = array<i32>} : memref<64x256xf32, #tpu.memory_space<vmem>>, vector<16x256xf32>,
      %c48_120 = arith.constant 48 : index
      %c0_121 = arith.constant 0 : index
      %274 = vector.load %arg15[%c48_120, %c0_121] : memref<64x256xf32, #tpu.memory_space<vmem>>, vector<16x256xf32>
      %c0_122 = arith.constant 0 : index
      %c0_123 = arith.constant 0 : index
      %275 = vector.load %arg15[%c0_122, %c0_123] : memref<64x256xf32, #tpu.memory_space<vmem>>, vector<16x256xf32>
      tpu.vector_store %arg15[%c0_122, %c0_123], %274 {strides = array<i32>} : memref<64x256xf32, #tpu.memory_space<vmem>>, vector<16x256xf32>,
    } else {
    }
    %c0 = arith.constant 0 : index
    %c0_3 = arith.constant 0 : index
    %6 = vector.load %arg1[%c0, %c0_3] : memref<48x256xf32, #tpu.memory_space<vmem>>, vector<48x256xf32>
    %c0_4 = arith.constant 0 : index
    %c0_5 = arith.constant 0 : index
    %7 = vector.load %arg2[%c0_4, %c0_5] : memref<48x256xf32, #tpu.memory_space<vmem>>, vector<48x256xf32>
    %cst = arith.constant 0.000000e+00 : f32
    %8 = vector.broadcast %cst : f32 to vector<48x256xf32>
    %9 = arith.cmpf ogt, %7, %8 : vector<48x256xf32>
    %cst_6 = arith.constant 1.000000e+01 : f32
    %10 = vector.broadcast %cst_6 : f32 to vector<48x256xf32>
    %11 = arith.cmpf ole, %7, %10 : vector<48x256xf32>
    %12 = arith.andi %9, %11 : vector<48x256xi1>
    %c48_i32 = arith.constant 48 : i32
    %13 = arith.muli %arg0, %c48_i32 : i32
    %c120_i32 = arith.constant 120 : i32
    %14 = arith.subi %c120_i32, %13 : i32
    %15 = tpu.iota {dimensions = array<i32: 0>} : vector<48x1xi32>
    %16 = vector.broadcast %14 : i32 to vector<48x1xi32>
    %17 = arith.cmpi slt, %15, %16 : vector<48x1xi32>
    %18 = vector.broadcast %17 : vector<48x1xi1> to vector<48x256xi1>
    %19 = arith.andi %12, %18 : vector<48x256xi1>
    %20 = arith.extui %19 : vector<48x256xi1> to vector<48x256xi32>
    %21 = arith.sitofp %20 : vector<48x256xi32> to vector<48x256xf32>
    %cst_7 = arith.constant 1.000000e-03 : f32
    %22 = vector.broadcast %cst_7 : f32 to vector<48x256xf32>
    %23 = arith.addf %6, %22 : vector<48x256xf32>
    %cst_8 = arith.constant 1.000000e-03 : f32
    %24 = vector.broadcast %cst_8 : f32 to vector<48x256xf32>
    %25 = arith.addf %7, %24 : vector<48x256xf32>
    %26 = arith.divf %23, %25 : vector<48x256xf32>
    %cst_9 = arith.constant 1.000000e+00 : f32
    %27 = vector.broadcast %cst_9 : f32 to vector<48x256xf32>
    %28 = arith.select %19, %26, %27 : vector<48x256xi1>, vector<48x256xf32>
    %29 = math.log %28 : vector<48x256xf32>
    %c0_10 = arith.constant 0 : index
    %c0_11 = arith.constant 0 : index
    %30 = vector.load %arg4[%c0_10, %c0_11] : memref<1x256xf32, #tpu.memory_space<vmem>>, vector<1x256xf32>
    %cst_12 = arith.constant dense<0.000000e+00> : vector<256xf32>
    %31 = vector.multi_reduction <add>, %21, %cst_12 [0] : vector<48x256xf32> to vector<256xf32>
    %32 = vector.shape_cast %31 : vector<256xf32> to vector<1x256xf32>
    %33 = arith.addf %30, %32 : vector<1x256xf32>
    %c0_13 = arith.constant 0 : index
    %c0_14 = arith.constant 0 : index
    %34 = vector.load %arg4[%c0_13, %c0_14] : memref<1x256xf32, #tpu.memory_space<vmem>>, vector<1x256xf32>
    tpu.vector_store %arg4[%c0_13, %c0_14], %33 {strides = array<i32>} : memref<1x256xf32, #tpu.memory_space<vmem>>, vector<1x256xf32>,
    %c0_15 = arith.constant 0 : index
    %c0_16 = arith.constant 0 : index
    %35 = vector.load %arg5[%c0_15, %c0_16] : memref<1x256xf32, #tpu.memory_space<vmem>>, vector<1x256xf32>
    %cst_17 = arith.constant dense<0.000000e+00> : vector<256xf32>
    %36 = vector.multi_reduction <add>, %29, %cst_17 [0] : vector<48x256xf32> to vector<256xf32>
    %37 = vector.shape_cast %36 : vector<256xf32> to vector<1x256xf32>
    %38 = arith.addf %35, %37 : vector<1x256xf32>
    %c0_18 = arith.constant 0 : index
    %c0_19 = arith.constant 0 : index
    %39 = vector.load %arg5[%c0_18, %c0_19] : memref<1x256xf32, #tpu.memory_space<vmem>>, vector<1x256xf32>
    tpu.vector_store %arg5[%c0_18, %c0_19], %38 {strides = array<i32>} : memref<1x256xf32, #tpu.memory_space<vmem>>, vector<1x256xf32>,
    %c0_20 = arith.constant 0 : index
    %c0_21 = arith.constant 0 : index
    %40 = vector.load %arg6[%c0_20, %c0_21] : memref<1x256xf32, #tpu.memory_space<vmem>>, vector<1x256xf32>
    %41 = arith.mulf %29, %29 : vector<48x256xf32>
    %cst_22 = arith.constant dense<0.000000e+00> : vector<256xf32>
    %42 = vector.multi_reduction <add>, %41, %cst_22 [0] : vector<48x256xf32> to vector<256xf32>
    %43 = vector.shape_cast %42 : vector<256xf32> to vector<1x256xf32>
    %44 = arith.addf %40, %43 : vector<1x256xf32>
    %c0_23 = arith.constant 0 : index
    %c0_24 = arith.constant 0 : index
    %45 = vector.load %arg6[%c0_23, %c0_24] : memref<1x256xf32, #tpu.memory_space<vmem>>, vector<1x256xf32>
    tpu.vector_store %arg6[%c0_23, %c0_24], %44 {strides = array<i32>} : memref<1x256xf32, #tpu.memory_space<vmem>>, vector<1x256xf32>,
    %c16 = arith.constant 16 : index
    %c0_25 = arith.constant 0 : index
    %46 = vector.load %arg14[%c16, %c0_25] : memref<64x256xf32, #tpu.memory_space<vmem>>, vector<48x256xf32>
    tpu.vector_store %arg14[%c16, %c0_25], %29 {strides = array<i32>} : memref<64x256xf32, #tpu.memory_space<vmem>>, vector<48x256xf32>,
    %c16_26 = arith.constant 16 : index
    %c0_27 = arith.constant 0 : index
    %47 = vector.load %arg15[%c16_26, %c0_27] : memref<64x256xf32, #tpu.memory_space<vmem>>, vector<48x256xf32>
    tpu.vector_store %arg15[%c16_26, %c0_27], %21 {strides = array<i32>} : memref<64x256xf32, #tpu.memory_space<vmem>>, vector<48x256xf32>,
    %48 = tpu.iota {dimensions = array<i32: 1>} : vector<1x256xi32>
    %49 = arith.sitofp %48 : vector<1x256xi32> to vector<1x256xf32>
    %50 = tpu.iota {dimensions = array<i32: 0>} : vector<48x1xi32>
    %51 = arith.sitofp %50 : vector<48x1xi32> to vector<48x1xf32>
    %c2_i32 = arith.constant 2 : i32
    %52 = tpu.dynamic_rotate %29 by %c2_i32 dim 1 : vector<48x256xf32>, i32 -> vector<48x256xf32>
    %c2_i32_28 = arith.constant 2 : i32
    %53 = tpu.dynamic_rotate %21 by %c2_i32_28 dim 1 : vector<48x256xf32>, i32 -> vector<48x256xf32>
    %54 = arith.subf %29, %52 : vector<48x256xf32>
    %55 = math.absf %54 : vector<48x256xf32>
    %56 = arith.mulf %21, %53 : vector<48x256xf32>
    %57 = arith.mulf %55, %56 : vector<48x256xf32>
    %cst_29 = arith.constant dense<0.000000e+00> : vector<256xf32>
    %58 = vector.multi_reduction <add>, %57, %cst_29 [0] : vector<48x256xf32> to vector<256xf32>
    %59 = vector.shape_cast %58 : vector<256xf32> to vector<1x256xf32>
    %c14 = arith.constant 14 : index
    %c0_30 = arith.constant 0 : index
    %60 = vector.load %arg14[%c14, %c0_30] : memref<64x256xf32, #tpu.memory_space<vmem>>, vector<48x256xf32>
    %c14_31 = arith.constant 14 : index
    %c0_32 = arith.constant 0 : index
    %61 = vector.load %arg15[%c14_31, %c0_32] : memref<64x256xf32, #tpu.memory_space<vmem>>, vector<48x256xf32>
    %62 = arith.subf %60, %29 : vector<48x256xf32>
    %63 = math.absf %62 : vector<48x256xf32>
    %64 = arith.mulf %61, %21 : vector<48x256xf32>
    %65 = arith.mulf %63, %64 : vector<48x256xf32>
    %cst_33 = arith.constant dense<0.000000e+00> : vector<256xf32>
    %66 = vector.multi_reduction <add>, %65, %cst_33 [0] : vector<48x256xf32> to vector<256xf32>
    %67 = vector.shape_cast %66 : vector<256xf32> to vector<1x256xf32>
    %c2_i32_34 = arith.constant 2 : i32
    %68 = tpu.dynamic_rotate %49 by %c2_i32_34 dim 1 : vector<1x256xf32>, i32 -> vector<1x256xf32>
    %69 = arith.subf %49, %68 : vector<1x256xf32>
    %70 = math.absf %69 : vector<1x256xf32>
    %cst_35 = arith.constant 2.000000e+00 : f32
    %71 = vector.broadcast %cst_35 : f32 to vector<1x256xf32>
    %72 = arith.cmpf oeq, %70, %71 : vector<1x256xf32>
    %73 = arith.extui %72 : vector<1x256xi1> to vector<1x256xi32>
    %74 = arith.sitofp %73 : vector<1x256xi32> to vector<1x256xf32>
    %c0_36 = arith.constant 0 : index
    %c0_37 = arith.constant 0 : index
    %75 = vector.load %arg7[%c0_36, %c0_37] : memref<1x256xf32, #tpu.memory_space<vmem>>, vector<1x256xf32>
    %76 = arith.mulf %59, %74 : vector<1x256xf32>
    %77 = arith.addf %76, %67 : vector<1x256xf32>
    %78 = arith.addf %75, %77 : vector<1x256xf32>
    %c0_38 = arith.constant 0 : index
    %c0_39 = arith.constant 0 : index
    %79 = vector.load %arg7[%c0_38, %c0_39] : memref<1x256xf32, #tpu.memory_space<vmem>>, vector<1x256xf32>
    tpu.vector_store %arg7[%c0_38, %c0_39], %78 {strides = array<i32>} : memref<1x256xf32, #tpu.memory_space<vmem>>, vector<1x256xf32>,
    %cst_40 = arith.constant 5.000000e-01 : f32
    %80 = vector.broadcast %cst_40 : f32 to vector<48x1xf32>
    %81 = arith.mulf %51, %80 : vector<48x1xf32>
    %cst_41 = arith.constant 5.000000e-01 : f32
    %82 = vector.broadcast %cst_41 : f32 to vector<48x1xf32>
    %83 = arith.addf %81, %82 : vector<48x1xf32>
    %84 = math.floor %83 : vector<48x1xf32>
    %cst_42 = arith.constant 2.000000e+00 : f32
    %85 = vector.broadcast %cst_42 : f32 to vector<48x1xf32>
    %86 = arith.mulf %84, %85 : vector<48x1xf32>
    %87 = arith.subf %51, %86 : vector<48x1xf32>
    %88 = math.absf %87 : vector<48x1xf32>
    %cst_43 = arith.constant 5.000000e-01 : f32
    %89 = vector.broadcast %cst_43 : f32 to vector<48x1xf32>
    %90 = arith.cmpf olt, %88, %89 : vector<48x1xf32>
    %91 = arith.extui %90 : vector<48x1xi1> to vector<48x1xi32>
    %92 = arith.sitofp %91 : vector<48x1xi32> to vector<48x1xf32>
    %93 = vector.broadcast %92 : vector<48x1xf32> to vector<48x256xf32>
    %94 = arith.mulf %21, %93 : vector<48x256xf32>
    %c0_44 = arith.constant 0 : index
    %c0_45 = arith.constant 0 : index
    %95 = vector.load %arg11[%c0_44, %c0_45] : memref<1x256xf32, #tpu.memory_space<vmem>>, vector<1x256xf32>
    %cst_46 = arith.constant dense<0.000000e+00> : vector<256xf32>
    %96 = vector.multi_reduction <add>, %94, %cst_46 [0] : vector<48x256xf32> to vector<256xf32>
    %97 = vector.shape_cast %96 : vector<256xf32> to vector<1x256xf32>
    %98 = arith.addf %95, %97 : vector<1x256xf32>
    %c0_47 = arith.constant 0 : index
    %c0_48 = arith.constant 0 : index
    %99 = vector.load %arg11[%c0_47, %c0_48] : memref<1x256xf32, #tpu.memory_space<vmem>>, vector<1x256xf32>
    tpu.vector_store %arg11[%c0_47, %c0_48], %98 {strides = array<i32>} : memref<1x256xf32, #tpu.memory_space<vmem>>, vector<1x256xf32>,
    %c4_i32 = arith.constant 4 : i32
    %100 = tpu.dynamic_rotate %29 by %c4_i32 dim 1 : vector<48x256xf32>, i32 -> vector<48x256xf32>
    %c4_i32_49 = arith.constant 4 : i32
    %101 = tpu.dynamic_rotate %94 by %c4_i32_49 dim 1 : vector<48x256xf32>, i32 -> vector<48x256xf32>
    %102 = arith.subf %29, %100 : vector<48x256xf32>
    %103 = math.absf %102 : vector<48x256xf32>
    %104 = arith.mulf %94, %101 : vector<48x256xf32>
    %105 = arith.mulf %103, %104 : vector<48x256xf32>
    %cst_50 = arith.constant dense<0.000000e+00> : vector<256xf32>
    %106 = vector.multi_reduction <add>, %105, %cst_50 [0] : vector<48x256xf32> to vector<256xf32>
    %107 = vector.shape_cast %106 : vector<256xf32> to vector<1x256xf32>
    %c12 = arith.constant 12 : index
    %c0_51 = arith.constant 0 : index
    %108 = vector.load %arg14[%c12, %c0_51] : memref<64x256xf32, #tpu.memory_space<vmem>>, vector<48x256xf32>
    %c12_52 = arith.constant 12 : index
    %c0_53 = arith.constant 0 : index
    %109 = vector.load %arg15[%c12_52, %c0_53] : memref<64x256xf32, #tpu.memory_space<vmem>>, vector<48x256xf32>
    %110 = arith.subf %108, %29 : vector<48x256xf32>
    %111 = math.absf %110 : vector<48x256xf32>
    %112 = arith.mulf %109, %94 : vector<48x256xf32>
    %113 = arith.mulf %111, %112 : vector<48x256xf32>
    %cst_54 = arith.constant dense<0.000000e+00> : vector<256xf32>
    %114 = vector.multi_reduction <add>, %113, %cst_54 [0] : vector<48x256xf32> to vector<256xf32>
    %115 = vector.shape_cast %114 : vector<256xf32> to vector<1x256xf32>
    %c4_i32_55 = arith.constant 4 : i32
    %116 = tpu.dynamic_rotate %49 by %c4_i32_55 dim 1 : vector<1x256xf32>, i32 -> vector<1x256xf32>
    %117 = arith.subf %49, %116 : vector<1x256xf32>
    %118 = math.absf %117 : vector<1x256xf32>
    %cst_56 = arith.constant 4.000000e+00 : f32
    %119 = vector.broadcast %cst_56 : f32 to vector<1x256xf32>
    %120 = arith.cmpf oeq, %118, %119 : vector<1x256xf32>
    %121 = arith.extui %120 : vector<1x256xi1> to vector<1x256xi32>
    %122 = arith.sitofp %121 : vector<1x256xi32> to vector<1x256xf32>
    %cst_57 = arith.constant 5.000000e-01 : f32
    %123 = vector.broadcast %cst_57 : f32 to vector<1x256xf32>
    %124 = arith.mulf %49, %123 : vector<1x256xf32>
    %cst_58 = arith.constant 5.000000e-01 : f32
    %125 = vector.broadcast %cst_58 : f32 to vector<1x256xf32>
    %126 = arith.addf %124, %125 : vector<1x256xf32>
    %127 = math.floor %126 : vector<1x256xf32>
    %cst_59 = arith.constant 2.000000e+00 : f32
    %128 = vector.broadcast %cst_59 : f32 to vector<1x256xf32>
    %129 = arith.mulf %127, %128 : vector<1x256xf32>
    %130 = arith.subf %49, %129 : vector<1x256xf32>
    %131 = math.absf %130 : vector<1x256xf32>
    %cst_60 = arith.constant 5.000000e-01 : f32
    %132 = vector.broadcast %cst_60 : f32 to vector<1x256xf32>
    %133 = arith.cmpf olt, %131, %132 : vector<1x256xf32>
    %134 = arith.extui %133 : vector<1x256xi1> to vector<1x256xi32>
    %135 = arith.sitofp %134 : vector<1x256xi32> to vector<1x256xf32>
    %c0_61 = arith.constant 0 : index
    %c0_62 = arith.constant 0 : index
    %136 = vector.load %arg8[%c0_61, %c0_62] : memref<1x256xf32, #tpu.memory_space<vmem>>, vector<1x256xf32>
    %137 = arith.mulf %122, %135 : vector<1x256xf32>
    %138 = arith.mulf %107, %137 : vector<1x256xf32>
    %139 = arith.mulf %115, %135 : vector<1x256xf32>
    %140 = arith.addf %138, %139 : vector<1x256xf32>
    %141 = arith.addf %136, %140 : vector<1x256xf32>
    %c0_63 = arith.constant 0 : index
    %c0_64 = arith.constant 0 : index
    %142 = vector.load %arg8[%c0_63, %c0_64] : memref<1x256xf32, #tpu.memory_space<vmem>>, vector<1x256xf32>
    tpu.vector_store %arg8[%c0_63, %c0_64], %141 {strides = array<i32>} : memref<1x256xf32, #tpu.memory_space<vmem>>, vector<1x256xf32>,
    %cst_65 = arith.constant 2.500000e-01 : f32
    %143 = vector.broadcast %cst_65 : f32 to vector<48x1xf32>
    %144 = arith.mulf %51, %143 : vector<48x1xf32>
    %cst_66 = arith.constant 5.000000e-01 : f32
    %145 = vector.broadcast %cst_66 : f32 to vector<48x1xf32>
    %146 = arith.addf %144, %145 : vector<48x1xf32>
    %147 = math.floor %146 : vector<48x1xf32>
    %cst_67 = arith.constant 4.000000e+00 : f32
    %148 = vector.broadcast %cst_67 : f32 to vector<48x1xf32>
    %149 = arith.mulf %147, %148 : vector<48x1xf32>
    %150 = arith.subf %51, %149 : vector<48x1xf32>
    %151 = math.absf %150 : vector<48x1xf32>
    %cst_68 = arith.constant 5.000000e-01 : f32
    %152 = vector.broadcast %cst_68 : f32 to vector<48x1xf32>
    %153 = arith.cmpf olt, %151, %152 : vector<48x1xf32>
    %154 = arith.extui %153 : vector<48x1xi1> to vector<48x1xi32>
    %155 = arith.sitofp %154 : vector<48x1xi32> to vector<48x1xf32>
    %156 = vector.broadcast %155 : vector<48x1xf32> to vector<48x256xf32>
    %157 = arith.mulf %21, %156 : vector<48x256xf32>
    %c0_69 = arith.constant 0 : index
    %c0_70 = arith.constant 0 : index
    %158 = vector.load %arg12[%c0_69, %c0_70] : memref<1x256xf32, #tpu.memory_space<vmem>>, vector<1x256xf32>
    %cst_71 = arith.constant dense<0.000000e+00> : vector<256xf32>
    %159 = vector.multi_reduction <add>, %157, %cst_71 [0] : vector<48x256xf32> to vector<256xf32>
    %160 = vector.shape_cast %159 : vector<256xf32> to vector<1x256xf32>
    %161 = arith.addf %158, %160 : vector<1x256xf32>
    %c0_72 = arith.constant 0 : index
    %c0_73 = arith.constant 0 : index
    %162 = vector.load %arg12[%c0_72, %c0_73] : memref<1x256xf32, #tpu.memory_space<vmem>>, vector<1x256xf32>
    tpu.vector_store %arg12[%c0_72, %c0_73], %161 {strides = array<i32>} : memref<1x256xf32, #tpu.memory_space<vmem>>, vector<1x256xf32>,
    %c8_i32 = arith.constant 8 : i32
    %163 = tpu.dynamic_rotate %29 by %c8_i32 dim 1 : vector<48x256xf32>, i32 -> vector<48x256xf32>
    %c8_i32_74 = arith.constant 8 : i32
    %164 = tpu.dynamic_rotate %157 by %c8_i32_74 dim 1 : vector<48x256xf32>, i32 -> vector<48x256xf32>
    %165 = arith.subf %29, %163 : vector<48x256xf32>
    %166 = math.absf %165 : vector<48x256xf32>
    %167 = arith.mulf %157, %164 : vector<48x256xf32>
    %168 = arith.mulf %166, %167 : vector<48x256xf32>
    %cst_75 = arith.constant dense<0.000000e+00> : vector<256xf32>
    %169 = vector.multi_reduction <add>, %168, %cst_75 [0] : vector<48x256xf32> to vector<256xf32>
    %170 = vector.shape_cast %169 : vector<256xf32> to vector<1x256xf32>
    %c8 = arith.constant 8 : index
    %c0_76 = arith.constant 0 : index
    %171 = vector.load %arg14[%c8, %c0_76] : memref<64x256xf32, #tpu.memory_space<vmem>>, vector<48x256xf32>
    %c8_77 = arith.constant 8 : index
    %c0_78 = arith.constant 0 : index
    %172 = vector.load %arg15[%c8_77, %c0_78] : memref<64x256xf32, #tpu.memory_space<vmem>>, vector<48x256xf32>
    %173 = arith.subf %171, %29 : vector<48x256xf32>
    %174 = math.absf %173 : vector<48x256xf32>
    %175 = arith.mulf %172, %157 : vector<48x256xf32>
    %176 = arith.mulf %174, %175 : vector<48x256xf32>
    %cst_79 = arith.constant dense<0.000000e+00> : vector<256xf32>
    %177 = vector.multi_reduction <add>, %176, %cst_79 [0] : vector<48x256xf32> to vector<256xf32>
    %178 = vector.shape_cast %177 : vector<256xf32> to vector<1x256xf32>
    %c8_i32_80 = arith.constant 8 : i32
    %179 = tpu.dynamic_rotate %49 by %c8_i32_80 dim 1 : vector<1x256xf32>, i32 -> vector<1x256xf32>
    %180 = arith.subf %49, %179 : vector<1x256xf32>
    %181 = math.absf %180 : vector<1x256xf32>
    %cst_81 = arith.constant 8.000000e+00 : f32
    %182 = vector.broadcast %cst_81 : f32 to vector<1x256xf32>
    %183 = arith.cmpf oeq, %181, %182 : vector<1x256xf32>
    %184 = arith.extui %183 : vector<1x256xi1> to vector<1x256xi32>
    %185 = arith.sitofp %184 : vector<1x256xi32> to vector<1x256xf32>
    %cst_82 = arith.constant 2.500000e-01 : f32
    %186 = vector.broadcast %cst_82 : f32 to vector<1x256xf32>
    %187 = arith.mulf %49, %186 : vector<1x256xf32>
    %cst_83 = arith.constant 5.000000e-01 : f32
    %188 = vector.broadcast %cst_83 : f32 to vector<1x256xf32>
    %189 = arith.addf %187, %188 : vector<1x256xf32>
    %190 = math.floor %189 : vector<1x256xf32>
    %cst_84 = arith.constant 4.000000e+00 : f32
    %191 = vector.broadcast %cst_84 : f32 to vector<1x256xf32>
    %192 = arith.mulf %190, %191 : vector<1x256xf32>
    %193 = arith.subf %49, %192 : vector<1x256xf32>
    %194 = math.absf %193 : vector<1x256xf32>
    %cst_85 = arith.constant 5.000000e-01 : f32
    %195 = vector.broadcast %cst_85 : f32 to vector<1x256xf32>
    %196 = arith.cmpf olt, %194, %195 : vector<1x256xf32>
    %197 = arith.extui %196 : vector<1x256xi1> to vector<1x256xi32>
    %198 = arith.sitofp %197 : vector<1x256xi32> to vector<1x256xf32>
    %c0_86 = arith.constant 0 : index
    %c0_87 = arith.constant 0 : index
    %199 = vector.load %arg9[%c0_86, %c0_87] : memref<1x256xf32, #tpu.memory_space<vmem>>, vector<1x256xf32>
    %200 = arith.mulf %185, %198 : vector<1x256xf32>
    %201 = arith.mulf %170, %200 : vector<1x256xf32>
    %202 = arith.mulf %178, %198 : vector<1x256xf32>
    %203 = arith.addf %201, %202 : vector<1x256xf32>
    %204 = arith.addf %199, %203 : vector<1x256xf32>
    %c0_88 = arith.constant 0 : index
    %c0_89 = arith.constant 0 : index
    %205 = vector.load %arg9[%c0_88, %c0_89] : memref<1x256xf32, #tpu.memory_space<vmem>>, vector<1x256xf32>
    tpu.vector_store %arg9[%c0_88, %c0_89], %204 {strides = array<i32>} : memref<1x256xf32, #tpu.memory_space<vmem>>, vector<1x256xf32>,
    %cst_90 = arith.constant 0.166666672 : f32
    %206 = vector.broadcast %cst_90 : f32 to vector<48x1xf32>
    %207 = arith.mulf %51, %206 : vector<48x1xf32>
    %cst_91 = arith.constant 5.000000e-01 : f32
    %208 = vector.broadcast %cst_91 : f32 to vector<48x1xf32>
    %209 = arith.addf %207, %208 : vector<48x1xf32>
    %210 = math.floor %209 : vector<48x1xf32>
    %cst_92 = arith.constant 6.000000e+00 : f32
    %211 = vector.broadcast %cst_92 : f32 to vector<48x1xf32>
    %212 = arith.mulf %210, %211 : vector<48x1xf32>
    %213 = arith.subf %51, %212 : vector<48x1xf32>
    %214 = math.absf %213 : vector<48x1xf32>
    %cst_93 = arith.constant 5.000000e-01 : f32
    %215 = vector.broadcast %cst_93 : f32 to vector<48x1xf32>
    %216 = arith.cmpf olt, %214, %215 : vector<48x1xf32>
    %217 = arith.extui %216 : vector<48x1xi1> to vector<48x1xi32>
    %218 = arith.sitofp %217 : vector<48x1xi32> to vector<48x1xf32>
    %219 = vector.broadcast %218 : vector<48x1xf32> to vector<48x256xf32>
    %220 = arith.mulf %21, %219 : vector<48x256xf32>
    %c0_94 = arith.constant 0 : index
    %c0_95 = arith.constant 0 : index
    %221 = vector.load %arg13[%c0_94, %c0_95] : memref<1x256xf32, #tpu.memory_space<vmem>>, vector<1x256xf32>
    %cst_96 = arith.constant dense<0.000000e+00> : vector<256xf32>
    %222 = vector.multi_reduction <add>, %220, %cst_96 [0] : vector<48x256xf32> to vector<256xf32>
    %223 = vector.shape_cast %222 : vector<256xf32> to vector<1x256xf32>
    %224 = arith.addf %221, %223 : vector<1x256xf32>
    %c0_97 = arith.constant 0 : index
    %c0_98 = arith.constant 0 : index
    %225 = vector.load %arg13[%c0_97, %c0_98] : memref<1x256xf32, #tpu.memory_space<vmem>>, vector<1x256xf32>
    tpu.vector_store %arg13[%c0_97, %c0_98], %224 {strides = array<i32>} : memref<1x256xf32, #tpu.memory_space<vmem>>, vector<1x256xf32>,
    %c12_i32 = arith.constant 12 : i32
    %226 = tpu.dynamic_rotate %29 by %c12_i32 dim 1 : vector<48x256xf32>, i32 -> vector<48x256xf32>
    %c12_i32_99 = arith.constant 12 : i32
    %227 = tpu.dynamic_rotate %220 by %c12_i32_99 dim 1 : vector<48x256xf32>, i32 -> vector<48x256xf32>
    %228 = arith.subf %29, %226 : vector<48x256xf32>
    %229 = math.absf %228 : vector<48x256xf32>
    %230 = arith.mulf %220, %227 : vector<48x256xf32>
    %231 = arith.mulf %229, %230 : vector<48x256xf32>
    %cst_100 = arith.constant dense<0.000000e+00> : vector<256xf32>
    %232 = vector.multi_reduction <add>, %231, %cst_100 [0] : vector<48x256xf32> to vector<256xf32>
    %233 = vector.shape_cast %232 : vector<256xf32> to vector<1x256xf32>
    %c4 = arith.constant 4 : index
    %c0_101 = arith.constant 0 : index
    %234 = vector.load %arg14[%c4, %c0_101] : memref<64x256xf32, #tpu.memory_space<vmem>>, vector<48x256xf32>
    %c4_102 = arith.constant 4 : index
    %c0_103 = arith.constant 0 : index
    %235 = vector.load %arg15[%c4_102, %c0_103] : memref<64x256xf32, #tpu.memory_space<vmem>>, vector<48x256xf32>
    %236 = arith.subf %234, %29 : vector<48x256xf32>
    %237 = math.absf %236 : vector<48x256xf32>
    %238 = arith.mulf %235, %220 : vector<48x256xf32>
    %239 = arith.mulf %237, %238 : vector<48x256xf32>
    %cst_104 = arith.constant dense<0.000000e+00> : vector<256xf32>
    %240 = vector.multi_reduction <add>, %239, %cst_104 [0] : vector<48x256xf32> to vector<256xf32>
    %241 = vector.shape_cast %240 : vector<256xf32> to vector<1x256xf32>
    %c12_i32_105 = arith.constant 12 : i32
    %242 = tpu.dynamic_rotate %49 by %c12_i32_105 dim 1 : vector<1x256xf32>, i32 -> vector<1x256xf32>
    %243 = arith.subf %49, %242 : vector<1x256xf32>
    %244 = math.absf %243 : vector<1x256xf32>
    %cst_106 = arith.constant 1.200000e+01 : f32
    %245 = vector.broadcast %cst_106 : f32 to vector<1x256xf32>
    %246 = arith.cmpf oeq, %244, %245 : vector<1x256xf32>
    %247 = arith.extui %246 : vector<1x256xi1> to vector<1x256xi32>
    %248 = arith.sitofp %247 : vector<1x256xi32> to vector<1x256xf32>
    %cst_107 = arith.constant 0.166666672 : f32
    %249 = vector.broadcast %cst_107 : f32 to vector<1x256xf32>
    %250 = arith.mulf %49, %249 : vector<1x256xf32>
    %cst_108 = arith.constant 5.000000e-01 : f32
    %251 = vector.broadcast %cst_108 : f32 to vector<1x256xf32>
    %252 = arith.addf %250, %251 : vector<1x256xf32>
    %253 = math.floor %252 : vector<1x256xf32>
    %cst_109 = arith.constant 6.000000e+00 : f32
    %254 = vector.broadcast %cst_109 : f32 to vector<1x256xf32>
    %255 = arith.mulf %253, %254 : vector<1x256xf32>
    %256 = arith.subf %49, %255 : vector<1x256xf32>
    %257 = math.absf %256 : vector<1x256xf32>
    %cst_110 = arith.constant 5.000000e-01 : f32
    %258 = vector.broadcast %cst_110 : f32 to vector<1x256xf32>
    %259 = arith.cmpf olt, %257, %258 : vector<1x256xf32>
    %260 = arith.extui %259 : vector<1x256xi1> to vector<1x256xi32>
    %261 = arith.sitofp %260 : vector<1x256xi32> to vector<1x256xf32>
    %c0_111 = arith.constant 0 : index
    %c0_112 = arith.constant 0 : index
    %262 = vector.load %arg10[%c0_111, %c0_112] : memref<1x256xf32, #tpu.memory_space<vmem>>, vector<1x256xf32>
    %263 = arith.mulf %248, %261 : vector<1x256xf32>
    %264 = arith.mulf %233, %263 : vector<1x256xf32>
    %265 = arith.mulf %241, %261 : vector<1x256xf32>
    %266 = arith.addf %264, %265 : vector<1x256xf32>
    %267 = arith.addf %262, %266 : vector<1x256xf32>
    %c0_113 = arith.constant 0 : index
    %c0_114 = arith.constant 0 : index
    %268 = vector.load %arg10[%c0_113, %c0_114] : memref<1x256xf32, #tpu.memory_space<vmem>>, vector<1x256xf32>
    tpu.vector_store %arg10[%c0_113, %c0_114], %267 {strides = array<i32>} : memref<1x256xf32, #tpu.memory_space<vmem>>, vector<1x256xf32>,
    %c2_i32_115 = arith.constant 2 : i32
    %269 = arith.cmpi eq, %arg0, %c2_i32_115 : i32
    %270 = arith.extui %269 : i1 to i32
    %c0_i32_116 = arith.constant 0 : i32
    %271 = arith.cmpi ne, %270, %c0_i32_116 : i32
    scf.if %271 {
      %c0_117 = arith.constant 0 : index
      %c0_118 = arith.constant 0 : index
      %272 = vector.load %arg4[%c0_117, %c0_118] : memref<1x256xf32, #tpu.memory_space<vmem>>, vector<1x256xf32>
      %273 = vector.shape_cast %272 : vector<1x256xf32> to vector<1x1x256xf32>
      %cst_119 = arith.constant dense<0.000000e+00> : vector<1xf32>
      %274 = vector.multi_reduction <add>, %273, %cst_119 [1, 2] : vector<1x1x256xf32> to vector<1xf32>
      %275 = vector.shape_cast %274 : vector<1xf32> to vector<1x1x1xf32>
      %276 = vector.extract %275[0, 0, 0] : f32 from vector<1x1x1xf32>
      %277 = vector.broadcast %276 : f32 to vector<1x1xf32>
      %c0_120 = arith.constant 0 : index
      %c0_121 = arith.constant 0 : index
      %278 = vector.load %arg5[%c0_120, %c0_121] : memref<1x256xf32, #tpu.memory_space<vmem>>, vector<1x256xf32>
      %279 = vector.shape_cast %278 : vector<1x256xf32> to vector<1x1x256xf32>
      %cst_122 = arith.constant dense<0.000000e+00> : vector<1xf32>
      %280 = vector.multi_reduction <add>, %279, %cst_122 [1, 2] : vector<1x1x256xf32> to vector<1xf32>
      %281 = vector.shape_cast %280 : vector<1xf32> to vector<1x1x1xf32>
      %282 = vector.extract %281[0, 0, 0] : f32 from vector<1x1x1xf32>
      %283 = vector.broadcast %282 : f32 to vector<1x1xf32>
      %c0_123 = arith.constant 0 : index
      %c0_124 = arith.constant 0 : index
      %284 = vector.load %arg6[%c0_123, %c0_124] : memref<1x256xf32, #tpu.memory_space<vmem>>, vector<1x256xf32>
      %285 = vector.shape_cast %284 : vector<1x256xf32> to vector<1x1x256xf32>
      %cst_125 = arith.constant dense<0.000000e+00> : vector<1xf32>
      %286 = vector.multi_reduction <add>, %285, %cst_125 [1, 2] : vector<1x1x256xf32> to vector<1xf32>
      %287 = vector.shape_cast %286 : vector<1xf32> to vector<1x1x1xf32>
      %288 = vector.extract %287[0, 0, 0] : f32 from vector<1x1x1xf32>
      %289 = vector.broadcast %288 : f32 to vector<1x1xf32>
      %290 = arith.divf %283, %277 : vector<1x1xf32>
      %291 = arith.divf %289, %277 : vector<1x1xf32>
      %cst_126 = arith.constant 8.500000e-01 : f32
      %292 = vector.broadcast %cst_126 : f32 to vector<1x1xf32>
      %293 = arith.mulf %292, %290 : vector<1x1xf32>
      %294 = arith.mulf %293, %290 : vector<1x1xf32>
      %295 = arith.subf %291, %294 : vector<1x1xf32>
      %cst_127 = arith.constant 0.000000e+00 : f32
      %296 = vector.broadcast %cst_127 : f32 to vector<1x1xf32>
      %297 = arith.maximumf %295, %296 : vector<1x1xf32>
      %298 = math.sqrt %297 : vector<1x1xf32>
      %c0_128 = arith.constant 0 : index
      %c0_129 = arith.constant 0 : index
      %299 = vector.load %arg7[%c0_128, %c0_129] : memref<1x256xf32, #tpu.memory_space<vmem>>, vector<1x256xf32>
      %300 = vector.shape_cast %299 : vector<1x256xf32> to vector<1x1x256xf32>
      %cst_130 = arith.constant dense<0.000000e+00> : vector<1xf32>
      %301 = vector.multi_reduction <add>, %300, %cst_130 [1, 2] : vector<1x1x256xf32> to vector<1xf32>
      %302 = vector.shape_cast %301 : vector<1xf32> to vector<1x1x1xf32>
      %303 = vector.extract %302[0, 0, 0] : f32 from vector<1x1x1xf32>
      %304 = vector.broadcast %303 : f32 to vector<1x1xf32>
      %305 = arith.divf %304, %277 : vector<1x1xf32>
      %cst_131 = arith.constant 5.000000e-01 : f32
      %306 = vector.broadcast %cst_131 : f32 to vector<1x256xf32>
      %307 = arith.mulf %49, %306 : vector<1x256xf32>
      %cst_132 = arith.constant 5.000000e-01 : f32
      %308 = vector.broadcast %cst_132 : f32 to vector<1x256xf32>
      %309 = arith.addf %307, %308 : vector<1x256xf32>
      %310 = math.floor %309 : vector<1x256xf32>
      %cst_133 = arith.constant 2.000000e+00 : f32
      %311 = vector.broadcast %cst_133 : f32 to vector<1x256xf32>
      %312 = arith.mulf %310, %311 : vector<1x256xf32>
      %313 = arith.subf %49, %312 : vector<1x256xf32>
      %314 = math.absf %313 : vector<1x256xf32>
      %cst_134 = arith.constant 5.000000e-01 : f32
      %315 = vector.broadcast %cst_134 : f32 to vector<1x256xf32>
      %316 = arith.cmpf olt, %314, %315 : vector<1x256xf32>
      %317 = arith.extui %316 : vector<1x256xi1> to vector<1x256xi32>
      %318 = arith.sitofp %317 : vector<1x256xi32> to vector<1x256xf32>
      %c0_135 = arith.constant 0 : index
      %c0_136 = arith.constant 0 : index
      %319 = vector.load %arg11[%c0_135, %c0_136] : memref<1x256xf32, #tpu.memory_space<vmem>>, vector<1x256xf32>
      %320 = arith.mulf %319, %318 : vector<1x256xf32>
      %321 = vector.shape_cast %320 : vector<1x256xf32> to vector<1x1x256xf32>
      %cst_137 = arith.constant dense<0.000000e+00> : vector<1xf32>
      %322 = vector.multi_reduction <add>, %321, %cst_137 [1, 2] : vector<1x1x256xf32> to vector<1xf32>
      %323 = vector.shape_cast %322 : vector<1xf32> to vector<1x1x1xf32>
      %324 = vector.extract %323[0, 0, 0] : f32 from vector<1x1x1xf32>
      %325 = vector.broadcast %324 : f32 to vector<1x1xf32>
      %c0_138 = arith.constant 0 : index
      %c0_139 = arith.constant 0 : index
      %326 = vector.load %arg8[%c0_138, %c0_139] : memref<1x256xf32, #tpu.memory_space<vmem>>, vector<1x256xf32>
      %327 = vector.shape_cast %326 : vector<1x256xf32> to vector<1x1x256xf32>
      %cst_140 = arith.constant dense<0.000000e+00> : vector<1xf32>
      %328 = vector.multi_reduction <add>, %327, %cst_140 [1, 2] : vector<1x1x256xf32> to vector<1xf32>
      %329 = vector.shape_cast %328 : vector<1xf32> to vector<1x1x1xf32>
      %330 = vector.extract %329[0, 0, 0] : f32 from vector<1x1x1xf32>
      %331 = vector.broadcast %330 : f32 to vector<1x1xf32>
      %332 = arith.divf %331, %325 : vector<1x1xf32>
      %333 = arith.addf %305, %332 : vector<1x1xf32>
      %cst_141 = arith.constant 2.500000e-01 : f32
      %334 = vector.broadcast %cst_141 : f32 to vector<1x256xf32>
      %335 = arith.mulf %49, %334 : vector<1x256xf32>
      %cst_142 = arith.constant 5.000000e-01 : f32
      %336 = vector.broadcast %cst_142 : f32 to vector<1x256xf32>
      %337 = arith.addf %335, %336 : vector<1x256xf32>
      %338 = math.floor %337 : vector<1x256xf32>
      %cst_143 = arith.constant 4.000000e+00 : f32
      %339 = vector.broadcast %cst_143 : f32 to vector<1x256xf32>
      %340 = arith.mulf %338, %339 : vector<1x256xf32>
      %341 = arith.subf %49, %340 : vector<1x256xf32>
      %342 = math.absf %341 : vector<1x256xf32>
      %cst_144 = arith.constant 5.000000e-01 : f32
      %343 = vector.broadcast %cst_144 : f32 to vector<1x256xf32>
      %344 = arith.cmpf olt, %342, %343 : vector<1x256xf32>
      %345 = arith.extui %344 : vector<1x256xi1> to vector<1x256xi32>
      %346 = arith.sitofp %345 : vector<1x256xi32> to vector<1x256xf32>
      %c0_145 = arith.constant 0 : index
      %c0_146 = arith.constant 0 : index
      %347 = vector.load %arg12[%c0_145, %c0_146] : memref<1x256xf32, #tpu.memory_space<vmem>>, vector<1x256xf32>
      %348 = arith.mulf %347, %346 : vector<1x256xf32>
      %349 = vector.shape_cast %348 : vector<1x256xf32> to vector<1x1x256xf32>
      %cst_147 = arith.constant dense<0.000000e+00> : vector<1xf32>
      %350 = vector.multi_reduction <add>, %349, %cst_147 [1, 2] : vector<1x1x256xf32> to vector<1xf32>
      %351 = vector.shape_cast %350 : vector<1xf32> to vector<1x1x1xf32>
      %352 = vector.extract %351[0, 0, 0] : f32 from vector<1x1x1xf32>
      %353 = vector.broadcast %352 : f32 to vector<1x1xf32>
      %c0_148 = arith.constant 0 : index
      %c0_149 = arith.constant 0 : index
      %354 = vector.load %arg9[%c0_148, %c0_149] : memref<1x256xf32, #tpu.memory_space<vmem>>, vector<1x256xf32>
      %355 = vector.shape_cast %354 : vector<1x256xf32> to vector<1x1x256xf32>
      %cst_150 = arith.constant dense<0.000000e+00> : vector<1xf32>
      %356 = vector.multi_reduction <add>, %355, %cst_150 [1, 2] : vector<1x1x256xf32> to vector<1xf32>
      %357 = vector.shape_cast %356 : vector<1xf32> to vector<1x1x1xf32>
      %358 = vector.extract %357[0, 0, 0] : f32 from vector<1x1x1xf32>
      %359 = vector.broadcast %358 : f32 to vector<1x1xf32>
      %360 = arith.divf %359, %353 : vector<1x1xf32>
      %361 = arith.addf %333, %360 : vector<1x1xf32>
      %cst_151 = arith.constant 0.166666672 : f32
      %362 = vector.broadcast %cst_151 : f32 to vector<1x256xf32>
      %363 = arith.mulf %49, %362 : vector<1x256xf32>
      %cst_152 = arith.constant 5.000000e-01 : f32
      %364 = vector.broadcast %cst_152 : f32 to vector<1x256xf32>
      %365 = arith.addf %363, %364 : vector<1x256xf32>
      %366 = math.floor %365 : vector<1x256xf32>
      %cst_153 = arith.constant 6.000000e+00 : f32
      %367 = vector.broadcast %cst_153 : f32 to vector<1x256xf32>
      %368 = arith.mulf %366, %367 : vector<1x256xf32>
      %369 = arith.subf %49, %368 : vector<1x256xf32>
      %370 = math.absf %369 : vector<1x256xf32>
      %cst_154 = arith.constant 5.000000e-01 : f32
      %371 = vector.broadcast %cst_154 : f32 to vector<1x256xf32>
      %372 = arith.cmpf olt, %370, %371 : vector<1x256xf32>
      %373 = arith.extui %372 : vector<1x256xi1> to vector<1x256xi32>
      %374 = arith.sitofp %373 : vector<1x256xi32> to vector<1x256xf32>
      %c0_155 = arith.constant 0 : index
      %c0_156 = arith.constant 0 : index
      %375 = vector.load %arg13[%c0_155, %c0_156] : memref<1x256xf32, #tpu.memory_space<vmem>>, vector<1x256xf32>
      %376 = arith.mulf %375, %374 : vector<1x256xf32>
      %377 = vector.shape_cast %376 : vector<1x256xf32> to vector<1x1x256xf32>
      %cst_157 = arith.constant dense<0.000000e+00> : vector<1xf32>
      %378 = vector.multi_reduction <add>, %377, %cst_157 [1, 2] : vector<1x1x256xf32> to vector<1xf32>
      %379 = vector.shape_cast %378 : vector<1xf32> to vector<1x1x1xf32>
      %380 = vector.extract %379[0, 0, 0] : f32 from vector<1x1x1xf32>
      %381 = vector.broadcast %380 : f32 to vector<1x1xf32>
      %c0_158 = arith.constant 0 : index
      %c0_159 = arith.constant 0 : index
      %382 = vector.load %arg10[%c0_158, %c0_159] : memref<1x256xf32, #tpu.memory_space<vmem>>, vector<1x256xf32>
      %383 = vector.shape_cast %382 : vector<1x256xf32> to vector<1x1x256xf32>
      %cst_160 = arith.constant dense<0.000000e+00> : vector<1xf32>
      %384 = vector.multi_reduction <add>, %383, %cst_160 [1, 2] : vector<1x1x256xf32> to vector<1xf32>
      %385 = vector.shape_cast %384 : vector<1xf32> to vector<1x1x1xf32>
      %386 = vector.extract %385[0, 0, 0] : f32 from vector<1x1x1xf32>
      %387 = vector.broadcast %386 : f32 to vector<1x1xf32>
      %388 = arith.divf %387, %381 : vector<1x1xf32>
      %389 = arith.addf %361, %388 : vector<1x1xf32>
      %cst_161 = arith.constant 1.000000e+01 : f32
      %390 = vector.broadcast %cst_161 : f32 to vector<1x1xf32>
      %391 = arith.mulf %390, %298 : vector<1x1xf32>
      %cst_162 = arith.constant 5.000000e-01 : f32
      %392 = vector.broadcast %cst_162 : f32 to vector<1x1xf32>
      %393 = arith.mulf %392, %389 : vector<1x1xf32>
      %394 = arith.addf %391, %393 : vector<1x1xf32>
      %395 = tpu.iota {dimensions = array<i32: 1>} : vector<1x128xi32>
      %c0_i32_163 = arith.constant 0 : i32
      %396 = vector.broadcast %c0_i32_163 : i32 to vector<1x128xi32>
      %397 = arith.cmpi eq, %395, %396 : vector<1x128xi32>
      %c1_i32 = arith.constant 1 : i32
      %398 = vector.broadcast %c1_i32 : i32 to vector<1x128xi32>
      %399 = arith.cmpi eq, %395, %398 : vector<1x128xi32>
      %c2_i32_164 = arith.constant 2 : i32
      %400 = vector.broadcast %c2_i32_164 : i32 to vector<1x128xi32>
      %401 = arith.cmpi eq, %395, %400 : vector<1x128xi32>
      %cst_165 = arith.constant 0.000000e+00 : f32
      %402 = vector.shape_cast %393 : vector<1x1xf32> to vector<1x1xf32>
      %403 = vector.broadcast %402 : vector<1x1xf32> to vector<1x128xf32>
      %404 = vector.broadcast %cst_165 : f32 to vector<1x128xf32>
      %405 = arith.select %401, %403, %404 : vector<1x128xi1>, vector<1x128xf32>
      %406 = vector.shape_cast %391 : vector<1x1xf32> to vector<1x1xf32>
      %407 = vector.broadcast %406 : vector<1x1xf32> to vector<1x128xf32>
      %408 = arith.select %399, %407, %405 : vector<1x128xi1>, vector<1x128xf32>
      %409 = vector.shape_cast %394 : vector<1x1xf32> to vector<1x1xf32>
      %410 = vector.broadcast %409 : vector<1x1xf32> to vector<1x128xf32>
      %411 = arith.select %397, %410, %408 : vector<1x128xi1>, vector<1x128xf32>
      %c0_166 = arith.constant 0 : index
      %c0_167 = arith.constant 0 : index
      %412 = vector.load %arg3[%c0_166, %c0_167] : memref<1x128xf32, #tpu.memory_space<vmem>>, vector<1x128xf32>
      tpu.vector_store %arg3[%c0_166, %c0_167], %411 {strides = array<i32>} : memref<1x128xf32, #tpu.memory_space<vmem>>, vector<1x128xf32>,
    } else {
    }
    return
  }
  func.func @transform_0(%arg0: i32) -> (i32, i32) {
    %c0_i32 = arith.constant 0 : i32
    %c0_i32_0 = arith.constant 0 : i32
    return %arg0, %c0_i32 : i32, i32
  }
  func.func @transform_1(%arg0: i32) -> (i32, i32) {
    %c0_i32 = arith.constant 0 : i32
    %c0_i32_0 = arith.constant 0 : i32
    return %arg0, %c0_i32 : i32, i32
  }
  func.func @transform_2(%arg0: i32) -> (i32, i32) {
    %c0_i32 = arith.constant 0 : i32
    %c0_i32_0 = arith.constant 0 : i32
    %c0_i32_1 = arith.constant 0 : i32
    return %c0_i32, %c0_i32_0 : i32, i32
  }
}

</mosaic_0001>

<bundles_post_ra>
// kernel: tpu_custom_call.1
= control target key start
LH: loop header
LB: loop body
LE: loop exit
PB: predicated region body
PF: predicated region fallthrough
CT: control target
= control target key end

     0   :  { %7 = vsyncpa [#allocation15], 0  ;;  %s6071_s0 = inlined_call_operand.hbm [shape: f32[120,256], index: 0, kind: input, shape index: {}]   ;;  %s6072_s1 = inlined_call_operand.hbm [shape: f32[120,256], index: 1, kind: input, shape index: {}]   ;;  %s6073_s2 = inlined_call_operand.hbm [shape: f32[1,128], index: 2, kind: output, shape index: {}]  }
   0x1   :  { %9 = vsyncpa [#allocation15 + $0x1], 0 }
   0x2   :  { %10 = vsyncpa [#allocation18], 0 }
   0x3   :  { %12 = vsyncpa [#allocation18 + $0x1], 0 }
   0x4   :  { %13 = vsyncpa [#allocation16], 0  ;;  %s3451_s9 = smov 0   ;;  %s3453_s10 = smov 0  }
   0x5   :  { %s3455_s11 = smov 0   ;;  %s3457_s12 = smov 0  }
   0x6 LB: > { %s3470_s13 = sadd.s32 4294967295, %s3420_s12   ;;  %s3473_s14 = sadd.s32 1, %s3420_s12   ;;  %s3420_s12 = sphi %s3457_s12, %s6709_s12   ;;  %s3416_s11 = sphi %s3455_s11, %s6708_s11   ;;  %s3412_s10 = sphi %s3453_s10, %s6707_s10   ;;  %s3408_s9 = sphi %s3451_s9, %s6706_s9  }
   0x7   : > { %s23_s15 = ssub.s32 %s3420_s12, %s3473_s14  ;;  %s26_s16 = sadd.s32 1, %s3416_s11 }
   0x8   : > { %p24_p0 = scmp.eq.s32.totalorder %s23_s15, 0  ;;  %p33_p1 = scmp.ne.s32.totalorder %s3416_s11, %s3412_s10 }
   0x9   : > { %p34_p2 = scmp.eq.s32.totalorder %s3420_s12, 0  ;;  %p39_p3 = scmp.ne.s32.totalorder %s3412_s10, %s3408_s9 }
   0xa   : > { %s3483_s17 = scalar_select %p24_p0, %s3416_s11, %s26_s16  }
   0xb   : > { %p3485_p4 = por %p34_p2, %p33_p1  ;;  %p40_p5 = scmp.eq.s32.totalorder %s3470_s13, 0 }
   0xc   : > { %p3008_p7 = scmp.ge.s32.totalorder %s3420_s12, 3 }
   0xd   : > { %p3490_p6 = por %p40_p5, %p39_p3 }
   0xe   : > { %106 = sbr.rel (%p3008_p7) target bundleno = 91 (0x5b), region = 16 }
  0x15   : > { %109 = sbr.rel (!%p3485_p4) target bundleno = 56 (0x38), region = 20  ;;  %s110_s20 = sand.u32 (%p3485_p4), 1, %s3416_s11  }
  0x16   : > { %s115_s21 = smul.u32 (%p3485_p4), 6, %s3420_s12  ;;  %s3502_s26 = scalar_lea.sflag (%p3485_p4), [#allocation15], %s110_s20 }
  0x17   : > { %s3083_s22 = smul.u32 (%p3485_p4), 96, %s110_s20 }
  0x18   : > { %s116_s23 = ssub.s32 (%p3485_p4), 15, %s115_s21 }
  0x19   : > { %p117_p8 = scmp.lt.s32.totalorder (%p3485_p4), %s116_s23, 6  ;;  %s114_s27 = scalar_lea.vmem (%p3485_p4), [#allocation14], %s3083_s22 }
  0x1c   : > { %s6711_s23 = smov (!%p117_p8, %s116_s23), 6 }
  0x1d   : > { %s3499_s24 = sshll.u32 %s6711_s23, 8 }
  0x1e   : > { %s122_s25 = ssub.s32 1536, %s3499_s24 }
  0x1f   : > { %123 = vsyncadd %s3502_s26, %s122_s25  ;;  %p3011_p9 = scmp.ne.s32.totalorder %s3499_s24, 0  ;;  %s3081_s28 = smul.u32 1536, %s3420_s12 }
  0x20   : > { %s129_s29 = sshll.u32 %s114_s27, 4  ;;  %s3300_s8 = scalar_lea.hbm %s6071_s0, 3840  ;;  %s3512_s29 = int_to_ptr.vmem [resolvable:$true] %s129_s29 }
  0x21   : > { %s3510_s4 = scalar_lea.hbm %s6071_s0, %s3081_s28 }
  0x22   : > { %s3296_s5 = scalar_lea.hbm %s3510_s4, %s3499_s24  ;;  %p3301_p13 = scmp.lt.u32.totalorder %s3510_s4, %s6071_s0 }
  0x23   : > { %p3297_p10 = scmp.ne.s32.totalorder %s3510_s4, %s3296_s5  ;;  %p3302_p0 = scmp.lt.u32.totalorder %s3300_s8, %s3296_s5 }
  0x24   : > { %p3304_p2 = scmp.lt.u32.totalorder %s3296_s5, %s3510_s4 }
  0x25   : > { %p3298_p11 = pnand %p3297_p10, %p3011_p9  ;;  %p3303_p1 = por %p3302_p0, %p3301_p13 }
  0x27   : > { %p3299_p12 = pneg %p3298_p11  ;;  %p3305_p3 = por %p3304_p2, %p3303_p1 }
  0x29   : > { %p3306_p5 = pnand %p3305_p3, %p3299_p12 }
  0x2b   : > { %3309 = shalt.err (!%p3306_p5)
}
  0x2c   : > { %s3310_s16 = scalar_lea.vmem %s3512_s29, %s3499_s24  ;;  %s3422_s20 = smov [#allocation14]  }
  0x2d   : > { %p3311_p7 = scmp.ne.s32.totalorder %s3512_s29, %s3310_s16  ;;  %s3314_s21 = sshll.u32 %s3422_s20, 4  ;;  %s3315_s21 = int_to_ptr.vmem [resolvable:$false] %s3314_s21 }
  0x2e   : > { %s3316_s22 = scalar_lea.vmem %s3315_s21, 3072  ;;  %p3317_p11 = scmp.lt.s32.totalorder %s3512_s29, %s3315_s21 }
  0x2f   : > { %p3312_p8 = pnand %p3311_p7, %p3011_p9  ;;  %p3318_p13 = scmp.lt.s32.totalorder %s3316_s22, %s3310_s16 }
  0x31   : > { %p3313_p10 = pneg %p3312_p8  ;;  %p3319_p0 = por %p3318_p13, %p3317_p11 }
  0x33   : > { %p3320_p1 = pnand %p3319_p0, %p3313_p10 }
  0x35   : > { %3323 = shalt.err (!%p3320_p1)
}
  0x36   : > { %s3423_s23 = smov 256   ;;  %s3424_s25 = smov 16  }
  0x37   : > { %135 = dma.hbm_to_vmem [thread:$0]  (%p3011_p9), %s3510_s4, %s3499_s24, %s3512_s29, %s3502_s26, %s3423_s23, %s3423_s23, %s3424_s25  }
  0x38 PF: > { %138 = sbr.rel (!%p3485_p4) target bundleno = 91 (0x5b), region = 24  ;;  %s139_s27 = sand.u32 (%p3485_p4), 1, %s3416_s11  }
  0x39   : > { %s144_s28 = smul.u32 (%p3485_p4), 6, %s3420_s12  ;;  %s3546_s7 = scalar_lea.sflag (%p3485_p4), [#allocation18], %s139_s27 }
  0x3a   : > { %s3084_s30 = smul.u32 (%p3485_p4), 96, %s139_s27 }
  0x3b   : > { %s145_s3 = ssub.s32 (%p3485_p4), 15, %s144_s28 }
  0x3c   : > { %p146_p12 = scmp.lt.s32.totalorder (%p3485_p4), %s145_s3, 6  ;;  %s143_s24 = scalar_lea.vmem (%p3485_p4), [#allocation17], %s3084_s30 }
  0x3f   : > { %s6713_s3 = smov (!%p146_p12, %s145_s3), 6 }
  0x40   : > { %s3543_s5 = sshll.u32 %s6713_s3, 8 }
  0x41   : > { %s151_s6 = ssub.s32 1536, %s3543_s5 }
  0x42   : > { %152 = vsyncadd %s3546_s7, %s151_s6  ;;  %p3018_p4 = scmp.ne.s32.totalorder %s3543_s5, 0  ;;  %s3082_s18 = smul.u32 1536, %s3420_s12 }
  0x43   : > { %s158_s26 = sshll.u32 %s143_s24, 4  ;;  %s3328_s20 = scalar_lea.hbm %s6072_s1, 3840  ;;  %s3556_s26 = int_to_ptr.vmem [resolvable:$true] %s158_s26 }
  0x44   : > { %s3554_s8 = scalar_lea.hbm %s6072_s1, %s3082_s18 }
  0x45   : > { %s3324_s9 = scalar_lea.hbm %s3554_s8, %s3543_s5  ;;  %p3329_p5 = scmp.lt.u32.totalorder %s3554_s8, %s6072_s1 }
  0x46   : > { %p3325_p9 = scmp.ne.s32.totalorder %s3554_s8, %s3324_s9  ;;  %p3330_p7 = scmp.lt.u32.totalorder %s3328_s20, %s3324_s9 }
  0x47   : > { %p3332_p10 = scmp.lt.u32.totalorder %s3324_s9, %s3554_s8 }
  0x48   : > { %p3326_p2 = pnand %p3325_p9, %p3018_p4  ;;  %p3331_p8 = por %p3330_p7, %p3329_p5 }
  0x4a   : > { %p3327_p3 = pneg %p3326_p2  ;;  %p3333_p11 = por %p3332_p10, %p3331_p8 }
  0x4c   : > { %p3334_p13 = pnand %p3333_p11, %p3327_p3 }
  0x4e   : > { %3337 = shalt.err (!%p3334_p13)
}
  0x4f   : > { %s3338_s23 = scalar_lea.vmem %s3556_s26, %s3543_s5  ;;  %s3425_s25 = smov [#allocation17]  }
  0x50   : > { %p3339_p0 = scmp.ne.s32.totalorder %s3556_s26, %s3338_s23  ;;  %s3342_s27 = sshll.u32 %s3425_s25, 4  ;;  %s3343_s27 = int_to_ptr.vmem [resolvable:$false] %s3342_s27 }
  0x51   : > { %s3344_s28 = scalar_lea.vmem %s3343_s27, 3072  ;;  %p3345_p9 = scmp.lt.s32.totalorder %s3556_s26, %s3343_s27 }
  0x52   : > { %p3340_p1 = pnand %p3339_p0, %p3018_p4  ;;  %p3346_p2 = scmp.lt.s32.totalorder %s3344_s28, %s3338_s23 }
  0x54   : > { %p3341_p12 = pneg %p3340_p1  ;;  %p3347_p5 = por %p3346_p2, %p3345_p9 }
  0x56   : > { %p3348_p7 = pnand %p3347_p5, %p3341_p12 }
  0x58   : > { %3351 = shalt.err (!%p3348_p7)
}
  0x59   : > { %s3426_s30 = smov 256   ;;  %s3427_s3 = smov 16  }
  0x5a   : > { %164 = dma.hbm_to_vmem [thread:$0]  (%p3018_p4), %s3554_s8, %s3543_s5, %s3556_s26, %s3546_s7, %s3426_s30, %s3426_s30, %s3427_s3  }
  0x5b PF: > { %p3023_p3 = scmp.ge.s32.totalorder %s3420_s12, 1  ;;  %p166_p8 = scmp.lt.s32.totalorder %s3420_s12, 4 }
  0x5d   : > { %p167_p10 = pnand %p3023_p3, %p166_p8 }
  0x5f   : > { %170 = sbr.rel (%p167_p10) target bundleno = 812 (0x32c), region = 28 }
  0x66   : > { %s172_s6 = sand.u32 1, %s3412_s10  }
  0x67   : > { %s3085_s24 = smul.u32 96, %s172_s6  ;;  %s173_s18 = scalar_lea.sflag [#allocation15], %s172_s6 }
  0x69   : > { %s3586_s29 = scalar_lea.vmem [#allocation14], %s3085_s24 }
  0x6a   : > { %3395 = dma.done.wait (%p3490_p6), %s173_s18, 1536  }
  0x6b   : > { %3397 = vsyncadd (%p3490_p6), %s173_s18, 4294965760  ;;  %s182_s5 = scalar_lea.sflag [#allocation18], %s172_s6  ;;  %s3592_s7 = scalar_lea.vmem [#allocation17], %s3085_s24 }
  0x6c   : > { %3399 = dma.done.wait (%p3490_p6), %s182_s5, 1536  }
  0x6d   : > { %3401 = vsyncadd (%p3490_p6), %s182_s5, 4294965760  ;;  %p3024_p4 = scmp.ne.s32.totalorder %s3470_s13, 0 }
  0x6e   : > { %v222_v0 = vlaneseq (!%p3024_p4)  ;;  %v3428_v1 = vmov (!%p3024_p4), 0.0  }
  0x6f   : > { %221 = sbr.rel (%p3024_p4) target bundleno = 120 (0x78), region = 40  ;;  %236 = vst [vmem:[#allocation12] sm:$0xff] (!%p3024_p4), %v3428_v1  ;;  %237 = vst [vmem:[#allocation12 + $0x8] sm:$0xff] (!%p3024_p4), %v3428_v1 }
  0x70   : > { %238 = vst [vmem:[#allocation12 + $0x10] sm:$0xff] (!%p3024_p4), %v3428_v1  ;;  %239 = vst [vmem:[#allocation12 + $0x18] sm:$0xff] (!%p3024_p4), %v3428_v1  ;;  %vm224_vm0 = vcmp.lt.s32.totalorder (!%p3024_p4), %v222_v0, 256 }
  0x71   : > { %240 = vst [vmem:[#allocation13] sm:$0xff] (!%p3024_p4), %v3428_v1  ;;  %241 = vst [vmem:[#allocation13 + $0x8] sm:$0xff] (!%p3024_p4), %v3428_v1 }
  0x72   : > { %242 = vst [vmem:[#allocation13 + $0x10] sm:$0xff] (!%p3024_p4), %v3428_v1  ;;  %243 = vst [vmem:[#allocation13 + $0x18] sm:$0xff] (!%p3024_p4), %v3428_v1 }
  0x73   : > { %226 = vst.msk [vmem:[#allocation2] sm:$0x3] (!%p3024_p4), %vm224_vm0, %v3428_v1  ;;  %227 = vst.msk [vmem:[#allocation3] sm:$0x3] (!%p3024_p4), %vm224_vm0, %v3428_v1 }
  0x74   : > { %228 = vst.msk [vmem:[#allocation4] sm:$0x3] (!%p3024_p4), %vm224_vm0, %v3428_v1  ;;  %229 = vst.msk [vmem:[#allocation5] sm:$0x3] (!%p3024_p4), %vm224_vm0, %v3428_v1 }
  0x75   : > { %230 = vst.msk [vmem:[#allocation6] sm:$0x3] (!%p3024_p4), %vm224_vm0, %v3428_v1  ;;  %231 = vst.msk [vmem:[#allocation7] sm:$0x3] (!%p3024_p4), %vm224_vm0, %v3428_v1 }
  0x76   : > { %232 = vst.msk [vmem:[#allocation8] sm:$0x3] %vm224_vm0, %v3428_v1  ;;  %233 = vst.msk [vmem:[#allocation9] sm:$0x3] %vm224_vm0, %v3428_v1 }
  0x77   : > { %234 = vst.msk [vmem:[#allocation10] sm:$0x3] %vm224_vm0, %v3428_v1  ;;  %235 = vst.msk [vmem:[#allocation11] sm:$0x3] %vm224_vm0, %v3428_v1 }
  0x78 PF: > { %p3025_p6 = scmp.le.s32.totalorder %s3470_s13, 0 }
  0x79   : > { %v248_v2 = vld [vmem:[#allocation12 + $0x60] sm:$0xff] (!%p3025_p6)  ;;  %v249_v3 = vld [vmem:[#allocation12 + $0x68] sm:$0xff] (!%p3025_p6)  ;;  %v250_v4 = vld [vmem:[#allocation12 + $0x70] sm:$0xff] (!%p3025_p6) }
  0x7a   : > { %247 = sbr.rel (%p3025_p6) target bundleno = 129 (0x81), region = 44  ;;  %252 = vst [vmem:[#allocation12] sm:$0xff] (!%p3025_p6), %v248_v2  ;;  %253 = vst [vmem:[#allocation12 + $0x8] sm:$0xff] (!%p3025_p6), %v249_v3  ;;  %v251_v5 = vld [vmem:[#allocation12 + $0x78] sm:$0xff] (!%p3025_p6)  ;;  %v256_v6 = vld [vmem:[#allocation13 + $0x60] sm:$0xff] (!%p3025_p6) }
  0x7b   : > { %254 = vst [vmem:[#allocation12 + $0x10] sm:$0xff] (!%p3025_p6), %v250_v4  ;;  %v257_v7 = vld [vmem:[#allocation13 + $0x68] sm:$0xff] (!%p3025_p6)  ;;  %255 = vst [vmem:[#allocation12 + $0x18] sm:$0xff] (!%p3025_p6), %v251_v5  ;;  %v258_v8 = vld [vmem:[#allocation13 + $0x70] sm:$0xff] (!%p3025_p6) }
  0x7c   : > { %260 = vst [vmem:[#allocation13] sm:$0xff] (!%p3025_p6), %v256_v6  ;;  %261 = vst [vmem:[#allocation13 + $0x8] sm:$0xff] (!%p3025_p6), %v257_v7  ;;  %v259_v9 = vld [vmem:[#allocation13 + $0x78] sm:$0xff] (!%p3025_p6) }
  0x7d   : > { %262 = vst [vmem:[#allocation13 + $0x10] sm:$0xff] (!%p3025_p6), %v258_v8  ;;  %263 = vst [vmem:[#allocation13 + $0x18] sm:$0xff] (!%p3025_p6), %v259_v9 }
  0x81 PF: > { %v280_v10 = vld [vmem:[%s3592_s7 + $0x20] sm:$0xff]  ;;  %v281_v11 = vld [vmem:[%s3592_s7 + $0x28] sm:$0xff]  ;;  %s324_s12 = smul.u32 48, %s3470_s13  ;;  %v6074_v12 = vlaneseq  ;;  %v282_v13 = vld [vmem:[%s3592_s7 + $0x30] sm:$0xff]  ;;  %v6075_v32 = vmov 0.0   ;;  %s3430_s26 = smov 2  }
  0x82   : > { %v283_v14 = vld [vmem:[%s3592_s7 + $0x38] sm:$0xff]  ;;  %vm292_vm1 = vcmp.gt.f32.partialorder %v280_v10, 0.0  ;;  %vm304_vm2 = vcmp.le.f32.partialorder %v280_v10, 10.0  ;;  %vm293_vm3 = vcmp.gt.f32.partialorder %v281_v11, 0.0  ;;  %vm294_vm4 = vcmp.gt.f32.partialorder %v282_v13, 0.0  ;;  %v268_v26 = vld [vmem:[%s3586_s29 + $0x20] sm:$0xff] }
  0x83   : > { %vm295_vm5 = vcmp.gt.f32.partialorder %v283_v14, 0.0  ;;  %vm305_vm6 = vcmp.le.f32.partialorder %v281_v11, 10.0  ;;  %s325_s19 = ssub.s32 120, %s324_s12  ;;  %vm306_vm7 = vcmp.le.f32.partialorder %v282_v13, 10.0  ;;  %v3606_v15 = vshrl.u32 %v6074_v12, 7  ;;  %vm3608_vm9 = vmand %vm292_vm1, %vm304_vm2  ;;  %v277_v29 = vld [vmem:[%s3592_s7 + $0x8] sm:$0xff] }
  0x84   : > { %v404_v16 = vadd.f32 0.001, %v280_v10  ;;  %v405_v17 = vadd.f32 0.001, %v281_v11  ;;  %vm307_vm8 = vcmp.le.f32.partialorder %v283_v14, 10.0  ;;  %v3612_v19 = vstv %s325_s19  ;;  %vm3614_vm10 = vmand %vm293_vm3, %vm305_vm6  ;;  %v279_v30 = vld [vmem:[%s3592_s7 + $0x18] sm:$0xff] }
  0x85   : > { %6274 = vst [vmem:[#allocation23_spill] sm:$0xff] %v3606_v15  ;;  %v406_v20 = vadd.f32 0.001, %v282_v13  ;;  %v407_v21 = vadd.f32 0.001, %v283_v14  ;;  %v3619_v23 = vadd.s32 16, %v3606_v15  ;;  %vm3625_vm11 = vmand %vm294_vm4, %vm306_vm7  ;;  %v3930_v39 = vcvt.s32.f32 %v3606_v15 }
  0x86   : > { %v3622_v24 = vadd.s32 24, %v3606_v15  ;;  %3188 = vrcp.f32 %v404_v16  ;;  %vm3631_vm12 = vmand %vm295_vm5, %vm307_vm8  ;;  %v269_v34 = vld [vmem:[%s3586_s29 + $0x28] sm:$0xff]  ;;  %v270_v35 = vld [vmem:[%s3586_s29 + $0x30] sm:$0xff]  ;;  %v392_v36 = vadd.f32 0.001, %v268_v26  ;;  %vm289_vm1 = vcmp.gt.f32.partialorder %v277_v29, 0.0 }
  0x87   : > { %3190 = vrcp.f32 %v405_v17  ;;  %vm336_vm13 = vcmp.lt.s32.totalorder %v3619_v23, %v3612_v19  ;;  %vm291_vm3 = vcmp.gt.f32.partialorder %v279_v30, 0.0  ;;  %vm301_vm4 = vcmp.le.f32.partialorder %v277_v29, 10.0  ;;  %v276_v43 = vld [vmem:[%s3592_s7] sm:$0xff]  ;;  %v271_v45 = vld [vmem:[%s3586_s29 + $0x38] sm:$0xff]  ;;  %v278_v48 = vld [vmem:[%s3592_s7 + $0x10] sm:$0xff]  ;;  %s3432_s4 = smov 4  }
  0x88   : > { %vm337_vm14 = vcmp.lt.s32.totalorder %v3622_v24, %v3612_v19  ;;  %3192 = vrcp.f32 %v406_v20  ;;  %vm3641_vm15 = vmand %vm3608_vm9, %vm336_vm13  ;;  %vm303_vm5 = vcmp.le.f32.partialorder %v279_v30, 10.0  ;;  %v3671_v38 = vadd.s32 8, %v3606_v15  ;;  %v265_v51 = vld [vmem:[%s3586_s29 + $0x8] sm:$0xff]  ;;  %v267_v57 = vld [vmem:[%s3586_s29 + $0x18] sm:$0xff]  ;;  %s3433_s8 = smov 8   ;;  %s3434_s9 = smov 12  }
  0x89   : > { %3194 = vrcp.f32 %v407_v21  ;;  %vm3649_vm0 = vmand %vm3614_vm10, %vm336_vm13  ;;  %v3656_v33 = vsel %vm3641_vm15, 1.0, %v6075_v32  ;;  %v401_v41 = vadd.f32 0.001, %v277_v29  ;;  %v403_v42 = vadd.f32 0.001, %v279_v30  ;;  %v264_v1 = vld [vmem:[%s3586_s29] sm:$0xff] }
  0x8a   : > { %vm3665_vm2 = vmand %vm3625_vm11, %vm337_vm14  ;;  %633 = vst [vmem:[#allocation13 + $0x40] sm:$0xff] %v3656_v33  ;;  %v393_v46 = vadd.f32 0.001, %v269_v34  ;;  %v394_v47 = vadd.f32 0.001, %v270_v35  ;;  %vm335_vm8 = vcmp.lt.s32.totalorder %v3671_v38, %v3612_v19  ;;  %vm334_vm10 = vcmp.lt.s32.totalorder %v3606_v15, %v3612_v19  ;;  %v284_v17 = vld [vmem:[%s3592_s7 + $0x40] sm:$0xff] }
  0x8b   : > { %vm3678_vm6 = vmand %vm3631_vm12, %vm337_vm14  ;;  %v3685_v40 = vsel %vm3665_vm2, 1.0, %v6075_v32  ;;  %3196 = vrcp.f32 %v401_v41  ;;  %vm288_vm11 = vcmp.gt.f32.partialorder %v276_v43, 0.0  ;;  %vm290_vm12 = vcmp.gt.f32.partialorder %v278_v48, 0.0  ;;  %v266_v21 = vld [vmem:[%s3586_s29 + $0x10] sm:$0xff]  ;;  %v285_v22 = vld [vmem:[%s3592_s7 + $0x48] sm:$0xff]  ;;  %p3070_p11 = scmp.ne.s32.totalorder %s3470_s13, 2 }
  0x8c   : > { %635 = vst [vmem:[#allocation13 + $0x50] sm:$0xff] %v3685_v40  ;;  %v3163_v44 = vpack.i.bf16 %v3685_v40, %v3656_v33  ;;  %vm313_vm7 = vmand %vm289_vm1, %vm301_vm4  ;;  %3198 = vrcp.f32 %v403_v42  ;;  %vm300_vm14 = vcmp.le.f32.partialorder %v276_v43, 10.0  ;;  %vm302_vm1 = vcmp.le.f32.partialorder %v278_v48, 10.0  ;;  %v286_v25 = vld [vmem:[%s3592_s7 + $0x50] sm:$0xff]  ;;  %v287_v28 = vld [vmem:[%s3592_s7 + $0x58] sm:$0xff] }
  0x8d   : > { %vm3698_vm9 = vmand %vm291_vm3, %vm303_vm5  ;;  %v400_v52 = vadd.f32 0.001, %v276_v43  ;;  %v395_v54 = vadd.f32 0.001, %v271_v45  ;;  %v402_v58 = vadd.f32 0.001, %v278_v48  ;;  %v3878_v10 = vcvt.s32.f32 %v3671_v38 }
  0x8e   : > { %3164 = vrot.lane.b32.xlu1 %v3163_v44, %s3430_s26  ;;  %vm3708_vm13 = vmand %vm313_vm7, %vm334_vm10  ;;  %v389_v5 = vadd.f32 0.001, %v265_v51  ;;  %v391_v6 = vadd.f32 0.001, %v267_v57  ;;  %v388_v16 = vadd.f32 0.001, %v264_v1 }
  0x8f   : > { %vm3718_vm3 = vmand %vm3698_vm9, %vm335_vm8  ;;  %v3725_v56 = vsel %vm3708_vm13, 1.0, %v6075_v32  ;;  %3200 = vrcp.f32 %v400_v52  ;;  %v3787_v29 = vadd.s32 32, %v3606_v15  ;;  %v390_v35 = vadd.f32 0.001, %v266_v21  ;;  %v272_v38 = vld [vmem:[%s3586_s29 + $0x40] sm:$0xff]  ;;  %v275_v42 = vld [vmem:[%s3586_s29 + $0x58] sm:$0xff] }
  0x90   : > { %v3189_v53 = vpop.eup %3188  ;;  %v3731_v61 = vsel %vm3718_vm3, 1.0, %v6075_v32  ;;  %630 = vst [vmem:[#allocation13 + $0x28] sm:$0xff] %v3725_v56  ;;  %vm312_vm4 = vmand %vm288_vm11, %vm300_vm14  ;;  %3202 = vrcp.f32 %v402_v58  ;;  %vm309_vm11 = vcmp.le.f32.partialorder %v285_v22, 10.0  ;;  %vm299_vm14 = vcmp.gt.f32.partialorder %v287_v28, 0.0 }
  0x91   : > { %v3191_v59 = vpop.eup %3190  ;;  %v421_v60 = vmul.f32 %v3189_v53, %v392_v36  ;;  %632 = vst [vmem:[#allocation13 + $0x38] sm:$0xff] %v3731_v61  ;;  %v3173_v0 = vpack.i.bf16 %v3731_v61, %v3725_v56  ;;  %vm314_vm5 = vmand %vm290_vm12, %vm302_vm1  ;;  %vm310_vm12 = vcmp.le.f32.partialorder %v286_v25, 10.0  ;;  %v3795_v37 = vadd.s32 40, %v3606_v15 }
  0x92   : > { %v3193_v62 = vpop.eup %3192  ;;  %v423_v63 = vmul.f32 %v3191_v59, %v393_v46  ;;  %vm3746_vm7 = vmand %vm312_vm4, %vm334_vm10  ;;  %vm308_vm10 = vcmp.le.f32.partialorder %v284_v17, 10.0  ;;  %vm311_vm4 = vcmp.le.f32.partialorder %v287_v28, 10.0  ;;  %vm338_vm9 = vcmp.lt.s32.totalorder %v3787_v29, %v3612_v19 }
  0x93   : > { %v3195_v2 = vpop.eup %3194  ;;  %v425_v3 = vmul.f32 %v3193_v62, %v394_v47  ;;  %v440_v4 = vsel %vm3641_vm15, %v421_v60, 1.0  ;;  %3174 = vrot.lane.b32.xlu1 %v3173_v0, %s3430_s26  ;;  %vm3756_vm15 = vmand %vm314_vm5, %vm335_vm8  ;;  %v3763_v11 = vsel %vm3746_vm7, 1.0, %v6075_v32  ;;  %vm297_vm8 = vcmp.gt.f32.partialorder %v285_v22, 0.0 }
  0x94   : > { %v427_v8 = vmul.f32 %v3195_v2, %v395_v54  ;;  %v441_v9 = vsel %vm3649_vm0, %v423_v63, 1.0  ;;  %3204 = vlog2.f32 %v440_v4  ;;  %6301 = vst [vmem:[#allocation24_spill] sm:$0xff] %v3763_v11  ;;  %v3770_v14 = vsel %vm3756_vm15, 1.0, %v6075_v32  ;;  %629 = vst [vmem:[#allocation13 + $0x20] sm:$0xff] %v3763_v11 }
  0x95   : > { %v442_v13 = vsel %vm3665_vm2, %v425_v3, 1.0  ;;  %3206 = vlog2.f32 %v441_v9  ;;  %6302 = vst [vmem:[#allocation25_spill] sm:$0xff] %v3770_v14  ;;  %631 = vst [vmem:[#allocation13 + $0x30] sm:$0xff] %v3770_v14  ;;  %v3158_v20 = vpack.i.bf16 %v3770_v14, %v3763_v11  ;;  %vm296_vm2 = vcmp.gt.f32.partialorder %v284_v17, 0.0  ;;  %v3197_v26 = vpop.eup %3196 }
  0x96   : > { %v443_v18 = vsel %vm3678_vm6, %v427_v8, 1.0  ;;  %3208 = vlog2.f32 %v442_v13  ;;  %v473_v27 = vadd.f32 %v3770_v14, %v3763_v11  ;;  %v3199_v30 = vpop.eup %3198  ;;  %v415_v34 = vmul.f32 %v3197_v26, %v389_v5  ;;  %vm3790_vm1 = vmand %vm296_vm2, %vm308_vm10 }
  0x97   : > { %3210 = vlog2.f32 %v443_v18  ;;  %3159 = vrot.lane.b32.xlu0 %v3158_v20, %s3430_s26  ;;  %v419_v41 = vmul.f32 %v3199_v30, %v391_v6  ;;  %vm3798_vm5 = vmand %vm297_vm8, %vm309_vm11  ;;  %v408_v43 = vadd.f32 0.001, %v284_v17  ;;  %vm6307_vm2 = vcmp.gt.f32.partialorder %v286_v25, 0.0 }
  0x98   : > { %v437_v45 = vsel %vm3708_vm13, %v415_v34, 1.0  ;;  %vm3808_vm10 = vmand %vm6307_vm2, %vm310_vm12  ;;  %vm339_vm8 = vcmp.lt.s32.totalorder %v3795_v37, %v3612_v19  ;;  %v474_v51 = vadd.f32 %v3656_v33, %v473_v27  ;;  %v409_v55 = vadd.f32 0.001, %v285_v22  ;;  %v274_v34 = vld [vmem:[%s3586_s29 + $0x50] sm:$0xff] }
  0x99   : > { %v3201_v44 = vpop.eup %3200  ;;  %v439_v48 = vsel %vm3718_vm3, %v419_v41, 1.0  ;;  %3212 = vlog2.f32 %v437_v45  ;;  %vm3822_vm13 = vmand %vm3790_vm1, %vm338_vm9  ;;  %v410_v60 = vadd.f32 0.001, %v286_v25  ;;  %v411_v62 = vadd.f32 0.001, %v287_v28  ;;  %v273_v25 = vld [vmem:[%s3586_s29 + $0x48] sm:$0xff] }
  0x9a   : > { %v3203_v47 = vpop.eup %3202  ;;  %v413_v49 = vmul.f32 %v3201_v44, %v388_v16  ;;  %3214 = vlog2.f32 %v439_v48  ;;  %vm3828_vm11 = vmand %vm299_vm14, %vm311_vm4  ;;  %v3835_v54 = vsel %vm3822_vm13, 1.0, %v6075_v32  ;;  %v484_v5 = vadd.f32 %v3731_v61, %v3725_v56 }
  0x9b   : > { %v417_v52 = vmul.f32 %v3203_v47, %v390_v35  ;;  %vm3844_vm3 = vmand %vm3808_vm10, %vm339_vm8  ;;  %3216 = vrcp.f32 %v408_v43  ;;  %637 = vst [vmem:[#allocation13 + $0x60] sm:$0xff] %v3835_v54  ;;  %v475_v13 = vadd.f32 %v3685_v40, %v474_v51  ;;  %v3913_v20 = vsel %vm3649_vm0, 1.0, %v6075_v32 }
  0x9c   : > { %v436_v58 = vsel %vm3746_vm7, %v413_v49, 1.0  ;;  %v3856_v2 = vsel %vm3844_vm3, 1.0, %v6075_v32  ;;  %vm3867_vm7 = vmand %vm3798_vm5, %vm338_vm9  ;;  %v3919_v21 = vsel %vm3678_vm6, 1.0, %v6075_v32  ;;  %v485_v22 = vadd.f32 %v3913_v20, %v484_v5  ;;  %634 = vst [vmem:[#allocation13 + $0x48] sm:$0xff] %v3913_v20 }
  0x9d   : > { %v438_v1 = vsel %vm3756_vm15, %v417_v52, 1.0  ;;  %3218 = vlog2.f32 %v436_v58  ;;  %639 = vst [vmem:[#allocation13 + $0x70] sm:$0xff] %v3856_v2  ;;  %v3168_v7 = vpack.i.bf16 %v3856_v2, %v3835_v54  ;;  %vm3886_vm15 = vmand %vm3828_vm11, %vm339_vm8  ;;  %v3900_v19 = vsel %vm3867_vm7, 1.0, %v6075_v32 }
  0x9e   : > { %v3205_v57 = vpop.eup %3204  ;;  %3220 = vlog2.f32 %v438_v1  ;;  %v3905_v18 = vsel %vm3886_vm15, 1.0, %v6075_v32  ;;  %638 = vst [vmem:[#allocation13 + $0x68] sm:$0xff] %v3900_v19  ;;  %v396_v26 = vadd.f32 0.001, %v272_v38  ;;  %v476_v27 = vadd.f32 %v3835_v54, %v475_v13  ;;  %636 = vst [vmem:[#allocation13 + $0x58] sm:$0xff] %v3919_v21 }
  0x9f   : > { %v3207_v63 = vpop.eup %3206  ;;  %v3849_v0 = vmul.f32 0.6931472, %v3205_v57  ;;  %3222 = vrcp.f32 %v409_v55  ;;  %3169 = vrot.lane.b32.xlu0 %v3168_v7, %s3430_s26  ;;  %640 = vst [vmem:[#allocation13 + $0x78] sm:$0xff] %v3905_v18  ;;  %v1093_v31 = vmul.f32 0.5, %v3878_v10  ;;  %v3933_v30 = vcvt.s32.f32 %v3619_v23 }
  0xa0   : > { %v3209_v3 = vpop.eup %3208  ;;  %v3858_v4 = vmul.f32 0.6931472, %v3207_v63  ;;  %3224 = vrcp.f32 %v410_v60  ;;  %v486_v35 = vadd.f32 %v3919_v21, %v485_v22  ;;  %v1092_v44 = vmul.f32 0.5, %v3930_v39 }
  0xa1   : > { %6316 = vst [vmem:[#allocation26_spill] sm:$0xff] %v3849_v0  ;;  %v3211_v8 = vpop.eup %3210  ;;  %v3874_v9 = vmul.f32 0.6931472, %v3209_v3  ;;  %621 = vst [vmem:[#allocation12 + $0x40] sm:$0xff] %v3849_v0  ;;  %656 = vrot.lane.b32.xlu1 %v3849_v0, %s3430_s26  ;;  %3226 = vrcp.f32 %v411_v62  ;;  %v1099_v43 = vadd.f32 0.5, %v1093_v31  ;;  %v3942_v46 = vcvt.s32.f32 %v3622_v24 }
  0xa2   : > { %v3892_v17 = vmul.f32 0.6931472, %v3211_v8  ;;  %622 = vst [vmem:[#allocation12 + $0x48] sm:$0xff] %v3858_v4  ;;  %v397_v48 = vadd.f32 0.001, %v273_v25  ;;  %v487_v23 = vadd.f32 %v3900_v19, %v486_v35  ;;  %v477_v53 = vadd.f32 %v3856_v2, %v476_v27 }
  0xa3   : > { %623 = vst [vmem:[#allocation12 + $0x50] sm:$0xff] %v3874_v9  ;;  %v3213_v28 = vpop.eup %3212  ;;  %6322 = vst [vmem:[#allocation28_spill] sm:$0xff] %v3942_v46  ;;  %v398_v51 = vadd.f32 0.001, %v274_v34  ;;  %v1098_v55 = vadd.f32 0.5, %v1092_v44  ;;  %v1094_v62 = vmul.f32 0.5, %v3933_v30  ;;  %v1105_v5 = vfloor.f32 %v1099_v43 }
  0xa4   : > { %6321 = vst [vmem:[#allocation27_spill] sm:$0xff] %v3892_v17  ;;  %624 = vst [vmem:[#allocation12 + $0x58] sm:$0xff] %v3892_v17  ;;  %v3215_v36 = vpop.eup %3214  ;;  %v3937_v41 = vmul.f32 0.6931472, %v3213_v28  ;;  %v399_v24 = vadd.f32 0.001, %v275_v42  ;;  %v488_v60 = vadd.f32 %v3905_v18, %v487_v23 }
  0xa5   : > { %658 = vrot.lane.b32.xlu1 %v3874_v9, %s3430_s26  ;;  %v3217_v45 = vpop.eup %3216  ;;  %v3944_v47 = vmul.f32 0.6931472, %v3215_v36  ;;  %v1104_v13 = vfloor.f32 %v1098_v55  ;;  %v1095_v38 = vmul.f32 0.5, %v3942_v46  ;;  %v1100_v28 = vadd.f32 0.5, %v1094_v62 }
  0xa6   : > { %618 = vst [vmem:[#allocation12 + $0x28] sm:$0xff] %v3937_v41  ;;  %v429_v52 = vmul.f32 %v3217_v45, %v396_v26  ;;  %v478_v26 = vrot.slane %v477_v53, 4  ;;  %v489_v31 = vrot.slane %v488_v60, 4  ;;  %v1111_v35 = vmul.f32 2.0, %v1105_v5 }
  0xa7   : > { %v3219_v49 = vpop.eup %3218  ;;  %620 = vst [vmem:[#allocation12 + $0x38] sm:$0xff] %v3944_v47  ;;  %v1110_v42 = vmul.f32 2.0, %v1104_v13  ;;  %v1101_v43 = vadd.f32 0.5, %v1095_v38  ;;  %v1106_v45 = vfloor.f32 %v1100_v28  ;;  %v3431_v38 = vmov 1966171168  }
  0xa8   : > { %v3221_v57 = vpop.eup %3220  ;;  %v3950_v58 = vmul.f32 0.6931472, %v3219_v49  ;;  %v444_v3 = vsel %vm3822_vm13, %v429_v52, 1.0  ;;  %v479_v44 = vadd.f32 %v478_v26, %v477_v53  ;;  %v490_v6 = vadd.f32 %v489_v31, %v488_v60 }
  0xa9   : > { %v3223_v63 = vpop.eup %3222  ;;  %v3954_v1 = vmul.f32 0.6931472, %v3221_v57  ;;  %3228 = vlog2.f32 %v444_v3  ;;  %v1116_v59 = vsub.f32 %v3930_v39, %v1110_v42  ;;  %v1107_v23 = vfloor.f32 %v1101_v43 }
  0xaa   : > { %6323 = vst [vmem:[#allocation29_spill] sm:$0xff] %v3950_v58  ;;  %v3225_v7 = vpop.eup %3224  ;;  %617 = vst [vmem:[#allocation12 + $0x20] sm:$0xff] %v3950_v58  ;;  %v431_v8 = vmul.f32 %v3223_v63, %v397_v48  ;;  %652 = vrot.lane.b32.xlu0 %v3950_v58, %s3430_s26  ;;  %v1117_v48 = vsub.f32 %v3878_v10, %v1111_v35  ;;  %v1112_v49 = vmul.f32 2.0, %v1106_v45  ;;  %v491_v16 = vrot.slane %v490_v6, 2 }
  0xab   : > { %6324 = vst [vmem:[#allocation30_spill] sm:$0xff] %v3954_v1  ;;  %v3227_v22 = vpop.eup %3226  ;;  %619 = vst [vmem:[#allocation12 + $0x30] sm:$0xff] %v3954_v1  ;;  %v433_v25 = vmul.f32 %v3225_v7, %v398_v51  ;;  %v480_v51 = vrot.slane %v479_v44, 2  ;;  %v1113_v62 = vmul.f32 2.0, %v1107_v23  ;;  %v3977_v53 = vcvt.s32.f32 %v3795_v37 }
  0xac   : > { %v435_v27 = vmul.f32 %v3227_v22, %v399_v24  ;;  %v445_v50 = vsel %vm3867_vm7, %v431_v8, 1.0  ;;  %v1123_v57 = vand.u32 2147483647, %v1117_v48  ;;  %v1122_v24 = vand.u32 2147483647, %v1116_v59 }
  0xad   : > { %v446_v34 = vsel %vm3844_vm3, %v433_v25, 1.0  ;;  %3230 = vlog2.f32 %v445_v50  ;;  %v1118_v63 = vsub.f32 %v3933_v30, %v1112_v49  ;;  %6326 = vst [vmem:[#allocation32_spill] sm:$0xff] %v3977_v53  ;;  %v481_v60 = vadd.f32 %v480_v51, %v479_v44 }
  0xae   : > { %v447_v36 = vsel %vm3886_vm15, %v435_v27, 1.0  ;;  %3232 = vlog2.f32 %v446_v34  ;;  %654 = vrot.lane.b32.xlu0 %v3954_v1, %s3430_s26  ;;  %v492_v8 = vadd.f32 %v491_v16, %v490_v6  ;;  %v499_v22 = vunpack.c.l.s4 %v3431_v38 }
  0xaf   : > { %3234 = vlog2.f32 %v447_v36  ;;  %v3985_v25 = vcvt.s32.f32 %v3787_v29  ;;  %vm1129_vm0 = vcmp.lt.f32.partialorder %v1123_v57, 0.5  ;;  %vm1128_vm6 = vcmp.lt.f32.partialorder %v1122_v24, 0.5 }
  0xb0   : > { %v1119_v27 = vsub.f32 %v3942_v46, %v1113_v62  ;;  %v1124_v50 = vand.u32 2147483647, %v1118_v63  ;;  %v482_v31 = vrot.slane %v481_v60, 1  ;;  %v1097_v29 = vmul.f32 0.5, %v3977_v53  ;;  %v1344_v62 = vld [vmem:[#allocation12 + $0x10] sm:$0xf0] }
  0xb1   : > { %6328 = vst [vmem:[#allocation34_spill] sm:$0xff] %v3985_v25  ;;  %v493_v28 = vrot.slane %v492_v8, 1  ;;  %v4001_v34 = vsel %vm1129_vm0, 1.0, %v6075_v32  ;;  %v500_v35 = vunpack.c.0.s8 %v499_v22  ;;  %v4004_v36 = vand.u32 127, %v6074_v12 }
  0xb2   : > { %v4007_v42 = vsel %vm1128_vm6, 1.0, %v6075_v32  ;;  %vm1372_vm9 = vcmask 1043456   ;;  %v1125_v43 = vand.u32 2147483647, %v1119_v27  ;;  %vm1130_vm12 = vcmp.lt.f32.partialorder %v1124_v50, 0.5 }
  0xb3   : > { %v3229_v52 = vpop.eup %3228  ;;  %6330 = vst [vmem:[#allocation36_spill] sm:$0xff] %v4004_v36  ;;  %v1103_v44 = vadd.f32 0.5, %v1097_v29  ;;  %v1096_v6 = vmul.f32 0.5, %v3985_v25  ;;  %v483_v45 = vadd.f32 %v482_v31, %v481_v60  ;;  %v4016_v48 = vmul.f32 %v4001_v34, %v3770_v14 }
  0xb4   : > { %v3973_v55 = vmul.f32 0.6931472, %v3229_v52  ;;  %v1375_v59 = vrot.slane %v3954_v1, 4  ;;  %v4020_v23 = vrot.slane %v3950_v58, 4  ;;  %v494_v49 = vadd.f32 %v493_v28, %v492_v8 }
  0xb5   : > { %6331 = vst [vmem:[#allocation37_spill] sm:$0xff] %v4016_v48  ;;  %v4024_v51 = vmul.f32 %v4007_v42, %v3763_v11  ;;  %v1109_v52 = vfloor.f32 %v1103_v44  ;;  %v1102_v16 = vadd.f32 0.5, %v1096_v6  ;;  %v4027_v57 = vsel %vm1130_vm12, 1.0, %v6075_v32 }
  0xb6   : > { %6325 = vst [vmem:[#allocation31_spill] sm:$0xff] %v3973_v55  ;;  %625 = vst [vmem:[#allocation12 + $0x60] sm:$0xff] %v3973_v55  ;;  %660 = vrot.lane.b32.xlu0 %v3973_v55, %s3430_s26  ;;  %vm1131_vm14 = vcmp.lt.f32.partialorder %v1125_v43, 0.5  ;;  %v4032_v60 = vsub.s32 %v500_v35, %v3606_v15  ;;  %v643_v8 = vadd.s32 128, %v4004_v36  ;;  %v497_v38 = vcombine.low %v483_v45, %v494_v49 }
  0xb7   : > { %v3231_v3 = vpop.eup %3230  ;;  %6332 = vst [vmem:[#allocation38_spill] sm:$0xff] %v4020_v23  ;;  %6333 = vst [vmem:[#allocation39_spill] sm:$0xff] %v4024_v51  ;;  %v1159_v24 = vadd.f32 %v4016_v48, %v4024_v51  ;;  %v1115_v63 = vmul.f32 2.0, %v1109_v52  ;;  %v4047_v22 = vmul.f32 %v4027_v57, %v3656_v33  ;;  %v1451_v31 = vrot.slane %v4016_v48, 4 }
  0xb8   : > { %v3233_v5 = vpop.eup %3232  ;;  %v3982_v7 = vmul.f32 0.6931472, %v3231_v3  ;;  %v1108_v3 = vfloor.f32 %v1102_v16  ;;  %6334 = vst [vmem:[#allocation40_spill] sm:$0xff] %v4032_v60  ;;  %v1449_v29 = vrot.slane %v4024_v51, 4  ;;  %v1409_v28 = vsub.f32 %v1344_v62, %v4020_v23 }
  0xb9   : > { %v3235_v13 = vpop.eup %3234  ;;  %v3987_v26 = vmul.f32 0.6931472, %v3233_v5  ;;  %v3178_v5 = vpack.i.bf16 %v3919_v21, %v3913_v20  ;;  %6336 = vst [vmem:[#allocation42_spill] sm:$0xff] %v4047_v22  ;;  %v1121_v27 = vsub.f32 %v3977_v53, %v1115_v63  ;;  %v4055_v35 = vsel %vm1131_vm14, 1.0, %v6075_v32 }
  0xba   : > { %6327 = vst [vmem:[#allocation33_spill] sm:$0xff] %v3982_v7  ;;  %v3989_v37 = vmul.f32 0.6931472, %v3235_v13  ;;  %626 = vst [vmem:[#allocation12 + $0x68] sm:$0xff] %v3982_v7  ;;  %664 = vrot.lane.b32.xlu0 %v3937_v41, %s3430_s26  ;;  %v4043_v13 = vsel %vm1372_vm9, %v4020_v23, %v1375_v59  ;;  %v1114_v50 = vmul.f32 2.0, %v1108_v3  ;;  %v1160_v6 = vadd.f32 %v1159_v24, %v4047_v22 }
  0xbb   : > { %6329 = vst [vmem:[#allocation35_spill] sm:$0xff] %v3987_v26  ;;  %627 = vst [vmem:[#allocation12 + $0x70] sm:$0xff] %v3987_v26  ;;  %662 = vrot.lane.b32.xlu1 %v3987_v26, %s3430_s26  ;;  %v1411_v44 = vsub.f32 %v3950_v58, %v4043_v13  ;;  %v1127_v45 = vand.u32 2147483647, %v1121_v27  ;;  %v3183_v52 = vpack.i.bf16 %v3905_v18, %v3900_v19  ;;  %v4067_v43 = vcvt.s32.f32 %v4004_v36  ;;  %v1358_v27 = vld [vmem:[#allocation13 + $0x10] sm:$0xf0] }
  0xbc   : > { %628 = vst [vmem:[#allocation12 + $0x78] sm:$0xff] %v3989_v37  ;;  %6335 = vst [vmem:[#allocation41_spill] sm:$0xff] %v4043_v13  ;;  %v1120_v49 = vsub.f32 %v3985_v25, %v1114_v50  ;;  %v1379_v16 = vrot.slane %v3849_v0, 4  ;;  %v504_v62 = vrot.slane %v497_v38, %v4032_v60  ;;  %v4073_v24 = vmul.f32 %v4055_v35, %v3685_v40 }
  0xbd   : > { %6337 = vst [vmem:[#allocation43_spill] sm:$0xff] %v4067_v43  ;;  %vm1133_vm1 = vcmp.lt.f32.partialorder %v1127_v45, 0.5  ;;  %v4075_v3 = vcvt.s32.f32 %v643_v8  ;;  %v1452_v50 = vsel %vm1372_vm9, %v1449_v29, %v1451_v31  ;;  %v1423_v12 = vand.u32 2147483647, %v1409_v28 }
  0xbe   : > { %668 = vrot.lane.b32.xlu0 %v3858_v4, %s3430_s26  ;;  %6338 = vst [vmem:[#allocation44_spill] sm:$0xff] %v4073_v24  ;;  %v1126_v63 = vand.u32 2147483647, %v1120_v49  ;;  %v1425_v32 = vand.u32 2147483647, %v1411_v44  ;;  %v1161_v15 = vadd.f32 %v1160_v6, %v4073_v24  ;;  %v4084_v40 = vsel %vm1372_vm9, %v1375_v59, %v1379_v16 }
  0xbf   : > { %666 = vrot.lane.b32.xlu1 %v3944_v47, %s3430_s26  ;;  %6339 = vst [vmem:[#allocation45_spill] sm:$0xff] %v4075_v3  ;;  %6340 = vst [vmem:[#allocation46_spill] sm:$0xff] %v4084_v40  ;;  %v1455_v8 = vrot.slane %v4047_v22, 4  ;;  %v6341_v38 = vmov 0.0   ;;  %v511_v28 = vrot.slane %v504_v62, %v4032_v60  ;;  %v1485_v44 = vmul.f32 %v1449_v29, %v1358_v27 }
  0xc0   : > { %vm1132_vm4 = vcmp.lt.f32.partialorder %v1126_v63, 0.5  ;;  %v4088_v45 = vsel %vm1133_vm1, 1.0, %v6341_v38  ;;  %v1487_v6 = vmul.f32 %v3763_v11, %v1452_v50  ;;  %v472_v63 = vld [vmem:[#allocation2] sm:$0x3]  ;;  %v1413_v25 = vsub.f32 %v3954_v1, %v4084_v40 }
  0xc1   : > { %v4091_v49 = vsel %vm1132_vm4, 1.0, %v6341_v38  ;;  %v4107_v13 = vmul.f32 %v4088_v45, %v3856_v2  ;;  %v513_v62 = vadd.f32 %v511_v28, %v472_v63  ;;  %v1499_v27 = vmul.f32 %v1485_v44, %v1423_v12 }
  0xc2   : > { %672 = vrot.lane.b32.xlu0 %v3982_v7, %s3430_s26  ;;  %v4115_v50 = vmul.f32 %v1487_v6, %v1425_v32  ;;  %v4126_v23 = vmul.f32 %v4007_v42, %v3725_v56  ;;  %v1427_v46 = vand.u32 2147483647, %v1413_v25  ;;  %v6349_v44 = vlaneseq }
  0xc3   : > { %670 = vrot.lane.b32.xlu1 %v3892_v17, %s3430_s26  ;;  %6344 = vst [vmem:[#allocation49_spill] sm:$0xff] %v4107_v13  ;;  %v6350_v25 = vmov 0  ;;  %v1527_v6 = vrot.slane %v1499_v27, 4  ;;  %v1356_v27 = vld [vmem:[#allocation12 + $0x70] sm:$0xf]  ;;  %v571_v36 = vmul.f32 %v3973_v55, %v3973_v55  ;;  %vm835_vm7 = vcmask 1045504  }
  0xc4   : > { %6345 = vst [vmem:[#allocation50_spill] sm:$0xff] %v4115_v50  ;;  %6347 = vst [vmem:[#allocation52_spill] sm:$0xff] %v4126_v23  ;;  %vm4140_vm5 = vcmp.lt.s32.totalorder %v6349_v44, 256  ;;  %v4154_v44 = vmul.f32 %v4027_v57, %v3913_v20  ;;  %vm990_vm0 = vcmask 1041408  }
  0xc5   : > { %v6351_v25 = vsel %vm4140_vm5, 4294967295, %v6350_v25  ;;  %518 = vst.msk [vmem:[#allocation2] sm:$0x3] %vm4140_vm5, %v513_v62 }
  0xc6   : > { %3179 = vrot.lane.b32.xlu0 %v3178_v5, %s3430_s26  ;;  %v1383_v5 = vrot.slane %v3874_v9, 4  ;;  %6352 = vst [vmem:[#allocation53_spill] sm:$0xff] %v6351_v25  ;;  %6353 = vst [vmem:[#allocation54_spill] sm:$0xff] %v4154_v44 }
  0xc7   : > { %674 = vrot.lane.b32.xlu1 %v3989_v37, %s3430_s26 }
  0xc8   : > { %v4100_v59 = vsel %vm1372_vm9, %v1379_v16, %v1383_v5  ;;  %v1456_v16 = vsel %vm1372_vm9, %v1451_v31, %v1455_v8  ;;  %v6348_v31 = vrot.slane %v4073_v24, 4 }
  0xc9   : > { %6343 = vst [vmem:[#allocation48_spill] sm:$0xff] %v4100_v59  ;;  %v1415_v2 = vsub.f32 %v3849_v0, %v4100_v59  ;;  %v1489_v32 = vmul.f32 %v3770_v14, %v1456_v16  ;;  %v564_v16 = vmul.f32 %v3937_v41, %v3937_v41 }
  0xca   : > { %1051 = vrot.lane.b32.xlu0 %v4067_v43, %s3430_s26  ;;  %v1460_v12 = vsel %vm1372_vm9, %v1455_v8, %v6348_v31  ;;  %v6355_v8 = vrot.slane %v3973_v55, 4 }
  0xcb   : > { %3184 = vrot.lane.b32.xlu1 %v3183_v52, %s3430_s26  ;;  %v4097_v52 = vmul.f32 %v4091_v49, %v3835_v54  ;;  %v1429_v31 = vand.u32 2147483647, %v1415_v2  ;;  %v1491_v28 = vmul.f32 %v3656_v33, %v1460_v12  ;;  %v4156_v59 = vmul.f32 %v1489_v32, %v1427_v46 }
  0xcc   : > { %v4161_v63 = vsel %vm1372_vm9, %v1383_v5, %v6355_v8  ;;  %v4171_v33 = vrot.slane %v3987_v26, 4  ;;  %v566_v5 = vmul.f32 %v3944_v47, %v3944_v47  ;;  %v6358_v2 = vrot.slane %v4115_v50, 4 }
  0xcd   : > { %6342 = vst [vmem:[#allocation47_spill] sm:$0xff] %v4097_v52  ;;  %v1162_v29 = vadd.f32 %v1161_v15, %v4097_v52  ;;  %v4122_v15 = vmul.f32 %v4001_v34, %v3731_v61  ;;  %6354 = vst [vmem:[#allocation55_spill] sm:$0xff] %v4156_v59  ;;  %v4182_v32 = vrot.slane %v3937_v41, 4  ;;  %v4187_v11 = vmul.f32 %v1491_v28, %v1429_v31  ;;  %v1345_v59 = vld [vmem:[#allocation12 + $0x18] sm:$0xf0] }
  0xce   : > { %1201 = vrot.lane.b32.xlu0 %v3950_v58, %s3432_s4  ;;  %6356 = vst [vmem:[#allocation56_spill] sm:$0xff] %v4161_v63  ;;  %6357 = vst [vmem:[#allocation57_spill] sm:$0xff] %v4171_v33  ;;  %v4179_v12 = vsel %vm1372_vm9, %v1527_v6, %v6358_v2  ;;  %v4217_v6 = vmul.f32 %v4088_v45, %v3905_v18  ;;  %v565_v28 = vmul.f32 %v3954_v1, %v3954_v1 }
  0xcf   : > { %1053 = vrot.lane.b32.xlu1 %v4075_v3, %s3430_s26  ;;  %v1163_v53 = vadd.f32 %v1162_v29, %v4107_v13  ;;  %6346 = vst [vmem:[#allocation51_spill] sm:$0xff] %v4122_v15  ;;  %v1170_v42 = vadd.f32 %v4122_v15, %v4126_v23  ;;  %v531_v29 = vadd.f32 %v3944_v47, %v3937_v41  ;;  %6359 = vst [vmem:[#allocation58_spill] sm:$0xff] %v4179_v12 }
  0xd0   : > { %6360 = vst [vmem:[#allocation59_spill] sm:$0xff] %v4187_v11  ;;  %v586_v12 = vadd.f32 %v566_v5, %v564_v16  ;;  %v572_v16 = vmul.f32 %v3982_v7, %v3982_v7  ;;  %6363 = vst [vmem:[#allocation62_spill] sm:$0xff] %v4217_v6  ;;  %v567_v45 = vmul.f32 %v3849_v0, %v3849_v0 }
  0xd1   : > { %v1164_v34 = vrot.slane %v1163_v53, 4  ;;  %v532_v62 = vadd.f32 %v531_v29, %v3858_v4  ;;  %v1171_v57 = vadd.f32 %v1170_v42, %v4154_v44  ;;  %v568_v29 = vmul.f32 %v3858_v4, %v3858_v4 }
  0xd2   : > { %1205 = vrot.lane.b32.xlu0 %v3849_v0, %s3432_s4  ;;  %v4194_v42 = vmul.f32 %v4055_v35, %v3919_v21  ;;  %v4207_v21 = vmul.f32 %v4091_v49, %v3900_v19  ;;  %v563_v49 = vmul.f32 %v3950_v58, %v3950_v58 }
  0xd3   : > { %1203 = vrot.lane.b32.xlu1 %v3954_v1, %s3432_s4  ;;  %v1165_v46 = vadd.f32 %v1164_v34, %v1163_v53  ;;  %v533_v8 = vadd.f32 %v532_v62, %v3892_v17  ;;  %v1421_v53 = vsub.f32 %v1356_v27, %v4171_v33  ;;  %v1417_v34 = vsub.f32 %v3874_v9, %v4161_v63 }
  0xd4   : > { %6361 = vst [vmem:[#allocation60_spill] sm:$0xff] %v4194_v42  ;;  %v570_v62 = vmul.f32 %v3892_v17, %v3892_v17  ;;  %6362 = vst [vmem:[#allocation61_spill] sm:$0xff] %v4207_v21  ;;  %v1172_v35 = vadd.f32 %v1171_v57, %v4194_v42  ;;  %v587_v5 = vadd.f32 %v586_v12, %v568_v29  ;;  %v1651_v63 = vmul.f32 0.25, %v3878_v10 }
  0xd5   : > { %v534_v2 = vadd.f32 %v533_v8, %v3982_v7  ;;  %v1166_v31 = vrot.slane %v1165_v46, 2  ;;  %v520_v8 = vadd.f32 %v3954_v1, %v3950_v58  ;;  %v4236_v50 = vand.u32 2147483647, %v1421_v53 }
  0xd6   : > { %1209 = vrot.lane.b32.xlu0 %v3973_v55, %s3432_s4  ;;  %v1173_v19 = vadd.f32 %v1172_v35, %v4207_v21  ;;  %v588_v12 = vadd.f32 %v587_v5, %v570_v62  ;;  %v569_v33 = vmul.f32 %v3874_v9, %v3874_v9  ;;  %v575_v18 = vadd.f32 %v565_v28, %v563_v49 }
  0xd7   : > { %1207 = vrot.lane.b32.xlu1 %v3874_v9, %s3432_s4  ;;  %v535_v27 = vadd.f32 %v534_v2, %v3989_v37  ;;  %v574_v2 = vmul.f32 %v3989_v37, %v3989_v37  ;;  %v521_v29 = vadd.f32 %v520_v8, %v3849_v0  ;;  %v1167_v62 = vadd.f32 %v1166_v31, %v1165_v46 }
  0xd8   : > { %v1174_v35 = vadd.f32 %v1173_v19, %v4217_v6  ;;  %v589_v8 = vadd.f32 %v588_v12, %v572_v16  ;;  %v1657_v0 = vadd.f32 0.5, %v1651_v63  ;;  %v573_v28 = vmul.f32 %v3987_v26, %v3987_v26 }
  0xd9   : > { %v536_v57 = vrot.slane %v535_v27, 4  ;;  %v522_v40 = vadd.f32 %v521_v29, %v3874_v9  ;;  %v1410_v9 = vsub.f32 %v1345_v59, %v4182_v32  ;;  %v1168_v63 = vrot.slane %v1167_v62, 1 }
  0xda   : > { %1213 = vrot.lane.b32.xlu0 %v3937_v41, %s3432_s4  ;;  %v1175_v14 = vrot.slane %v1174_v35, 4  ;;  %v590_v19 = vadd.f32 %v589_v8, %v574_v2  ;;  %v1663_v49 = vfloor.f32 %v1657_v0  ;;  %v4253_v29 = vand.u32 2147483647, %v1417_v34 }
  0xdb   : > { %1211 = vrot.lane.b32.xlu1 %v3987_v26, %s3432_s4  ;;  %v537_v5 = vadd.f32 %v536_v57, %v535_v27  ;;  %v523_v31 = vadd.f32 %v522_v40, %v3973_v55  ;;  %v576_v27 = vadd.f32 %v575_v18, %v567_v45  ;;  %v1450_v40 = vrot.slane %v4126_v23, 4 }
  0xdc   : > { %v1176_v53 = vadd.f32 %v1175_v14, %v1174_v35  ;;  %v591_v16 = vrot.slane %v590_v19, 4  ;;  %v1669_v14 = vmul.f32 4.0, %v1663_v49  ;;  %v6364_v45 = vrot.slane %v3944_v47, 4 }
  0xdd   : > { %v538_v11 = vrot.slane %v537_v5, 2  ;;  %v524_v2 = vadd.f32 %v523_v31, %v3987_v26  ;;  %v577_v12 = vadd.f32 %v576_v27, %v569_v33  ;;  %v1381_v49 = vrot.slane %v3858_v4, 4 }
  0xde   : > { %1217 = vrot.lane.b32.xlu0 %v3858_v4, %s3432_s4  ;;  %v1177_v57 = vrot.slane %v1176_v53, 2  ;;  %v592_v46 = vadd.f32 %v591_v16, %v590_v19  ;;  %v4264_v33 = vsel %vm1372_vm9, %v4182_v32, %v6364_v45  ;;  %v1675_v35 = vsub.f32 %v3878_v10, %v1669_v14  ;;  %v1359_v19 = vld [vmem:[#allocation13 + $0x18] sm:$0xf0]  ;;  %v4274_v14 = vld [vmem:[#allocation12 + $0x28] sm:$0xff] }
  0xdf   : > { %1215 = vrot.lane.b32.xlu1 %v3944_v47, %s3432_s4  ;;  %v539_v8 = vadd.f32 %v538_v11, %v537_v5  ;;  %v525_v0 = vrot.slane %v524_v2, 4  ;;  %v578_v18 = vadd.f32 %v577_v12, %v571_v36  ;;  %v1424_v11 = vand.u32 2147483647, %v1410_v9 }
  0xe0   : > { %v1178_v59 = vadd.f32 %v1177_v57, %v1176_v53  ;;  %v593_v34 = vrot.slane %v592_v46, 2  ;;  %v1169_v5 = vadd.f32 %v1168_v63, %v1167_v62  ;;  %v1681_v36 = vand.u32 2147483647, %v1675_v35 }
  0xe1   : > { %v526_v27 = vadd.f32 %v525_v0, %v524_v2  ;;  %v579_v16 = vadd.f32 %v578_v18, %v573_v28  ;;  %v540_v53 = vrot.slane %v539_v8, 1  ;;  %v1412_v9 = vsub.f32 %v3937_v41, %v4264_v33 }
  0xe2   : > { %1221 = vrot.lane.b32.xlu0 %v3982_v7, %s3432_s4  ;;  %v1179_v31 = vrot.slane %v1178_v59, 1  ;;  %v594_v57 = vadd.f32 %v593_v34, %v592_v46  ;;  %v6365_v28 = vrot.slane %v4122_v15, 4  ;;  %v1486_v46 = vmul.f32 %v1450_v40, %v1359_v19 }
  0xe3   : > { %1219 = vrot.lane.b32.xlu1 %v3892_v17, %s3432_s4  ;;  %v527_v62 = vrot.slane %v526_v27, 2  ;;  %v580_v63 = vrot.slane %v579_v16, 4  ;;  %vm1687_vm2 = vcmp.lt.f32.partialorder %v1681_v36, 0.5  ;;  %v1929_v0 = vsub.f32 %v4274_v14, %v3944_v47 }
  0xe4   : > { %v1180_v12 = vadd.f32 %v1179_v31, %v1178_v59  ;;  %v1454_v2 = vsel %vm1372_vm9, %v1450_v40, %v6365_v28  ;;  %v4282_v35 = vsel %vm1687_vm2, 1.0, %v6341_v38  ;;  %v541_v59 = vadd.f32 %v540_v53, %v539_v8 }
  0xe5   : > { %v528_v45 = vadd.f32 %v527_v62, %v526_v27  ;;  %v581_v34 = vadd.f32 %v580_v63, %v579_v16  ;;  %v595_v31 = vrot.slane %v594_v57, 1  ;;  %v4294_v27 = vld [vmem:[#allocation13 + $0x28] sm:$0xff]  ;;  %v1941_v8 = vand.u32 2147483647, %v1929_v0 }
  0xe6   : > { %1238 = vrot.lane.b32.xlu0 %v4024_v51, %s3432_s4  ;;  %v1183_v18 = vcombine.low %v1169_v5, %v1180_v12  ;;  %v4287_v51 = vmul.f32 %v4282_v35, %v3731_v61  ;;  %v1426_v16 = vand.u32 2147483647, %v1412_v9  ;;  %v1488_v53 = vmul.f32 %v3725_v56, %v1454_v2  ;;  %v1158_v61 = vld [vmem:[#allocation9] sm:$0x3] }
  0xe7   : > { %1223 = vrot.lane.b32.xlu1 %v3989_v37, %s3432_s4  ;;  %v529_v5 = vrot.slane %v528_v45, 1  ;;  %v582_v19 = vrot.slane %v581_v34, 2  ;;  %v6110_v36 = vrot.slane %v3892_v17, 4  ;;  %v4300_v62 = vmul.f32 %v1486_v46, %v1424_v11 }
  0xe8   : > { %6366 = vst [vmem:[#allocation63_spill] sm:$0xff] %v4287_v51  ;;  %v1190_v40 = vrot.slane %v1183_v18, %v4032_v60  ;;  %v1953_v12 = vmul.f32 %v4294_v27, %v4287_v51  ;;  %v596_v9 = vadd.f32 %v595_v31, %v594_v57  ;;  %v1370_v57 = vld [vmem:[#allocation13 + $0x70] sm:$0xf] }
  0xe9   : > { %v530_v28 = vadd.f32 %v529_v5, %v528_v45  ;;  %v583_v18 = vadd.f32 %v582_v19, %v581_v34  ;;  %v2060_v45 = vmul.f32 0.16666667, %v3878_v10  ;;  %v1467_v34 = vrot.slane %v4107_v13, 4 }
  0xea   : > { %1242 = vrot.lane.b32.xlu0 %v4047_v22, %s3432_s4  ;;  %v1650_v22 = vmul.f32 0.25, %v3930_v39  ;;  %v1197_v63 = vrot.slane %v1190_v40, %v4032_v60  ;;  %v4308_v56 = vmul.f32 %v1953_v12, %v1941_v8  ;;  %v4316_v40 = vmul.f32 %v1488_v53, %v1426_v16 }
  0xeb   : > { %1240 = vrot.lane.b32.xlu1 %v4016_v48, %s3432_s4  ;;  %v6367_v48 = vrot.slane %v3944_v47, 4  ;;  %v544_v2 = vcombine.low %v530_v28, %v541_v59  ;;  %v584_v46 = vrot.slane %v583_v18, 1  ;;  %v2066_v5 = vadd.f32 0.5, %v2060_v45 }
  0xec   : > { %v1656_v0 = vadd.f32 0.5, %v1650_v22  ;;  %6368 = vst [vmem:[#allocation64_spill] sm:$0xff] %v4308_v56  ;;  %v1199_v11 = vadd.f32 %v1197_v63, %v1158_v61  ;;  %6369 = vst [vmem:[#allocation65_spill] sm:$0xff] %v4316_v40  ;;  %v4322_v22 = vsel %vm1372_vm9, %v1381_v49, %v6110_v36  ;;  %v2059_v19 = vmul.f32 0.16666667, %v3930_v39 }
  0xed   : > { %v4306_v26 = vsel %vm1372_vm9, %v6367_v48, %v1381_v49  ;;  %6370 = vst [vmem:[#allocation66_spill] sm:$0xff] %v4322_v22  ;;  %v551_v59 = vrot.slane %v544_v2, %v4032_v60  ;;  %v585_v31 = vadd.f32 %v584_v46, %v583_v18  ;;  %v1457_v53 = vrot.slane %v4154_v44, 4  ;;  %v519_v61 = vld [vmem:[#allocation3] sm:$0x3] }
  0xee   : > { %1246 = vrot.lane.b32.xlu0 %v4097_v52, %s3432_s4  ;;  %1200 = vst.msk [vmem:[#allocation9] sm:$0x3] %vm4140_vm5, %v1199_v11  ;;  %v1414_v16 = vsub.f32 %v3944_v47, %v4306_v26  ;;  %v1662_v49 = vfloor.f32 %v1656_v0  ;;  %v2072_v28 = vfloor.f32 %v2066_v5  ;;  %v2065_v18 = vadd.f32 0.5, %v2059_v19  ;;  %v1357_v19 = vld [vmem:[#allocation12 + $0x78] sm:$0xf] }
  0xef   : > { %1244 = vrot.lane.b32.xlu1 %v4073_v24, %s3432_s4  ;;  %v558_v12 = vrot.slane %v551_v59, %v4032_v60  ;;  %v599_v63 = vcombine.low %v585_v31, %v596_v9  ;;  %v1497_v11 = vmul.f32 %v1467_v34, %v1370_v57  ;;  %v1463_v2 = vrot.slane %v4097_v52, 4  ;;  %v562_v59 = vld [vmem:[#allocation4] sm:$0x3] }
  0xf0   : > { %v1416_v45 = vsub.f32 %v3858_v4, %v4322_v22  ;;  %v2078_v8 = vmul.f32 6.0, %v2072_v28  ;;  %v2071_v48 = vfloor.f32 %v2065_v18  ;;  %v1668_v31 = vmul.f32 4.0, %v1662_v49 }
  0xf1   : > { %v560_v0 = vadd.f32 %v558_v12, %v519_v61  ;;  %v606_v36 = vrot.slane %v599_v63, %v4032_v60  ;;  %v1652_v57 = vmul.f32 0.25, %v3933_v30  ;;  %v6372_v5 = vrot.slane %v4194_v42, 4 }
  0xf2   : > { %1250 = vrot.lane.b32.xlu0 %v4126_v23, %s3432_s4  ;;  %v2077_v61 = vmul.f32 6.0, %v2071_v48  ;;  %v4358_v49 = vmul.f32 %v1497_v11, %v4236_v50  ;;  %v4361_v12 = vrot.slane %v3989_v37, 4  ;;  %v6375_v28 = vrot.slane %v4073_v24, 4  ;;  %v1371_v48 = vld [vmem:[#allocation13 + $0x78] sm:$0xf] }
  0xf3   : > { %1248 = vrot.lane.b32.xlu1 %v4107_v13, %s3432_s4  ;;  %v1428_v13 = vand.u32 2147483647, %v1414_v16  ;;  %v1462_v4 = vsel %vm1372_vm9, %v1457_v53, %v6372_v5  ;;  %561 = vst.msk [vmem:[#allocation3] sm:$0x3] %vm4140_vm5, %v560_v0  ;;  %v2084_v16 = vsub.f32 %v3878_v10, %v2078_v8  ;;  %v1658_v63 = vadd.f32 0.5, %v1652_v57  ;;  %v4574_v23 = vld [vmem:[#allocation12 + $0x58] sm:$0xff] }
  0xf4   : > { %6373 = vst [vmem:[#allocation67_spill] sm:$0xff] %v4358_v49  ;;  %6374 = vst [vmem:[#allocation68_spill] sm:$0xff] %v4361_v12  ;;  %v1464_v18 = vsel %vm1372_vm9, %v6375_v28, %v1463_v2  ;;  %v1468_v10 = vsel %vm1372_vm9, %v1463_v2, %v1467_v34  ;;  %v1422_v50 = vsub.f32 %v1357_v19, %v4361_v12  ;;  %v2312_v11 = vld [vmem:[#allocation12 + $0x8] sm:$0xf0]  ;;  %v6113_v46 = vrot.slane %v4217_v6, 4  ;;  %v4383_v19 = vld [vmem:[#allocation13 + $0x38] sm:$0xff] }
  0xf5   : > { %v2090_v5 = vand.u32 2147483647, %v2084_v16  ;;  %v1674_v8 = vsub.f32 %v3930_v39, %v1668_v31  ;;  %v1664_v57 = vfloor.f32 %v1658_v63  ;;  %v2061_v2 = vmul.f32 0.16666667, %v3933_v30  ;;  %v4389_v63 = vld [vmem:[#allocation12 + $0x18] sm:$0xff]  ;;  %6419 = vst [vmem:[#allocation100_spill] sm:$0xff] %v4574_v23 }
  0xf6   : > { %1254 = vrot.lane.b32.xlu0 %v4154_v44, %s3432_s4  ;;  %v6371_v44 = vrot.slane %v4122_v15, 4  ;;  %v1430_v31 = vand.u32 2147483647, %v1416_v45  ;;  %v1492_v16 = vmul.f32 %v3913_v20, %v1462_v4  ;;  %6377 = vst [vmem:[#allocation70_spill] sm:$0xff] %v4389_v63  ;;  %v4400_v4 = vmul.f32 %v3835_v54, %v1468_v10 }
  0xf7   : > { %1252 = vrot.lane.b32.xlu1 %v4122_v15, %s3432_s4  ;;  %vm2096_vm10 = vcmp.lt.f32.partialorder %v2090_v5, 0.5  ;;  %v1436_v5 = vand.u32 2147483647, %v1422_v50  ;;  %v2067_v50 = vadd.f32 0.5, %v2061_v2  ;;  %v840_v52 = vrot.slane %v3944_v47, 2 }
  0xf8   : > { %v1458_v9 = vsel %vm1372_vm9, %v6371_v44, %v1457_v53  ;;  %v613_v44 = vrot.slane %v606_v36, %v4032_v60  ;;  %v2083_v36 = vsub.f32 %v3930_v39, %v2077_v61  ;;  %v1498_v61 = vmul.f32 %v6113_v46, %v1371_v48  ;;  %6379 = vst [vmem:[#allocation72_spill] sm:$0xff] %v4400_v4  ;;  %v2326_v53 = vld [vmem:[#allocation13 + $0x8] sm:$0xf0]  ;;  %v4436_v4 = vld [vmem:[#allocation13 + $0x18] sm:$0xff]  ;;  %v6420_v60 = vld [vmem:[#allocation35_spill] sm:$0xff] }
  0xf9   : > { %v4392_v28 = vsel %vm2096_vm10, 1.0, %v6341_v38  ;;  %v6383_v46 = vrot.slane %v4316_v40, 4  ;;  %6388 = vst [vmem:[#allocation79_spill] sm:$0xff] %v4436_v4  ;;  %v848_v15 = vrot.slane %v4574_v23, 2  ;;  %v854_v56 = vrot.slane %v6420_v60, 2 }
  0xfa   : > { %1258 = vrot.lane.b32.xlu0 %v4207_v21, %s3432_s4  ;;  %v615_v0 = vadd.f32 %v613_v44, %v562_v59  ;;  %v2089_v34 = vand.u32 2147483647, %v2083_v36  ;;  %v4380_v59 = vld [vmem:[#allocation13 + $0x50] sm:$0xff]  ;;  %v1490_v44 = vmul.f32 %v4383_v19, %v1458_v9  ;;  %v1680_v36 = vand.u32 2147483647, %v1674_v8 }
  0xfb   : > { %1256 = vrot.lane.b32.xlu1 %v4194_v42, %s3432_s4  ;;  %6376 = vst [vmem:[#allocation69_spill] sm:$0xff] %v4380_v59  ;;  %v1493_v39 = vmul.f32 %v4380_v59, %v1464_v18  ;;  %v4396_v45 = vmul.f32 %v4383_v19, %v4392_v28  ;;  %v2340_v9 = vsub.f32 %v2312_v11, %v4182_v32  ;;  %v4415_v32 = vld [vmem:[#allocation13 + $0x28] sm:$0xff]  ;;  %v6423_v42 = vrot.slane %v3954_v1, 2 }
  0xfc   : > { %616 = vst.msk [vmem:[#allocation4] sm:$0x3] %vm4140_vm5, %v615_v0  ;;  %vm2095_vm8 = vcmp.lt.f32.partialorder %v2089_v34, 0.5  ;;  %v1670_v0 = vmul.f32 4.0, %v1664_v57  ;;  %v4410_v8 = vmul.f32 %v1490_v44, %v1428_v13  ;;  %v2342_v11 = vsub.f32 %v4389_v63, %v4264_v33 }
  0xfd   : > { %6378 = vst [vmem:[#allocation71_spill] sm:$0xff] %v4396_v45  ;;  %v4408_v48 = vsel %vm2095_vm8, 1.0, %v6341_v38  ;;  %v6384_v13 = vrot.slane %v4300_v62, 4  ;;  %v4431_v44 = vmul.f32 %v1492_v16, %v1430_v31  ;;  %v4434_v18 = vmul.f32 %v1498_v61, %v1436_v5  ;;  %v6393_v16 = vld [vmem:[#allocation26_spill] sm:$0xff] }
  0xfe   : > { %1587 = vrot.lane.b32.xlu0 %v4067_v43, %s3432_s4  ;;  %6380 = vst [vmem:[#allocation73_spill] sm:$0xff] %v4410_v8  ;;  %v4419_v10 = vmul.f32 %v4415_v32, %v4408_v48  ;;  %v1676_v54 = vsub.f32 %v3933_v30, %v1670_v0  ;;  %vm1686_vm13 = vcmp.lt.f32.partialorder %v1680_v36, 0.5  ;;  %v2354_v33 = vand.u32 2147483647, %v2340_v9  ;;  %v6403_v36 = vld [vmem:[#allocation46_spill] sm:$0xff]  ;;  %v4650_v43 = vld [vmem:[#allocation12 + $0x68] sm:$0xff] }
  0xff   : > { %1260 = vrot.lane.b32.xlu1 %v4217_v6, %s3432_s4  ;;  %v4429_v2 = vsel %vm1372_vm9, %v6384_v13, %v6383_v46  ;;  %6386 = vst [vmem:[#allocation77_spill] sm:$0xff] %v4431_v44  ;;  %6387 = vst [vmem:[#allocation78_spill] sm:$0xff] %v4434_v18  ;;  %v4440_v49 = vmul.f32 %v1493_v39, %v4253_v29  ;;  %v6390_v62 = vrot.slane %v3982_v7, 4  ;;  %v6391_v46 = vrot.slane %v3892_v17, 4  ;;  %v4456_v39 = vld [vmem:[#allocation12 + $0x10] sm:$0xff] }
 0x100   : > { %v4412_v57 = vpop.permute.xlu1 %3164  ;;  %6382 = vst [vmem:[#allocation75_spill] sm:$0xff] %v4419_v10  ;;  %6385 = vst [vmem:[#allocation76_spill] sm:$0xff] %v4429_v2  ;;  %v2380_v34 = vrot.slane %v4419_v10, 4  ;;  %v1928_v61 = vsub.f32 %v3950_v58, %v3954_v1  ;;  %v2073_v0 = vfloor.f32 %v2067_v50  ;;  %v2356_v5 = vand.u32 2147483647, %v2342_v11  ;;  %v4481_v50 = vld [vmem:[#allocation13 + $0x20] sm:$0xff] }
 0x101   : > { %6381 = vst [vmem:[#allocation74_spill] sm:$0xff] %v4412_v57  ;;  %6389 = vst [vmem:[#allocation80_spill] sm:$0xff] %v4440_v49  ;;  %v4447_v31 = vsel %vm1372_vm9, %v6391_v46, %v6390_v62  ;;  %v6395_v9 = vrot.slane %v4396_v45, 4  ;;  %v3050_v49 = vsel %vm1686_vm13, 1.0, %v6341_v38  ;;  %v1682_v2 = vand.u32 2147483647, %v1676_v54 }
 0x102   : > { %1759 = vrot.lane.b32.xlu0 %v3950_v58, %s3433_s8  ;;  %6392 = vst [vmem:[#allocation81_spill] sm:$0xff] %v4447_v31  ;;  %6394 = vst [vmem:[#allocation26_spill] sm:$0xff] %v4456_v39  ;;  %v2416_v62 = vmul.f32 %v2380_v34, %v2326_v53  ;;  %v4473_v53 = vand.u32 2147483647, %v1928_v61  ;;  %v6397_v54 = vld [vmem:[#allocation36_spill] sm:$0xff]  ;;  %v4488_v61 = vld [vmem:[#allocation12 + $0x20] sm:$0xff]  ;;  %v4493_v18 = vmul.f32 %v4415_v32, %v3050_v49 }
 0x103   : > { %1589 = vrot.lane.b32.xlu1 %v4075_v3, %s3432_s4  ;;  %v2384_v13 = vsel %vm1372_vm9, %v2380_v34, %v6395_v9  ;;  %vm676_vm11 = vcmp.lt.s32.totalorder %v6397_v54, 2  ;;  %v2079_v34 = vmul.f32 6.0, %v2073_v0  ;;  %v3239_v9 = vld [vmem:[#allocation13 + $0x30] sm:$0xff]  ;;  %6399 = vst [vmem:[#allocation84_spill] sm:$0xff] %v4481_v50  ;;  %6402 = vst [vmem:[#allocation87_spill] sm:$0xff] %v4488_v61  ;;  %vm1688_vm3 = vcmp.lt.f32.partialorder %v1682_v2, 0.5 }
 0x104   : > { %v2430_v12 = vmul.f32 %v2416_v62, %v2354_v33  ;;  %6396 = vst [vmem:[#allocation82_spill] sm:$0xff] %v4473_v53  ;;  %v4484_v33 = vmul.f32 %v4481_v50, %v3050_v49  ;;  %v2343_v0 = vsub.f32 %v4488_v61, %v6403_v36  ;;  %6404 = vst [vmem:[#allocation46_spill] sm:$0xff] %v4493_v18  ;;  %v3052_v36 = vsel %vm1688_vm3, 1.0, %v6341_v38  ;;  %v796_v53 = vld [vmem:[#allocation12 + $0x18] sm:$0xc0]  ;;  %v4618_v39 = vld [vmem:[#allocation12 + $0x40] sm:$0xff] }
 0x105   : > { %v3175_v40 = vpop.permute.xlu1 %3174  ;;  %v4504_v49 = vmul.f32 %v3239_v9, %v4392_v28  ;;  %v6407_v44 = vsub.f32 %v4274_v14, %v4306_v26  ;;  %v6409_v26 = vrot.slane %v3937_v41, 2  ;;  %v856_v31 = vrot.slane %v3989_v37, 2  ;;  %6430 = vst [vmem:[#allocation104_spill] sm:$0xff] %v4618_v39  ;;  %v807_v3 = vld [vmem:[#allocation12 + $0x70] sm:$0x3f]  ;;  %v820_v61 = vld [vmem:[#allocation13 + $0x68] sm:$0xff] }
 0x106   : > { %1763 = vrot.lane.b32.xlu0 %v6393_v16, %s3433_s8  ;;  %v2418_v16 = vmul.f32 %v2384_v13, %v4436_v4  ;;  %v4479_v13 = vmul.f32 %v3239_v9, %v4282_v35  ;;  %6400 = vst [vmem:[#allocation85_spill] sm:$0xff] %v4484_v33  ;;  %v2460_v46 = vrot.slane %v2430_v12, 4  ;;  %v3177_v11 = vunpack.i.h.bf16 %v3175_v40 }
 0x107   : > { %1761 = vrot.lane.b32.xlu1 %v3954_v1, %s3433_s8  ;;  %v3176_v12 = vunpack.i.l.bf16 %v3175_v40  ;;  %6405 = vst [vmem:[#allocation88_spill] sm:$0xff] %v4504_v49  ;;  %v4515_v24 = vand.u32 2147483647, %v6407_v44  ;;  %v4520_v28 = vand.u32 2147483647, %v2343_v0  ;;  %v4531_v44 = vsel %vm835_vm7, %v6409_v26, %v840_v52 }
 0x108   : > { %6398 = vst [vmem:[#allocation83_spill] sm:$0xff] %v4479_v13  ;;  %v4486_v62 = vmul.f32 %v2418_v16, %v2356_v5  ;;  %v2085_v5 = vsub.f32 %v3933_v30, %v2079_v34  ;;  %v6428_v17 = vrot.slane %v4504_v49, 4  ;;  %vm1225_vm4 = vcmp.lt.s32.totalorder %v6397_v54, 4 }
 0x109   : > { %v3160_v8 = vpop.permute.xlu0 %3159  ;;  %vm1783_vm3 = vcmp.lt.s32.totalorder %v6397_v54, 8 }
 0x10a   : > { %1773 = vrot.lane.b32.xlu0 %v3944_v47, %s3433_s8  ;;  %6401 = vst [vmem:[#allocation86_spill] sm:$0xff] %v4486_v62  ;;  %v3162_v29 = vunpack.i.h.bf16 %v3160_v8  ;;  %v6125_v35 = vrot.slane %v4486_v62, 4  ;;  %v3161_v2 = vunpack.i.l.bf16 %v3160_v8  ;;  %v2091_v8 = vand.u32 2147483647, %v2085_v5 }
 0x10b   : > { %1771 = vrot.lane.b32.xlu1 %v3937_v41, %s3433_s8  ;;  %v4542_v5 = vmul.f32 %v3052_v36, %v3913_v20 }
 0x10c   : > { %v4509_v16 = vsel %vm1372_vm9, %v2460_v46, %v6125_v35  ;;  %v720_v30 = vsel %vm676_vm11, %v3177_v11, %v3162_v29  ;;  %v4525_v46 = vmul.f32 %v4481_v50, %v4408_v48  ;;  %v714_v0 = vsel %vm676_vm11, %v3162_v29, %v3177_v11  ;;  %v4549_v35 = vld [vmem:[#allocation12 + $0x40] sm:$0xff] }
 0x10d   : > { %6406 = vst [vmem:[#allocation89_spill] sm:$0xff] %v4509_v16  ;;  %v719_v48 = vsel %vm676_vm11, %v3176_v12, %v3161_v2  ;;  %6410 = vst [vmem:[#allocation91_spill] sm:$0xff] %v4542_v5  ;;  %vm2097_vm15 = vcmp.lt.f32.partialorder %v2091_v8, 0.5  ;;  %v713_v26 = vsel %vm676_vm11, %v3161_v2, %v3176_v12  ;;  %v4546_v40 = vmul.f32 %v3239_v9, %v720_v30  ;;  %v4552_v16 = vld [vmem:[#allocation13 + $0x48] sm:$0xff]  ;;  %v4557_v11 = vld [vmem:[#allocation13 + $0x40] sm:$0xff] }
 0x10e   : > { %2170 = vrot.lane.b32.xlu0 %v3954_v1, %s3434_s9  ;;  %6408 = vst [vmem:[#allocation90_spill] sm:$0xff] %v4525_v46  ;;  %v3062_v34 = vsel %vm2097_vm15, 1.0, %v6341_v38  ;;  %6412 = vst [vmem:[#allocation93_spill] sm:$0xff] %v4552_v16  ;;  %v4562_v8 = vld [vmem:[#allocation12 + $0x48] sm:$0xff]  ;;  %v4565_v12 = vld [vmem:[#allocation12 + $0x50] sm:$0xff]  ;;  %v4569_v30 = vmul.f32 %v4383_v19, %v714_v0  ;;  %v4572_v62 = vmul.f32 %v4481_v50, %v719_v48  ;;  %v852_v48 = vrot.slane %v3982_v7, 2 }
 0x10f   : > { %2168 = vrot.lane.b32.xlu1 %v3950_v58, %s3434_s9  ;;  %6411 = vst [vmem:[#allocation92_spill] sm:$0xff] %v4546_v40  ;;  %v4555_v29 = vmul.f32 %v4552_v16, %v3062_v34  ;;  %6414 = vst [vmem:[#allocation95_spill] sm:$0xff] %v4557_v11  ;;  %v4560_v20 = vmul.f32 %v4557_v11, %v3062_v34  ;;  %v844_v9 = vrot.slane %v4562_v8, 2  ;;  %v846_v2 = vrot.slane %v4565_v12, 2  ;;  %v4598_v0 = vld [vmem:[#allocation12 + $0x38] sm:$0xff] }
 0x110   : > { %6416 = vst [vmem:[#allocation97_spill] sm:$0xff] %v4562_v8  ;;  %6417 = vst [vmem:[#allocation98_spill] sm:$0xff] %v4565_v12  ;;  %v850_v34 = vrot.slane %v3973_v55, 2  ;;  %v4589_v6 = vmul.f32 %v4415_v32, %v713_v26  ;;  %v4592_v55 = vmul.f32 %v4557_v11, %v3052_v36  ;;  %v6426_v7 = vrot.slane %v4396_v45, 4  ;;  %v4605_v26 = vld [vmem:[#allocation13 + $0x20] sm:$0xff] }
 0x111   : > { %6413 = vst [vmem:[#allocation94_spill] sm:$0xff] %v4555_v29  ;;  %6415 = vst [vmem:[#allocation96_spill] sm:$0xff] %v4560_v20  ;;  %v4582_v25 = vpop.permute.xlu0 %3169  ;;  %v6425_v22 = vrot.slane %v4555_v29, 4  ;;  %v6427_v36 = vrot.slane %v4560_v20, 4  ;;  %v4653_v63 = vsel %vm835_vm7, %v852_v48, %v856_v31 }
 0x112   : > { %2182 = vrot.lane.b32.xlu0 %v3944_v47, %s3434_s9  ;;  %v842_v47 = vrot.slane %v4549_v35, 2  ;;  %6418 = vst [vmem:[#allocation99_spill] sm:$0xff] %v4569_v30  ;;  %6421 = vst [vmem:[#allocation35_spill] sm:$0xff] %v4589_v6  ;;  %v851_v38 = vsel %vm835_vm7, %v846_v2, %v850_v34 }
 0x113   : > { %2180 = vrot.lane.b32.xlu1 %v3937_v41, %s3434_s9  ;;  %6422 = vst [vmem:[#allocation101_spill] sm:$0xff] %v4592_v55  ;;  %6424 = vst [vmem:[#allocation102_spill] sm:$0xff] %v4598_v0  ;;  %v2388_v60 = vsel %vm1372_vm9, %v6426_v7, %v6425_v22  ;;  %v2386_v4 = vsel %vm1372_vm9, %v6428_v17, %v6427_v36  ;;  %v4620_v7 = vld [vmem:[#allocation12 + $0x48] sm:$0xff]  ;;  %v849_v22 = vsel %vm835_vm7, %v844_v9, %v848_v15 }
 0x114   : > { %v843_v21 = vsel %vm835_vm7, %v6423_v42, %v842_v47  ;;  %v845_v42 = vsel %vm835_vm7, %v840_v52, %v844_v9  ;;  %v847_v37 = vsel %vm835_vm7, %v842_v47, %v846_v2  ;;  %v2420_v50 = vmul.f32 %v2388_v60, %v4294_v27  ;;  %6431 = vst [vmem:[#allocation105_spill] sm:$0xff] %v4620_v7  ;;  %v803_v52 = vld [vmem:[#allocation12 + $0x50] sm:$0xff]  ;;  %v4629_v47 = vld [vmem:[#allocation12 + $0x58] sm:$0xff] }
 0x115   : > { %v2419_v58 = vmul.f32 %v2386_v4, %v4605_v26  ;;  %v4631_v4 = vld [vmem:[#allocation12 + $0x60] sm:$0xff]  ;;  %v4634_v60 = vsel %vm835_vm7, %v848_v15, %v852_v48  ;;  %v4637_v9 = vsel %vm835_vm7, %v850_v34, %v854_v56  ;;  %v6432_v2 = vrot.slane %v3937_v41, 2  ;;  %v808_v15 = vld [vmem:[#allocation12 + $0x78] sm:$0x3f] }
 0x116   : > { %1796 = vrot.lane.b32.xlu0 %v4484_v33, %s3433_s8  ;;  %v4614_v33 = vld [vmem:[#allocation12 + $0x30] sm:$0xff]  ;;  %v875_v41 = vsub.f32 %v4274_v14, %v4531_v44  ;;  %v882_v48 = vsub.f32 %v4631_v4, %v4637_v9  ;;  %v4673_v14 = vsub.f32 %v807_v3, %v854_v56  ;;  %v4675_v44 = vsub.f32 %v808_v15, %v856_v31  ;;  %v4684_v4 = vpop.permute.xlu1 %656  ;;  %v4688_v3 = vld [vmem:[#allocation13 + $0x58] sm:$0xff] }
 0x117   : > { %1775 = vrot.lane.b32.xlu1 %v4562_v8, %s3433_s8  ;;  %6429 = vst [vmem:[#allocation103_spill] sm:$0xff] %v4614_v33  ;;  %v4641_v36 = vsub.f32 %v796_v53, %v6432_v2  ;;  %v876_v53 = vsub.f32 %v4614_v33, %v843_v21  ;;  %v881_v2 = vsub.f32 %v4629_v47, %v4634_v60  ;;  %v920_v47 = vrot.slane %v4552_v16, 2  ;;  %v816_v16 = vld [vmem:[#allocation13 + $0x48] sm:$0xff] }
 0x118   : > { %v883_v21 = vsub.f32 %v4650_v43, %v4653_v63  ;;  %v889_v60 = vand.u32 2147483647, %v875_v41  ;;  %6436 = vst [vmem:[#allocation109_spill] sm:$0xff] %v4688_v3  ;;  %v924_v56 = vrot.slane %v4688_v3, 2  ;;  %v4691_v63 = vld [vmem:[#allocation13 + $0x68] sm:$0xff] }
 0x119   : > { %v4686_v43 = vand.u32 2147483647, %v876_v53  ;;  %6437 = vst [vmem:[#allocation110_spill] sm:$0xff] %v4691_v63  ;;  %v928_v31 = vrot.slane %v4691_v63, 2  ;;  %v809_v63 = vld [vmem:[#allocation13 + $0x10] sm:$0xc0] }
 0x11a   : > { %1808 = vrot.lane.b32.xlu0 %v4493_v18, %s3433_s8  ;;  %v4648_v18 = vmul.f32 %v2419_v58, %v4520_v28  ;;  %v879_v58 = vsub.f32 %v4620_v7, %v849_v22  ;;  %v880_v28 = vsub.f32 %v803_v52, %v851_v38  ;;  %v916_v22 = vrot.slane %v4383_v19, 2  ;;  %v6441_v7 = vld [vmem:[#allocation25_spill] sm:$0xff] }
 0x11b   : > { %1798 = vrot.lane.b32.xlu1 %v4479_v13, %s3433_s8  ;;  %v4645_v13 = vmul.f32 %v2420_v50, %v4515_v24  ;;  %v877_v24 = vsub.f32 %v4598_v0, %v845_v42  ;;  %v878_v50 = vsub.f32 %v4618_v39, %v847_v37  ;;  %v4678_v42 = vld [vmem:[#allocation13 + $0x38] sm:$0xff]  ;;  %v913_v37 = vrot.slane %v4415_v32, 2 }
 0x11c   : > { %6434 = vst [vmem:[#allocation107_spill] sm:$0xff] %v4648_v18  ;;  %v4655_v34 = vpop.permute.xlu0 %652  ;;  %6435 = vst [vmem:[#allocation108_spill] sm:$0xff] %v4678_v42  ;;  %v918_v52 = vrot.slane %v4557_v11, 2  ;;  %v810_v32 = vld [vmem:[#allocation13 + $0x18] sm:$0xc0]  ;;  %v921_v17 = vsel %vm835_vm7, %v916_v22, %v920_v47  ;;  %v922_v38 = vrot.slane %v4380_v59, 2  ;;  %v925_v0 = vsel %vm835_vm7, %v920_v47, %v924_v56 }
 0x11d   : > { %6433 = vst [vmem:[#allocation106_spill] sm:$0xff] %v4645_v13  ;;  %v891_v9 = vand.u32 2147483647, %v877_v24  ;;  %v4694_v19 = vand.u32 2147483647, %v878_v50  ;;  %v917_v15 = vsel %vm835_vm7, %v913_v37, %v916_v22  ;;  %v4705_v18 = vld [vmem:[#allocation13 + $0x60] sm:$0xff]  ;;  %v929_v11 = vsel %vm835_vm7, %v924_v56, %v928_v31  ;;  %v4731_v56 = vpop.permute.xlu1 %658 }
 0x11e   : > { %2172 = vrot.lane.b32.xlu0 %v4549_v35, %s3434_s9  ;;  %v893_v53 = vand.u32 2147483647, %v879_v58  ;;  %6438 = vst [vmem:[#allocation111_spill] sm:$0xff] %v4705_v18  ;;  %v926_v24 = vrot.slane %v4705_v18, 2  ;;  %v4708_v50 = vld [vmem:[#allocation13 + $0x78] sm:$0xff]  ;;  %v4711_v22 = vld [vmem:[#allocation13 + $0x30] sm:$0xff]  ;;  %v949_v3 = vmul.f32 %v913_v37, %v810_v32 }
 0x11f   : > { %1810 = vrot.lane.b32.xlu1 %v4287_v51, %s3433_s8  ;;  %6439 = vst [vmem:[#allocation112_spill] sm:$0xff] %v4708_v50  ;;  %v932_v13 = vrot.slane %v4708_v50, 2  ;;  %6440 = vst [vmem:[#allocation113_spill] sm:$0xff] %v4711_v22  ;;  %v894_v39 = vand.u32 2147483647, %v880_v28  ;;  %v6442_v51 = vrot.slane %v6441_v7, 2  ;;  %v951_v50 = vmul.f32 %v4294_v27, %v917_v15 }
 0x120   : > { %v4702_v41 = vpop.permute.xlu0 %654  ;;  %v4717_v58 = vld [vmem:[#allocation13 + $0x70] sm:$0xff]  ;;  %v818_v18 = vld [vmem:[#allocation13 + $0x58] sm:$0xff]  ;;  %v953_v28 = vmul.f32 %v4678_v42, %v921_v17  ;;  %v895_v59 = vand.u32 2147483647, %v881_v2  ;;  %v896_v57 = vand.u32 2147483647, %v882_v48  ;;  %v923_v7 = vsel %vm835_vm7, %v918_v52, %v922_v38 }
 0x121   : > { %v919_v33 = vsel %vm835_vm7, %v6442_v51, %v918_v52  ;;  %6443 = vst [vmem:[#allocation25_spill] sm:$0xff] %v4717_v58  ;;  %v6444_v47 = vld [vmem:[#allocation24_spill] sm:$0xff]  ;;  %v815_v27 = vld [vmem:[#allocation13 + $0x40] sm:$0xff]  ;;  %v897_v2 = vand.u32 2147483647, %v883_v21  ;;  %v927_v37 = vsel %vm835_vm7, %v922_v38, %v926_v24  ;;  %v957_v42 = vmul.f32 %v929_v11, %v818_v18 }
 0x122   : > { %2205 = vrot.lane.b32.xlu0 %v4525_v46, %s3434_s9  ;;  %v930_v46 = vrot.slane %v4717_v58, 2  ;;  %v6445_v1 = vrot.slane %v6444_v47, 2  ;;  %v933_v58 = vsel %vm835_vm7, %v928_v31, %v932_v13  ;;  %v817_v17 = vld [vmem:[#allocation13 + $0x50] sm:$0xff]  ;;  %v898_v48 = vand.u32 2147483647, %v4673_v14 }
 0x123   : > { %2184 = vrot.lane.b32.xlu1 %v4562_v8, %s3434_s9  ;;  %v821_v32 = vld [vmem:[#allocation13 + $0x70] sm:$0x3f]  ;;  %v952_v15 = vmul.f32 %v4711_v22, %v919_v33  ;;  %v959_v20 = vmul.f32 %v933_v58, %v820_v61  ;;  %v6446_v21 = vand.u32 2147483647, %v4641_v36  ;;  %v965_v14 = vmul.f32 %v951_v50, %v889_v60 }
 0x124   : > { %v915_v29 = vsel %vm835_vm7, %v6445_v1, %v6442_v51  ;;  %v819_v1 = vld [vmem:[#allocation13 + $0x60] sm:$0xff]  ;;  %v931_v31 = vsel %vm835_vm7, %v926_v24, %v930_v46  ;;  %v955_v51 = vmul.f32 %v925_v0, %v816_v16  ;;  %v967_v8 = vmul.f32 %v953_v28, %v891_v9 }
 0x125   : > { %v963_v30 = vmul.f32 %v949_v3, %v6446_v21  ;;  %v899_v52 = vand.u32 2147483647, %v4675_v44  ;;  %v6447_v38 = vrot.slane %v6444_v47, 2  ;;  %v954_v24 = vmul.f32 %v923_v7, %v815_v27  ;;  %v4802_v7 = vld [vmem:[#allocation12 + $0x30] sm:$0xff]  ;;  %v6471_v28 = vld [vmem:[#allocation87_spill] sm:$0xff] }
 0x126   : > { %2217 = vrot.lane.b32.xlu0 %v4419_v10, %s3434_s9  ;;  %v822_v10 = vld [vmem:[#allocation13 + $0x78] sm:$0x3f]  ;;  %v956_v40 = vmul.f32 %v927_v37, %v817_v17  ;;  %v4754_v18 = vmul.f32 %v4605_v26, %v915_v29  ;;  %v958_v33 = vmul.f32 %v931_v31, %v819_v1  ;;  %v960_v61 = vmul.f32 %v930_v46, %v821_v32 }
 0x127   : > { %2207 = vrot.lane.b32.xlu1 %v4504_v49, %s3434_s9  ;;  %v4747_v6 = vmul.f32 %v6447_v38, %v809_v63  ;;  %v961_v16 = vmul.f32 %v932_v13, %v822_v10  ;;  %v4757_v11 = vmul.f32 %v952_v15, %v4686_v43  ;;  %v969_v0 = vmul.f32 %v955_v51, %v893_v53  ;;  %v4805_v1 = vld [vmem:[#allocation12 + $0x38] sm:$0xff] }
 0x128   : > { %v4740_v49 = vpop.permute.xlu0 %660  ;;  %v971_v36 = vmul.f32 %v957_v42, %v895_v59  ;;  %v4761_v3 = vmul.f32 %v959_v20, %v897_v2  ;;  %v994_v63 = vrot.slane %v963_v30, 6  ;;  %v995_v9 = vrot.slane %v965_v14, 6  ;;  %v4777_v20 = vld [vmem:[#allocation12 + $0x20] sm:$0xff]  ;;  %v4780_v30 = vld [vmem:[#allocation12 + $0x28] sm:$0xff]  ;;  %6449 = vst [vmem:[#allocation114_spill] sm:$0xff] %v4802_v7  ;;  %6450 = vst [vmem:[#allocation115_spill] sm:$0xff] %v4805_v1 }
 0x129   : > { %v999_v50 = vrot.slane %v967_v8, 6  ;;  %v4770_v13 = vmul.f32 %v954_v24, %v4694_v19  ;;  %v4772_v59 = vmul.f32 %v956_v40, %v894_v39  ;;  %v3171_v46 = vunpack.i.l.bf16 %v4582_v25  ;;  %6448 = vst [vmem:[#allocation24_spill] sm:$0xff] %v4777_v20 }
 0x12a   : > { %1765 = vrot.lane.b32.xlu0 %v4565_v12, %s3433_s8  ;;  %v4787_v39 = vmul.f32 %v960_v61, %v898_v48  ;;  %v975_v40 = vmul.f32 %v961_v16, %v899_v52  ;;  %v1003_v42 = vrot.slane %v969_v0, 6  ;;  %v1007_v43 = vrot.slane %v971_v36, 6 }
 0x12b   : > { %2219 = vrot.lane.b32.xlu1 %v4396_v45, %s3434_s9  ;;  %v996_v58 = vsel %vm990_vm0, %v994_v63, %v995_v9  ;;  %v1000_v47 = vsel %vm990_vm0, %v995_v9, %v999_v50  ;;  %v1011_v27 = vrot.slane %v4761_v3, 6  ;;  %v6451_v3 = vld [vmem:[#allocation92_spill] sm:$0xff]  ;;  %v6452_v9 = vld [vmem:[#allocation35_spill] sm:$0xff] }
 0x12c   : > { %v665_v60 = vpop.permute.xlu0 %664  ;;  %v1004_v51 = vsel %vm990_vm0, %v999_v50, %v1003_v42  ;;  %v1008_v21 = vsel %vm990_vm0, %v1003_v42, %v1007_v43  ;;  %v1040_v14 = vadd.f32 %v1000_v47, %v996_v58  ;;  %v1015_v16 = vrot.slane %v975_v40, 6  ;;  %v6455_v42 = vld [vmem:[#allocation96_spill] sm:$0xff] }
 0x12d   : > { %v4759_v44 = vpop.permute.xlu1 %662  ;;  %v677_v29 = vsel %vm676_vm11, %v4655_v34, %v665_v60  ;;  %v683_v10 = vsel %vm676_vm11, %v665_v60, %v4655_v34  ;;  %v4785_v34 = vmul.f32 %v958_v33, %v896_v57  ;;  %v1012_v60 = vsel %vm990_vm0, %v1007_v43, %v1011_v27 }
 0x12e   : > { %v725_v8 = vsub.f32 %v4777_v20, %v683_v10  ;;  %v726_v26 = vsub.f32 %v4780_v30, %v677_v29  ;;  %1800 = vrot.lane.b32.xlu0 %v4592_v55, %s3433_s8  ;;  %v6453_v29 = vld [vmem:[#allocation97_spill] sm:$0xff]  ;;  %v1041_v43 = vadd.f32 %v1040_v14, %v1004_v51 }
 0x12f   : > { %1777 = vrot.lane.b32.xlu1 %v4574_v23, %s3433_s8 }
 0x130   : > { %v669_v53 = vpop.permute.xlu0 %668  ;;  %v737_v2 = vand.u32 2147483647, %v725_v8  ;;  %v738_v31 = vand.u32 2147483647, %v726_v26  ;;  %v6454_v8 = vld [vmem:[#allocation99_spill] sm:$0xff] }
 0x131   : > { %v667_v19 = vpop.permute.xlu1 %666  ;;  %v685_v48 = vsel %vm676_vm11, %v669_v53, %v4684_v4 }
 0x132   : > { %v678_v57 = vsel %vm676_vm11, %v4702_v41, %v667_v19  ;;  %v684_v17 = vsel %vm676_vm11, %v667_v19, %v4702_v41  ;;  %v679_v41 = vsel %vm676_vm11, %v4684_v4, %v669_v53  ;;  %2174 = vrot.lane.b32.xlu0 %v4565_v12, %s3434_s9  ;;  %v729_v33 = vsub.f32 %v4549_v35, %v685_v48 }
 0x133   : > { %v727_v37 = vsub.f32 %v4802_v7, %v684_v17  ;;  %v728_v32 = vsub.f32 %v4805_v1, %v678_v57  ;;  %1812 = vrot.lane.b32.xlu1 %v4542_v5, %s3433_s8  ;;  %v761_v0 = vmul.f32 %v4572_v62, %v737_v2  ;;  %v762_v50 = vmul.f32 %v6452_v9, %v738_v31  ;;  %v6456_v17 = vld [vmem:[#allocation28_spill] sm:$0xff]  ;;  %v4852_v31 = vld [vmem:[#allocation12 + $0x60] sm:$0xff]  ;;  %v6473_v1 = vld [vmem:[#allocation109_spill] sm:$0xff] }
 0x134   : > { %v673_v61 = vpop.permute.xlu0 %672  ;;  %v730_v10 = vsub.f32 %v6453_v29, %v679_v41  ;;  %v836_v62 = vrot.slane %v4777_v20, 2  ;;  %v741_v53 = vand.u32 2147483647, %v729_v33  ;;  %v1016_v57 = vsel %vm990_vm0, %v1011_v27, %v1015_v16  ;;  %6457 = vst [vmem:[#allocation92_spill] sm:$0xff] %v4852_v31  ;;  %v6458_v27 = vld [vmem:[#allocation94_spill] sm:$0xff] }
 0x135   : > { %v739_v52 = vand.u32 2147483647, %v727_v37  ;;  %v740_v38 = vand.u32 2147483647, %v728_v32  ;;  %v671_v24 = vpop.permute.xlu1 %670  ;;  %v1653_v2 = vmul.f32 0.25, %v6456_v17  ;;  %v681_v32 = vsel %vm676_vm11, %v4740_v49, %v673_v61 }
 0x136   : > { %v680_v4 = vsel %vm676_vm11, %v4731_v56, %v671_v24  ;;  %v686_v36 = vsel %vm676_vm11, %v671_v24, %v4731_v56  ;;  %v687_v56 = vsel %vm676_vm11, %v673_v61, %v4740_v49  ;;  %2209 = vrot.lane.b32.xlu0 %v6455_v42, %s3434_s9  ;;  %v742_v51 = vand.u32 2147483647, %v730_v10  ;;  %v795_v49 = vld [vmem:[#allocation12 + $0x10] sm:$0xc0]  ;;  %v4865_v10 = vld [vmem:[#allocation12 + $0x78] sm:$0xff] }
 0x137   : > { %v763_v63 = vmul.f32 %v6451_v3, %v739_v52  ;;  %2186 = vrot.lane.b32.xlu1 %v4574_v23, %s3434_s9  ;;  %v764_v26 = vmul.f32 %v6454_v8, %v740_v38  ;;  %v731_v40 = vsub.f32 %v4565_v12, %v686_v36  ;;  %v732_v19 = vsub.f32 %v4574_v23, %v680_v4  ;;  %v6459_v38 = vld [vmem:[#allocation30_spill] sm:$0xff]  ;;  %v4862_v3 = vld [vmem:[#allocation12 + $0x70] sm:$0xff] }
 0x138   : > { %v3180_v47 = vpop.permute.xlu0 %3179  ;;  %v733_v41 = vsub.f32 %v4852_v31, %v687_v56  ;;  %v6460_v24 = vrot.slane %v6459_v38, 2  ;;  %v1042_v61 = vadd.f32 %v1041_v43, %v1008_v21  ;;  %6461 = vst [vmem:[#allocation35_spill] sm:$0xff] %v4862_v3  ;;  %6462 = vst [vmem:[#allocation97_spill] sm:$0xff] %v4865_v10  ;;  %v4868_v56 = vld [vmem:[#allocation12 + $0x68] sm:$0xff]  ;;  %v6464_v21 = vld [vmem:[#allocation74_spill] sm:$0xff] }
 0x139   : > { %v675_v58 = vpop.permute.xlu1 %674  ;;  %v3182_v14 = vunpack.i.h.bf16 %v3180_v47  ;;  %v3181_v52 = vunpack.i.l.bf16 %v3180_v47  ;;  %v773_v16 = vadd.f32 %v763_v63, %v761_v0  ;;  %v743_v4 = vand.u32 2147483647, %v731_v40  ;;  %6463 = vst [vmem:[#allocation99_spill] sm:$0xff] %v4868_v56  ;;  %v6478_v23 = vld [vmem:[#allocation110_spill] sm:$0xff] }
 0x13a   : > { %v682_v48 = vsel %vm676_vm11, %v4759_v44, %v675_v58  ;;  %v688_v37 = vsel %vm676_vm11, %v675_v58, %v4759_v44  ;;  %v839_v33 = vsel %vm835_vm7, %v836_v62, %v6460_v24  ;;  %v784_v44 = vadd.f32 %v764_v26, %v762_v50  ;;  %1767 = vrot.lane.b32.xlu0 %v4852_v31, %s3433_s8 }
 0x13b   : > { %2221 = vrot.lane.b32.xlu1 %v6458_v27, %s3434_s9  ;;  %v744_v36 = vand.u32 2147483647, %v732_v19  ;;  %v735_v9 = vsub.f32 %v4862_v3, %v688_v37  ;;  %v736_v8 = vsub.f32 %v4865_v10, %v682_v48  ;;  %v734_v0 = vsub.f32 %v4868_v56, %v681_v32  ;;  %v6474_v27 = vld [vmem:[#allocation95_spill] sm:$0xff]  ;;  %v6479_v3 = vld [vmem:[#allocation112_spill] sm:$0xff] }
 0x13c   : > { %v4871_v50 = vpop.permute.xlu0 %1051  ;;  %v745_v26 = vand.u32 2147483647, %v733_v41  ;;  %v6465_v43 = vunpack.i.h.bf16 %v6464_v21  ;;  %v6467_v37 = vunpack.i.l.bf16 %v6464_v21  ;;  %v872_v24 = vsub.f32 %v795_v49, %v836_v62 }
 0x13d   : > { %v3185_v63 = vpop.permute.xlu1 %3184  ;;  %v874_v15 = vsub.f32 %v6471_v28, %v839_v33 }
 0x13e   : > { %v3187_v40 = vunpack.i.h.bf16 %v3185_v63  ;;  %v3186_v58 = vunpack.i.l.bf16 %v3185_v63  ;;  %v722_v19 = vsel %vm676_vm11, %v3182_v14, %v6465_v43  ;;  %v6466_v47 = vmov %v6465_v43 }
 0x13f   : > { %v716_v48 = vsel %vm676_vm11, %v6466_v47, %v3182_v14  ;;  %v715_v32 = vsel %vm676_vm11, %v6467_v37, %v3181_v52  ;;  %v6468_v38 = vmov %v6467_v37  ;;  %1779 = vrot.lane.b32.xlu1 %v4868_v56, %s3433_s8  ;;  %v6469_v63 = vunpack.i.h.bf16 %v4582_v25 }
 0x140   : > { %v721_v41 = vsel %vm676_vm11, %v3181_v52, %v6468_v38  ;;  %v717_v14 = vsel %vm676_vm11, %v3171_v46, %v3186_v58  ;;  %v723_v21 = vsel %vm676_vm11, %v3186_v58, %v3171_v46  ;;  %v1043_v52 = vadd.f32 %v1042_v61, %v1012_v60  ;;  %v6470_v38 = vld [vmem:[#allocation69_spill] sm:$0xff]  ;;  %v4905_v20 = vpop.permute.xlu0 %1201  ;;  %v6477_v58 = vld [vmem:[#allocation111_spill] sm:$0xff] }
 0x141   : > { %v724_v43 = vsel %vm676_vm11, %v3187_v40, %v6469_v63  ;;  %v747_v47 = vand.u32 2147483647, %v735_v9  ;;  %v746_v37 = vand.u32 2147483647, %v734_v0  ;;  %v755_v62 = vmul.f32 %v6470_v38, %v722_v19  ;;  %v1054_v49 = vpop.permute.xlu1 %1053  ;;  %6472 = vst [vmem:[#allocation28_spill] sm:$0xff] %v4905_v20  ;;  %v6475_v46 = vld [vmem:[#allocation93_spill] sm:$0xff] }
 0x142   : > { %v718_v7 = vsel %vm676_vm11, %v6469_v63, %v3187_v40  ;;  %v756_v42 = vmul.f32 %v6473_v1, %v716_v48  ;;  %v753_v12 = vmul.f32 %v6474_v27, %v721_v41  ;;  %v754_v60 = vmul.f32 %v6475_v46, %v715_v32  ;;  %v6476_v9 = vld [vmem:[#allocation25_spill] sm:$0xff] }
 0x143   : > { %v748_v61 = vand.u32 2147483647, %v736_v8  ;;  %v759_v0 = vmul.f32 %v6476_v9, %v724_v43  ;;  %v757_v19 = vmul.f32 %v6477_v58, %v723_v21  ;;  %v758_v28 = vmul.f32 %v6478_v23, %v717_v14 }
 0x144   : > { %v765_v33 = vmul.f32 %v753_v12, %v741_v53  ;;  %v766_v20 = vmul.f32 %v754_v60, %v742_v51  ;;  %v1044_v45 = vadd.f32 %v1043_v52, %v1016_v57  ;;  %v886_v25 = vand.u32 2147483647, %v872_v24  ;;  %v4920_v27 = vpop.permute.xlu0 %1205 }
 0x145   : > { %v760_v10 = vmul.f32 %v6479_v3, %v718_v7  ;;  %v767_v40 = vmul.f32 %v755_v62, %v743_v4  ;;  %v888_v63 = vand.u32 2147483647, %v874_v15  ;;  %v1659_v48 = vadd.f32 0.5, %v1653_v2  ;;  %v4918_v22 = vpop.permute.xlu1 %1203 }
 0x146   : > { %v768_v8 = vmul.f32 %v756_v42, %v744_v36  ;;  %v774_v32 = vadd.f32 %v773_v16, %v765_v33  ;;  %v785_v41 = vadd.f32 %v784_v44, %v766_v20  ;;  %v962_v43 = vmul.f32 %v4747_v6, %v886_v25 }
 0x147   : > { %v769_v21 = vmul.f32 %v757_v19, %v745_v26  ;;  %v770_v14 = vmul.f32 %v758_v28, %v746_v37  ;;  %v964_v12 = vmul.f32 %v4754_v18, %v888_v63  ;;  %v1665_v53 = vfloor.f32 %v1659_v48 }
 0x148   : > { %v775_v57 = vadd.f32 %v774_v32, %v767_v40  ;;  %v786_v51 = vadd.f32 %v785_v41, %v768_v8  ;;  %v1045_v7 = vrot.slane %v1044_v45, 4  ;;  %v991_v4 = vrot.slane %v962_v43, 6  ;;  %v4928_v20 = vpop.permute.xlu0 %1209 }
 0x149   : > { %v1005_v15 = vrot.slane %v4772_v59, 6  ;;  %v1009_v2 = vrot.slane %v4785_v34, 6  ;;  %v992_v24 = vrot.slane %v964_v12, 6  ;;  %v1671_v52 = vmul.f32 4.0, %v1665_v53  ;;  %v4926_v42 = vpop.permute.xlu1 %1207  ;;  %6480 = vst [vmem:[#allocation30_spill] sm:$0xff] %v4928_v20 }
 0x14a   : > { %v771_v6 = vmul.f32 %v759_v0, %v747_v47  ;;  %v772_v16 = vmul.f32 %v760_v10, %v748_v61  ;;  %v776_v44 = vadd.f32 %v775_v57, %v769_v21  ;;  %v787_v36 = vadd.f32 %v786_v51, %v770_v14  ;;  %v6484_v0 = vld [vmem:[#allocation70_spill] sm:$0xff] }
 0x14b   : > { %v6481_v18 = vrot.slane %v4770_v13, 6  ;;  %v6482_v26 = vrot.slane %v4757_v11, 6  ;;  %v993_v59 = vsel %vm990_vm0, %v991_v4, %v992_v24  ;;  %v1055_v46 = vsel %vm676_vm11, %v4871_v50, %v1054_v49  ;;  %v6486_v13 = vld [vmem:[#allocation45_spill] sm:$0xff] }
 0x14c   : > { %v1046_v47 = vadd.f32 %v1045_v7, %v1044_v45  ;;  %v777_v10 = vadd.f32 %v776_v44, %v771_v6  ;;  %v788_v60 = vadd.f32 %v787_v36, %v772_v16  ;;  %v1927_v19 = vsub.f32 %v6484_v0, %v4780_v30  ;;  %v4951_v63 = vpop.permute.xlu0 %1213  ;;  %v6487_v7 = vld [vmem:[#allocation43_spill] sm:$0xff] }
 0x14d   : > { %v1002_v37 = vsel %vm990_vm0, %v6482_v26, %v6481_v18  ;;  %v6483_v34 = vmov %v6482_v26  ;;  %v6485_v28 = vmov %v6481_v18  ;;  %v1013_v25 = vrot.slane %v4787_v39, 6  ;;  %v4949_v40 = vpop.permute.xlu1 %1211 }
 0x14e   : > { %v998_v62 = vsel %vm990_vm0, %v992_v24, %v6483_v34  ;;  %v1006_v33 = vsel %vm990_vm0, %v6485_v28, %v1005_v15  ;;  %v1677_v11 = vsub.f32 %v6456_v17, %v1671_v52  ;;  %v778_v48 = vrot.slane %v777_v10, 4  ;;  %v6493_v28 = vld [vmem:[#allocation90_spill] sm:$0xff] }
 0x14f   : > { %v1029_v61 = vadd.f32 %v998_v62, %v993_v59  ;;  %v789_v45 = vrot.slane %v788_v60, 4  ;;  %v1056_v32 = vsel %vm676_vm11, %v1054_v49, %v4871_v50  ;;  %v1010_v41 = vsel %vm990_vm0, %v1005_v15, %v1009_v2  ;;  %v2311_v49 = vld [vmem:[#allocation12] sm:$0xf0] }
 0x150   : > { %v1058_v43 = vsub.f32 %v6486_v13, %v1055_v46  ;;  %v1683_v21 = vand.u32 2147483647, %v1677_v11  ;;  %v2062_v39 = vmul.f32 0.16666667, %v6456_v17  ;;  %v1047_v14 = vrot.slane %v1046_v47, 2  ;;  %v4963_v50 = vpop.permute.xlu0 %1217 }
 0x151   : > { %v1030_v8 = vadd.f32 %v1029_v61, %v1002_v37  ;;  %v779_v12 = vadd.f32 %v778_v48, %v777_v10  ;;  %v790_v53 = vadd.f32 %v789_v45, %v788_v60  ;;  %v1014_v51 = vsel %vm990_vm0, %v1009_v2, %v1013_v25  ;;  %v4961_v52 = vpop.permute.xlu1 %1215  ;;  %v6490_v10 = vld [vmem:[#allocation26_spill] sm:$0xff]  ;;  %v6491_v60 = vld [vmem:[#allocation29_spill] sm:$0xff] }
 0x152   : > { %v1057_v4 = vsub.f32 %v6487_v7, %v1056_v32  ;;  %vm1689_vm6 = vcmp.lt.f32.partialorder %v1683_v21, 0.5  ;;  %v2068_v24 = vadd.f32 0.5, %v2062_v39  ;;  %v6488_v44 = vmov 0.0   ;;  %v6494_v25 = vld [vmem:[#allocation38_spill] sm:$0xff]  ;;  %v6496_v39 = vld [vmem:[#allocation83_spill] sm:$0xff] }
 0x153   : > { %v1031_v57 = vadd.f32 %v1030_v8, %v1006_v33  ;;  %v780_v15 = vrot.slane %v779_v12, 2  ;;  %v791_v6 = vrot.slane %v790_v53, 2  ;;  %v3053_v36 = vsel %vm1689_vm6, 1.0, %v6488_v44 }
 0x154   : > { %v1060_v18 = vand.u32 2147483647, %v1058_v43  ;;  %v4967_v26 = vmul.f32 %v6473_v1, %v3053_v36  ;;  %v4970_v2 = vmul.f32 %v6470_v38, %v3053_v36  ;;  %v2074_v37 = vfloor.f32 %v2068_v24  ;;  %v4983_v8 = vpop.permute.xlu0 %1221 }
 0x155   : > { %v1032_v16 = vadd.f32 %v1031_v57, %v1010_v41  ;;  %v1048_v59 = vadd.f32 %v1047_v14, %v1046_v47  ;;  %v781_v34 = vadd.f32 %v780_v15, %v779_v12  ;;  %v792_v62 = vadd.f32 %v791_v6, %v790_v53  ;;  %v4981_v45 = vpop.permute.xlu1 %1219  ;;  %6495 = vst [vmem:[#allocation69_spill] sm:$0xff] %v4983_v8  ;;  %v1914_v47 = vld [vmem:[#allocation13 + $0x10] sm:$0xff] }
 0x156   : > { %6489 = vst [vmem:[#allocation74_spill] sm:$0xff] %v4967_v26  ;;  %v6492_v61 = vsub.f32 %v6490_v10, %v6491_v60  ;;  %v2379_v33 = vrot.slane %v6493_v28, 4  ;;  %v2339_v11 = vsub.f32 %v2311_v49, %v6494_v25  ;;  %v1059_v48 = vand.u32 2147483647, %v1057_v4  ;;  %1814 = vrot.lane.b32.xlu1 %v4967_v26, %s3433_s8  ;;  %1802 = vrot.lane.b32.xlu0 %v4970_v2, %s3433_s8  ;;  %v6497_v14 = vld [vmem:[#allocation84_spill] sm:$0xff]  ;;  %v6498_v57 = vld [vmem:[#allocation41_spill] sm:$0xff] }
 0x157   : > { %v1033_v46 = vadd.f32 %v1032_v16, %v1014_v51  ;;  %v782_v32 = vrot.slane %v781_v34, 1  ;;  %v793_v41 = vrot.slane %v792_v62, 1  ;;  %v2080_v21 = vmul.f32 6.0, %v2074_v37  ;;  %v2325_v4 = vld [vmem:[#allocation13] sm:$0xf0]  ;;  %v6499_v16 = vld [vmem:[#allocation85_spill] sm:$0xff] }
 0x158   : > { %v4975_v0 = vand.u32 2147483647, %v6492_v61  ;;  %v1952_v12 = vmul.f32 %v6497_v14, %v6496_v39  ;;  %v1939_v53 = vand.u32 2147483647, %v1927_v19  ;;  %v2341_v51 = vsub.f32 %v6490_v10, %v6498_v57  ;;  %v6500_v60 = vld [vmem:[#allocation46_spill] sm:$0xff]  ;;  %v6501_v61 = vld [vmem:[#allocation79_spill] sm:$0xff]  ;;  %v5002_v57 = vpop.permute.xlu0 %1238 }
 0x159   : > { %v1034_v43 = vrot.slane %v1033_v46, 4  ;;  %vm1062_vm12 = vcmp.eq.f32.partialorder %v1060_v18, 2.0  ;;  %v1049_v24 = vrot.slane %v1048_v59, 1  ;;  %v794_v49 = vadd.f32 %v793_v41, %v792_v62  ;;  %v6502_v37 = vld [vmem:[#allocation88_spill] sm:$0xff]  ;;  %v5000_v10 = vpop.permute.xlu1 %1223  ;;  %6504 = vst [vmem:[#allocation87_spill] sm:$0xff] %v5002_v57 }
 0x15a   : > { %v2086_v6 = vsub.f32 %v6456_v17, %v2080_v21  ;;  %v1950_v36 = vmul.f32 %v1914_v47, %v6499_v16  ;;  %v1951_v25 = vmul.f32 %v6501_v61, %v6500_v60  ;;  %v6503_v7 = vrot.slane %v6502_v37, 4  ;;  %2188 = vrot.lane.b32.xlu1 %v4868_v56, %s3434_s9  ;;  %2176 = vrot.lane.b32.xlu0 %v4852_v31, %s3434_s9  ;;  %v6505_v21 = vld [vmem:[#allocation102_spill] sm:$0xff] }
 0x15b   : > { %v1035_v15 = vadd.f32 %v1034_v43, %v1033_v46  ;;  %v2353_v19 = vand.u32 2147483647, %v2339_v11  ;;  %v783_v62 = vadd.f32 %v782_v32, %v781_v34  ;;  %vm1061_vm14 = vcmp.eq.f32.partialorder %v1059_v48, 2.0  ;;  %v6506_v32 = vld [vmem:[#allocation34_spill] sm:$0xff] }
 0x15c   : > { %v2382_v14 = vsel %vm1372_vm9, %v2379_v33, %v6503_v7  ;;  %v2092_v17 = vand.u32 2147483647, %v2086_v6  ;;  %v2415_v41 = vmul.f32 %v2379_v33, %v2325_v4  ;;  %v2355_v43 = vand.u32 2147483647, %v2341_v51  ;;  %v5015_v33 = vpop.permute.xlu0 %1242 }
 0x15d   : > { %v1036_v46 = vrot.slane %v1035_v15, 2  ;;  %v1931_v7 = vsub.f32 %v6505_v21, %v6453_v29  ;;  %v3039_v11 = vsel %vm1062_vm12, 1.0, %v6488_v44  ;;  %v1050_v61 = vadd.f32 %v1049_v24, %v1048_v59  ;;  %v5013_v6 = vpop.permute.xlu1 %1240  ;;  %6508 = vst [vmem:[#allocation95_spill] sm:$0xff] %v5015_v33  ;;  %v6511_v24 = vld [vmem:[#allocation27_spill] sm:$0xff] }
 0x15e   : > { %v1069_v56 = vmul.f32 %v3039_v11, %v794_v49  ;;  %vm2098_vm1 = vcmp.lt.f32.partialorder %v2092_v17, 0.5  ;;  %v2417_v20 = vmul.f32 %v2382_v14, %v1914_v47  ;;  %v3038_v34 = vsel %vm1061_vm14, 1.0, %v6488_v44  ;;  %6507 = vst [vmem:[#allocation109_spill] sm:$0xff] %v5013_v6  ;;  %v6512_v47 = vld [vmem:[#allocation81_spill] sm:$0xff]  ;;  %v6516_v17 = vld [vmem:[#allocation60_spill] sm:$0xff] }
 0x15f   : > { %v1037_v13 = vadd.f32 %v1036_v46, %v1035_v15  ;;  %v3063_v48 = vsel %vm2098_vm1, 1.0, %v6488_v44  ;;  %v1654_v31 = vmul.f32 0.25, %v6506_v32  ;;  %v1068_v4 = vmul.f32 %v3038_v34, %v783_v62  ;;  %v6514_v14 = vld [vmem:[#allocation61_spill] sm:$0xff]  ;;  %v6518_v62 = vld [vmem:[#allocation103_spill] sm:$0xff] }
 0x160   : > { %v5018_v18 = vmul.f32 %v6473_v1, %v3063_v48  ;;  %v5021_v59 = vmul.f32 %v6470_v38, %v3063_v48  ;;  %v6513_v49 = vsub.f32 %v6511_v24, %v6512_v47  ;;  %v6515_v46 = vrot.slane %v6514_v14, 4  ;;  %v6520_v24 = vld [vmem:[#allocation108_spill] sm:$0xff] }
 0x161   : > { %v1038_v51 = vrot.slane %v1037_v13, 1  ;;  %v6517_v11 = vrot.slane %v6516_v17, 4  ;;  %v1963_v9 = vmul.f32 %v1951_v25, %v1939_v53  ;;  %v1660_v33 = vadd.f32 0.5, %v1654_v31  ;;  %v5041_v31 = vpop.permute.xlu1 %1244  ;;  %v5043_v25 = vpop.permute.xlu0 %1246  ;;  %v6526_v47 = vld [vmem:[#allocation64_spill] sm:$0xff] }
 0x162   : > { %6509 = vst [vmem:[#allocation93_spill] sm:$0xff] %v5018_v18  ;;  %6510 = vst [vmem:[#allocation111_spill] sm:$0xff] %v5021_v59  ;;  %v1432_v15 = vand.u32 2147483647, %v6513_v49  ;;  %v1943_v3 = vand.u32 2147483647, %v1931_v7  ;;  %v1930_v34 = vsub.f32 %v6518_v62, %v4549_v35  ;;  %v1071_v6 = vadd.f32 %v1069_v56, %v1050_v61  ;;  %2223 = vrot.lane.b32.xlu1 %v5018_v18, %s3434_s9 }
 0x163   : > { %v1466_v8 = vsel %vm1372_vm9, %v6517_v11, %v6515_v46  ;;  %v1039_v57 = vadd.f32 %v1038_v51, %v1037_v13  ;;  %2211 = vrot.lane.b32.xlu0 %v5021_v59, %s3434_s9  ;;  %v2429_v38 = vmul.f32 %v2415_v41, %v2353_v19  ;;  %v5037_v48 = vmul.f32 %v2417_v20, %v2355_v43  ;;  %v6521_v56 = vld [vmem:[#allocation82_spill] sm:$0xff]  ;;  %v6525_v43 = vld [vmem:[#allocation63_spill] sm:$0xff] }
 0x164   : > { %v1955_v49 = vmul.f32 %v6520_v24, %v4542_v5  ;;  %v1666_v53 = vfloor.f32 %v1660_v33  ;;  %v1494_v13 = vmul.f32 %v6473_v1, %v1466_v8  ;;  %v1964_v7 = vmul.f32 %v1952_v12, %v6521_v56  ;;  %v6522_v46 = vld [vmem:[#allocation62_spill] sm:$0xff]  ;;  %v6527_v12 = vld [vmem:[#allocation113_spill] sm:$0xff] }
 0x165   : > { %6519 = vst [vmem:[#allocation110_spill] sm:$0xff] %v5037_v48  ;;  %v1962_v61 = vmul.f32 %v1950_v36, %v4975_v0  ;;  %v1070_v51 = vadd.f32 %v1068_v4, %v1039_v57  ;;  %v6523_v11 = vrot.slane %v6522_v46, 4  ;;  %v6524_v20 = vrot.slane %v6514_v14, 4  ;;  %v6528_v57 = vld [vmem:[#allocation97_spill] sm:$0xff]  ;;  %v6529_v4 = vld [vmem:[#allocation35_spill] sm:$0xff] }
 0x166   : > { %v1717_v41 = vadd.f32 %v6496_v39, %v6499_v16  ;;  %v1728_v33 = vadd.f32 %v6525_v43, %v6500_v60  ;;  %v1672_v24 = vmul.f32 4.0, %v1666_v53  ;;  %v1985_v1 = vadd.f32 %v6526_v47, %v1963_v9  ;;  %1781 = vrot.lane.b32.xlu1 %v6528_v57, %s3433_s8  ;;  %v5066_v53 = vpop.permute.xlu1 %1248  ;;  %v5068_v9 = vpop.permute.xlu0 %1250  ;;  %v6531_v60 = vld [vmem:[#allocation75_spill] sm:$0xff] }
 0x167   : > { %v1470_v19 = vsel %vm1372_vm9, %v6524_v20, %v6523_v11  ;;  %v1942_v8 = vand.u32 2147483647, %v1930_v34  ;;  %v1954_v0 = vmul.f32 %v6527_v12, %v4592_v55  ;;  %v1074_v36 = vcombine.low %v1070_v51, %v1071_v6  ;;  %1769 = vrot.lane.b32.xlu0 %v6529_v4, %s3433_s8  ;;  %v6530_v51 = vld [vmem:[#allocation40_spill] sm:$0xff]  ;;  %v6532_v11 = vld [vmem:[#allocation71_spill] sm:$0xff] }
 0x168   : > { %v2457_v56 = vrot.slane %v2429_v38, 4  ;;  %v1967_v20 = vmul.f32 %v1955_v49, %v1943_v3  ;;  %v1678_v16 = vsub.f32 %v6506_v32, %v1672_v24  ;;  %v5071_v47 = vmul.f32 %v6478_v23, %v1470_v19  ;;  %v1067_v24 = vld [vmem:[#allocation5] sm:$0x3] }
 0x169   : > { %v5073_v6 = vmul.f32 %v1494_v13, %v1432_v15  ;;  %v1974_v34 = vadd.f32 %v1964_v7, %v1962_v61  ;;  %v1081_v12 = vrot.slane %v1074_v36, %v6530_v51  ;;  %v2126_v38 = vadd.f32 %v6502_v37, %v6493_v28  ;;  %v6537_v36 = vld [vmem:[#allocation105_spill] sm:$0xff]  ;;  %v6539_v28 = vld [vmem:[#allocation104_spill] sm:$0xff] }
 0x16a   : > { %v2137_v3 = vadd.f32 %v6532_v11, %v6531_v60  ;;  %v1729_v49 = vadd.f32 %v1728_v33, %v4542_v5  ;;  %v1684_v43 = vand.u32 2147483647, %v1678_v16  ;;  %v1966_v39 = vmul.f32 %v1954_v0, %v1942_v8  ;;  %v5092_v33 = vpop.permute.xlu1 %1252  ;;  %v5094_v16 = vpop.permute.xlu0 %1254  ;;  %v6536_v0 = vld [vmem:[#allocation100_spill] sm:$0xff]  ;;  %v6538_v5 = vld [vmem:[#allocation98_spill] sm:$0xff] }
 0x16b   : > { %v1088_v14 = vrot.slane %v1081_v12, %v6530_v51  ;;  %v2063_v15 = vmul.f32 0.16666667, %v6506_v32  ;;  %v6533_v13 = vrot.slane %v5037_v48, 4  ;;  %v5089_v61 = vadd.f32 %v1985_v1, %v1967_v20  ;;  %v6549_v37 = vld [vmem:[#allocation28_spill] sm:$0xff] }
 0x16c   : > { %v1718_v19 = vadd.f32 %v1717_v41, %v4592_v55  ;;  %vm1690_vm2 = vcmp.lt.f32.partialorder %v1684_v43, 0.5  ;;  %v1933_v12 = vsub.f32 %v6537_v36, %v6536_v0  ;;  %v1932_v60 = vsub.f32 %v6539_v28, %v6538_v5 }
 0x16d   : > { %v5087_v7 = vsel %vm1372_vm9, %v2457_v56, %v6533_v13  ;;  %6535 = vst [vmem:[#allocation26_spill] sm:$0xff] %v5089_v61  ;;  %v1090_v8 = vadd.f32 %v1088_v14, %v1067_v24  ;;  %v3054_v48 = vsel %vm1690_vm2, 1.0, %v6488_v44  ;;  %v6540_v56 = vld [vmem:[#allocation66_spill] sm:$0xff]  ;;  %v1227_v41 = vsel %vm1225_vm4, %v4918_v22, %v4961_v52  ;;  %v6545_v13 = vld [vmem:[#allocation96_spill] sm:$0xff] }
 0x16e   : > { %6534 = vst [vmem:[#allocation70_spill] sm:$0xff] %v5087_v7  ;;  %v2346_v1 = vsub.f32 %v6505_v21, %v6540_v56  ;;  %v5108_v43 = vmul.f32 %v6478_v23, %v3054_v48  ;;  %v5111_v14 = vmul.f32 %v6477_v58, %v3054_v48  ;;  %v5113_v20 = vadd.f32 %v1974_v34, %v1966_v39  ;;  %v6544_v24 = vld [vmem:[#allocation94_spill] sm:$0xff]  ;;  %v5131_v34 = vpop.permute.xlu1 %1256 }
 0x16f   : > { %v2138_v28 = vadd.f32 %v2137_v3, %v6544_v24  ;;  %v2127_v36 = vadd.f32 %v2126_v38, %v6545_v13  ;;  %1091 = vst.msk [vmem:[#allocation5] sm:$0x3] %vm4140_vm5, %v1090_v8  ;;  %v2069_v21 = vadd.f32 0.5, %v2063_v15  ;;  %v1233_v48 = vsel %vm1225_vm4, %v4961_v52, %v4918_v22  ;;  %v5133_v38 = vpop.permute.xlu0 %1258  ;;  %v6551_v15 = vld [vmem:[#allocation115_spill] sm:$0xff]  ;;  %v6557_v24 = vld [vmem:[#allocation24_spill] sm:$0xff] }
 0x170   : > { %6541 = vst [vmem:[#allocation29_spill] sm:$0xff] %v5108_v43  ;;  %6542 = vst [vmem:[#allocation38_spill] sm:$0xff] %v5111_v14  ;;  %v1232_v39 = vsel %vm1225_vm4, %v4951_v63, %v6549_v37  ;;  %1816 = vrot.lane.b32.xlu1 %v5108_v43, %s3433_s8  ;;  %v5135_v3 = vand.u32 2147483647, %v1933_v12  ;;  %v1277_v8 = vsub.f32 %v6551_v15, %v1227_v41  ;;  %1804 = vrot.lane.b32.xlu0 %v5111_v14, %s3433_s8  ;;  %v6555_v12 = vld [vmem:[#allocation32_spill] sm:$0xff]  ;;  %v6556_v15 = vld [vmem:[#allocation114_spill] sm:$0xff] }
 0x171   : > { %6543 = vst [vmem:[#allocation84_spill] sm:$0xff] %v5113_v20  ;;  %v1226_v22 = vsel %vm1225_vm4, %v6549_v37, %v4951_v63  ;;  %v2075_v52 = vfloor.f32 %v2069_v21  ;;  %v5144_v11 = vand.u32 2147483647, %v1932_v60  ;;  %v5146_v61 = vand.u32 2147483647, %v2346_v1 }
 0x172   : > { %6550 = vst [vmem:[#allocation41_spill] sm:$0xff] %v5135_v3  ;;  %v1655_v56 = vmul.f32 0.25, %v6555_v12  ;;  %v1730_v41 = vadd.f32 %v1729_v49, %v4967_v26  ;;  %v1276_v13 = vsub.f32 %v6556_v15, %v1233_v48  ;;  %v1274_v3 = vsub.f32 %v6557_v24, %v1232_v39  ;;  %v5162_v20 = vpop.permute.xlu1 %1260 }
 0x173   : > { %6552 = vst [vmem:[#allocation79_spill] sm:$0xff] %v5144_v11  ;;  %6553 = vst [vmem:[#allocation102_spill] sm:$0xff] %v5146_v61  ;;  %v2081_v63 = vmul.f32 6.0, %v2075_v52  ;;  %v1275_v37 = vsub.f32 %v4780_v30, %v1226_v22  ;;  %v1235_v60 = vsel %vm1225_vm4, %v4981_v45, %v4926_v42  ;;  %v2064_v21 = vmul.f32 0.16666667, %v6555_v12  ;;  %v5164_v49 = vpop.permute.xlu0 %1587 }
 0x174   : > { %2190 = vrot.lane.b32.xlu1 %v6528_v57, %s3434_s9  ;;  %v1661_v1 = vadd.f32 0.5, %v1655_v56  ;;  %v1719_v24 = vadd.f32 %v1718_v19, %v4970_v2  ;;  %v5167_v48 = vand.u32 2147483647, %v1277_v8  ;;  %v1229_v30 = vsel %vm1225_vm4, %v4926_v42, %v4981_v45  ;;  %2178 = vrot.lane.b32.xlu0 %v6529_v4, %s3434_s9 }
 0x175   : > { %v2087_v56 = vsub.f32 %v6506_v32, %v2081_v63  ;;  %v1228_v39 = vsel %vm1225_vm4, %v4920_v27, %v4963_v50  ;;  %v1234_v19 = vsel %vm1225_vm4, %v4963_v50, %v4920_v27  ;;  %v2070_v22 = vadd.f32 0.5, %v2064_v21 }
 0x176   : > { %v1667_v8 = vfloor.f32 %v1661_v1  ;;  %v5184_v52 = vand.u32 2147483647, %v1276_v13  ;;  %v5186_v42 = vand.u32 2147483647, %v1274_v3  ;;  %v1280_v45 = vsub.f32 %v6538_v5, %v1235_v60  ;;  %v5192_v62 = vpop.permute.xlu1 %1589 }
 0x177   : > { %v2093_v15 = vand.u32 2147483647, %v2087_v56  ;;  %v5189_v32 = vand.u32 2147483647, %v1275_v37  ;;  %v1281_v63 = vsub.f32 %v6536_v0, %v1229_v30  ;;  %v2076_v55 = vfloor.f32 %v2070_v22  ;;  %v5194_v11 = vpop.permute.xlu0 %1759 }
 0x178   : > { %v1673_v61 = vmul.f32 4.0, %v1667_v8  ;;  %v2139_v27 = vadd.f32 %v2138_v28, %v5018_v18  ;;  %v1278_v50 = vsub.f32 %v4549_v35, %v1234_v19  ;;  %v1279_v13 = vsub.f32 %v6453_v29, %v1228_v39 }
 0x179   : > { %vm2099_vm10 = vcmp.lt.f32.partialorder %v2093_v15, 0.5  ;;  %v1237_v5 = vsel %vm1225_vm4, %v5000_v10, %v4949_v40  ;;  %v2082_v37 = vmul.f32 6.0, %v2076_v55  ;;  %v2128_v60 = vadd.f32 %v2127_v36, %v5021_v59 }
 0x17a   : > { %v3064_v0 = vsel %vm2099_vm10, 1.0, %v6488_v44  ;;  %v1679_v3 = vsub.f32 %v6555_v12, %v1673_v61  ;;  %v5206_v1 = vand.u32 2147483647, %v1280_v45  ;;  %v5214_v29 = vand.u32 2147483647, %v1281_v63  ;;  %v5223_v36 = vpop.permute.xlu1 %1761  ;;  %v6561_v45 = vld [vmem:[#allocation87_spill] sm:$0xff] }
 0x17b   : > { %v5209_v28 = vmul.f32 %v6478_v23, %v3064_v0  ;;  %v5212_v35 = vmul.f32 %v6477_v58, %v3064_v0  ;;  %v5220_v21 = vsel %vm1225_vm4, %v4949_v40, %v5000_v10  ;;  %v2088_v55 = vsub.f32 %v6555_v12, %v2082_v37  ;;  %v5225_v30 = vpop.permute.xlu0 %1763  ;;  %v6560_v40 = vld [vmem:[#allocation109_spill] sm:$0xff] }
 0x17c   : > { %v1685_v61 = vand.u32 2147483647, %v1679_v3  ;;  %v5227_v23 = vand.u32 2147483647, %v1278_v50  ;;  %v5229_v56 = vand.u32 2147483647, %v1279_v13  ;;  %v1284_v58 = vsub.f32 %v6529_v4, %v1237_v5 }
 0x17d   : > { %6558 = vst [vmem:[#allocation34_spill] sm:$0xff] %v5209_v28  ;;  %6559 = vst [vmem:[#allocation27_spill] sm:$0xff] %v5212_v35  ;;  %2225 = vrot.lane.b32.xlu1 %v5209_v28, %s3434_s9  ;;  %2213 = vrot.lane.b32.xlu0 %v5212_v35, %s3434_s9  ;;  %v1263_v10 = vsel %vm1225_vm4, %v6560_v40, %v5092_v33  ;;  %v1731_v12 = vadd.f32 %v1730_v41, %v5108_v43  ;;  %v2094_v39 = vand.u32 2147483647, %v2088_v55  ;;  %v6562_v41 = vld [vmem:[#allocation112_spill] sm:$0xff]  ;;  %v6564_v50 = vld [vmem:[#allocation25_spill] sm:$0xff] }
 0x17e   : > { %vm1691_vm8 = vcmp.lt.f32.partialorder %v1685_v61, 0.5  ;;  %v1269_v4 = vsel %vm1225_vm4, %v5092_v33, %v6560_v40  ;;  %v1720_v19 = vadd.f32 %v1719_v24, %v5111_v14  ;;  %v1262_v15 = vsel %vm1225_vm4, %v6561_v45, %v5068_v9  ;;  %v6566_v5 = vld [vmem:[#allocation51_spill] sm:$0xff]  ;;  %v5264_v0 = vpop.permute.xlu1 %1771  ;;  %v6567_v61 = vld [vmem:[#allocation69_spill] sm:$0xff]  ;;  %v6568_v55 = vld [vmem:[#allocation30_spill] sm:$0xff] }
 0x17f   : > { %v3055_v22 = vsel %vm1691_vm8, 1.0, %v6488_v44  ;;  %v1301_v33 = vmul.f32 %v1263_v10, %v6566_v5  ;;  %v1268_v24 = vsel %vm1225_vm4, %v5068_v9, %v6561_v45  ;;  %v5266_v3 = vpop.permute.xlu0 %1773  ;;  %v5268_v37 = vand.u32 2147483647, %v1284_v58  ;;  %v6570_v58 = vld [vmem:[#allocation52_spill] sm:$0xff] }
 0x180   : > { %v5254_v63 = vmul.f32 %v6562_v41, %v3055_v22  ;;  %v5257_v13 = vmul.f32 %v6564_v50, %v3055_v22  ;;  %v5274_v40 = vsel %vm1225_vm4, %v6568_v55, %v6567_v61  ;;  %vm2100_vm13 = vcmp.lt.f32.partialorder %v2094_v39, 0.5  ;;  %v6569_v22 = vld [vmem:[#allocation37_spill] sm:$0xff] }
 0x181   : > { %v1300_v10 = vmul.f32 %v1269_v4, %v6569_v22  ;;  %v2140_v5 = vadd.f32 %v2139_v27, %v5209_v28  ;;  %v2129_v8 = vadd.f32 %v2128_v60, %v5212_v35  ;;  %v1299_v45 = vmul.f32 %v1262_v15, %v6570_v58  ;;  %v6571_v60 = vld [vmem:[#allocation39_spill] sm:$0xff] }
 0x182   : > { %6563 = vst [vmem:[#allocation60_spill] sm:$0xff] %v5254_v63  ;;  %6565 = vst [vmem:[#allocation108_spill] sm:$0xff] %v5257_v13  ;;  %v1732_v9 = vadd.f32 %v1731_v12, %v5254_v63  ;;  %1818 = vrot.lane.b32.xlu1 %v5254_v63, %s3433_s8  ;;  %v1236_v14 = vsel %vm1225_vm4, %v6567_v61, %v6568_v55  ;;  %v1721_v39 = vadd.f32 %v1720_v19, %v5257_v13  ;;  %v5299_v63 = vpop.permute.xlu1 %2168 }
 0x183   : > { %1806 = vrot.lane.b32.xlu0 %v5257_v13, %s3433_s8  ;;  %v3065_v27 = vsel %vm2100_vm13, 1.0, %v6488_v44  ;;  %v1298_v4 = vmul.f32 %v1268_v24, %v6571_v60  ;;  %v1313_v58 = vmul.f32 %v1301_v33, %v5167_v48  ;;  %v5301_v61 = vpop.permute.xlu0 %2170  ;;  %v1312_v55 = vmul.f32 %v1300_v10, %v5184_v52  ;;  %v6575_v13 = vld [vmem:[#allocation95_spill] sm:$0xff] }
 0x184   : > { %v1733_v12 = vrot.slane %v1732_v9, 4  ;;  %v5293_v22 = vmul.f32 %v6562_v41, %v3065_v27  ;;  %v5296_v15 = vmul.f32 %v6564_v50, %v3065_v27  ;;  %6574 = vst [vmem:[#allocation64_spill] sm:$0xff] %v5301_v61  ;;  %v1722_v19 = vrot.slane %v1721_v39, 4 }
 0x185   : > { %v1264_v24 = vsel %vm1225_vm4, %v6575_v13, %v5094_v16  ;;  %v1270_v41 = vsel %vm1225_vm4, %v5094_v16, %v6575_v13  ;;  %v1311_v52 = vmul.f32 %v1299_v45, %v5189_v32  ;;  %v1310_v27 = vmul.f32 %v1298_v4, %v5186_v42  ;;  %v6576_v13 = vld [vmem:[#allocation42_spill] sm:$0xff]  ;;  %v6579_v45 = vld [vmem:[#allocation99_spill] sm:$0xff] }
 0x186   : > { %6572 = vst [vmem:[#allocation82_spill] sm:$0xff] %v5293_v22  ;;  %6573 = vst [vmem:[#allocation62_spill] sm:$0xff] %v5296_v15  ;;  %v1734_v50 = vadd.f32 %v1733_v12, %v1732_v9  ;;  %v2141_v48 = vadd.f32 %v2140_v5, %v5293_v22  ;;  %2227 = vrot.lane.b32.xlu1 %v5293_v22, %s3434_s9  ;;  %v2130_v33 = vadd.f32 %v2129_v8, %v5296_v15  ;;  %v6577_v9 = vld [vmem:[#allocation92_spill] sm:$0xff]  ;;  %v6578_v8 = vld [vmem:[#allocation54_spill] sm:$0xff]  ;;  %v5327_v32 = vpop.permute.xlu1 %2180  ;;  %vm2596_vm13 = vcmask (!%p3070_p11), 1040384  }
 0x187   : > { %v1723_v10 = vadd.f32 %v1722_v19, %v1721_v39  ;;  %2215 = vrot.lane.b32.xlu0 %v5296_v15, %s3434_s9  ;;  %v1271_v16 = vsel %vm1225_vm4, %v5131_v34, %v5041_v31  ;;  %v1302_v5 = vmul.f32 %v1270_v41, %v6576_v13  ;;  %v1282_v60 = vsub.f32 %v6577_v9, %v1236_v14  ;;  %v5335_v15 = vpop.permute.xlu0 %2182  ;;  %v6580_v13 = vld [vmem:[#allocation45_spill] sm:$0xff]  ;;  %v6581_v9 = vld [vmem:[#allocation44_spill] sm:$0xff] }
 0x188   : > { %v1735_v12 = vrot.slane %v1734_v50, 2  ;;  %v2142_v22 = vrot.slane %v2141_v48, 4  ;;  %v1303_v43 = vmul.f32 %v1264_v24, %v6578_v8  ;;  %v1283_v39 = vsub.f32 %v6579_v45, %v5274_v40  ;;  %v6582_v40 = vld [vmem:[#allocation43_spill] sm:$0xff] }
 0x189   : > { %v1724_v19 = vrot.slane %v1723_v10, 2  ;;  %v2131_v42 = vrot.slane %v2130_v33, 4  ;;  %v1265_v4 = vsel %vm1225_vm4, %v5041_v31, %v5131_v34  ;;  %v1333_v24 = vadd.f32 %v1313_v58, %v1311_v52 }
 0x18a   : > { %v1736_v41 = vadd.f32 %v1735_v12, %v1734_v50  ;;  %v2143_v14 = vadd.f32 %v2142_v22, %v2141_v48  ;;  %1998 = vrot.lane.b32.xlu1 %v6580_v13, %s3433_s8  ;;  %v1304_v8 = vmul.f32 %v1271_v16, %v6581_v9  ;;  %v1322_v45 = vadd.f32 %v1312_v55, %v1310_v27  ;;  %v5345_v50 = vpop.permute.xlu1 %1775  ;;  %v6583_v12 = vld [vmem:[#allocation49_spill] sm:$0xff] }
 0x18b   : > { %v1725_v35 = vadd.f32 %v1724_v19, %v1723_v10  ;;  %v2132_v28 = vadd.f32 %v2131_v42, %v2130_v33  ;;  %1996 = vrot.lane.b32.xlu0 %v6582_v40, %s3433_s8  ;;  %v1314_v61 = vmul.f32 %v1302_v5, %v5227_v23  ;;  %v1305_v34 = vmul.f32 %v1265_v4, %v6516_v17 }
 0x18c   : > { %v1737_v59 = vrot.slane %v1736_v41, 1  ;;  %v2144_v31 = vrot.slane %v2143_v14, 2  ;;  %v1315_v22 = vmul.f32 %v1303_v43, %v5229_v56  ;;  %v1294_v48 = vand.u32 2147483647, %v1282_v60  ;;  %v5359_v56 = vpop.permute.xlu0 %1796 }
 0x18d   : > { %v1726_v58 = vrot.slane %v1725_v35, 1  ;;  %v2133_v52 = vrot.slane %v2132_v28, 2  ;;  %v1323_v16 = vadd.f32 %v1322_v45, %v1314_v61  ;;  %v1267_v23 = vsel %vm1225_vm4, %v5066_v53, %v5162_v20  ;;  %v1354_v45 = vld [vmem:[#allocation12 + $0x60] sm:$0xff] }
 0x18e   : > { %v1738_v10 = vadd.f32 %v1737_v59, %v1736_v41  ;;  %v2145_v33 = vadd.f32 %v2144_v31, %v2143_v14  ;;  %2519 = vrot.lane.b32.xlu1 %v6580_v13, %s3434_s9  ;;  %v1334_v55 = vadd.f32 %v1333_v24, %v1315_v22  ;;  %v1295_v17 = vand.u32 2147483647, %v1283_v39  ;;  %v5364_v39 = vpop.permute.xlu1 %1798  ;;  %v6584_v24 = vld [vmem:[#allocation47_spill] sm:$0xff] }
 0x18f   : > { %v1727_v27 = vadd.f32 %v1726_v58, %v1725_v35  ;;  %v2134_v43 = vadd.f32 %v2133_v52, %v2132_v28  ;;  %2517 = vrot.lane.b32.xlu0 %v6582_v40, %s3434_s9  ;;  %v1273_v59 = vsel %vm1225_vm4, %v5162_v20, %v5066_v53  ;;  %v1316_v5 = vmul.f32 %v1304_v8, %v5206_v1  ;;  %v6585_v8 = vld [vmem:[#allocation61_spill] sm:$0xff]  ;;  %v1355_v31 = vld [vmem:[#allocation12 + $0x68] sm:$0xff]  ;;  %v1716_v58 = vld [vmem:[#allocation10] sm:$0x3] }
 0x190   : > { %v2146_v61 = vrot.slane %v2145_v33, 1  ;;  %v1317_v60 = vmul.f32 %v1305_v34, %v5214_v29  ;;  %v1308_v19 = vmul.f32 %v1273_v59, %v6583_v12  ;;  %v1309_v42 = vmul.f32 %v1267_v23, %v6522_v46 }
 0x191   : > { %v1741_v28 = vcombine.low %v1727_v27, %v1738_v10  ;;  %v2135_v35 = vrot.slane %v2134_v43, 1  ;;  %v1266_v53 = vsel %vm1225_vm4, %v5043_v25, %v5133_v38  ;;  %v1324_v4 = vadd.f32 %v1323_v16, %v1316_v5  ;;  %v6587_v16 = vld [vmem:[#allocation57_spill] sm:$0xff]  ;;  %v6588_v10 = vld [vmem:[#allocation31_spill] sm:$0xff] }
 0x192   : > { %v2147_v20 = vadd.f32 %v2146_v61, %v2145_v33  ;;  %v1335_v41 = vadd.f32 %v1334_v55, %v1317_v60  ;;  %v1272_v1 = vsel %vm1225_vm4, %v5133_v38, %v5043_v25  ;;  %v1307_v46 = vmul.f32 %v1266_v53, %v6585_v8  ;;  %v6590_v38 = vld [vmem:[#allocation68_spill] sm:$0xff]  ;;  %v6591_v55 = vld [vmem:[#allocation33_spill] sm:$0xff]  ;;  %v5395_v61 = vpop.permute.xlu1 %1810 }
 0x193   : > { %v1748_v29 = vrot.slane %v1741_v28, %v6530_v51  ;;  %v2136_v14 = vadd.f32 %v2135_v35, %v2134_v43  ;;  %v1306_v9 = vmul.f32 %v1272_v1, %v6584_v24  ;;  %v6586_v34 = vsub.f32 %v6528_v57, %v5220_v21  ;;  %v6595_v35 = vld [vmem:[#allocation65_spill] sm:$0xff] }
 0x194   : > { %v1320_v52 = vmul.f32 %v1308_v19, %v5268_v37  ;;  %v6589_v33 = vrot.slane %v6588_v10, 4  ;;  %v6592_v23 = vrot.slane %v6591_v55, 4  ;;  %v1319_v21 = vmul.f32 %v1307_v46, %v1295_v17  ;;  %v5397_v37 = vpop.permute.xlu0 %1808  ;;  %v6593_v19 = vld [vmem:[#allocation73_spill] sm:$0xff]  ;;  %v6600_v10 = vld [vmem:[#allocation76_spill] sm:$0xff] }
 0x195   : > { %v1297_v22 = vand.u32 2147483647, %v6586_v34  ;;  %v1755_v43 = vrot.slane %v1748_v29, %v6530_v51  ;;  %v2150_v59 = vcombine.low %v2136_v14, %v2147_v20  ;;  %v1318_v57 = vmul.f32 %v1306_v9, %v1294_v48  ;;  %v2125_v29 = vld [vmem:[#allocation11] sm:$0x3]  ;;  %v6597_v8 = vld [vmem:[#allocation77_spill] sm:$0xff] }
 0x196   : > { %v5386_v25 = vsel %vm1372_vm9, %v6589_v33, %v6587_v16  ;;  %v5392_v27 = vsel %vm1372_vm9, %v6592_v23, %v6590_v38  ;;  %v6594_v28 = vrot.slane %v6593_v19, 4  ;;  %v6596_v53 = vrot.slane %v6595_v35, 4 }
 0x197   : > { %v1321_v5 = vmul.f32 %v1309_v42, %v1297_v22  ;;  %v1419_v60 = vsub.f32 %v1354_v45, %v5386_v25  ;;  %v1420_v12 = vsub.f32 %v1355_v31, %v5392_v27  ;;  %v1757_v24 = vadd.f32 %v1755_v43, %v1716_v58 }
 0x198   : > { %v1536_v1 = vsel %vm1372_vm9, %v6596_v53, %v6594_v28  ;;  %v2157_v48 = vrot.slane %v2150_v59, %v6530_v51  ;;  %v1325_v17 = vadd.f32 %v1324_v4, %v1318_v57  ;;  %v1336_v20 = vadd.f32 %v1335_v41, %v1319_v21  ;;  %v6601_v41 = vld [vmem:[#allocation72_spill] sm:$0xff] }
 0x199   : > { %v1433_v14 = vand.u32 2147483647, %v1419_v60  ;;  %v1434_v9 = vand.u32 2147483647, %v1420_v12  ;;  %v6598_v42 = vrot.slane %v6597_v8, 4  ;;  %v6599_v46 = vmov %v6594_v28  ;;  %v5423_v12 = vpop.permute.xlu1 %2184 }
 0x19a   : > { %v1543_v31 = vrot.slane %v5073_v6, 4  ;;  %1758 = vst.msk [vmem:[#allocation10] sm:$0x3] %vm4140_vm5, %v1757_v24  ;;  %v2164_v34 = vrot.slane %v2157_v48, %v6530_v51  ;;  %v1326_v22 = vadd.f32 %v1325_v17, %v1320_v52  ;;  %v1337_v58 = vadd.f32 %v1336_v20, %v1321_v5  ;;  %v5425_v52 = vpop.permute.xlu0 %2172  ;;  %v6603_v5 = vld [vmem:[#allocation80_spill] sm:$0xff]  ;;  %v6606_v17 = vld [vmem:[#allocation50_spill] sm:$0xff] }
 0x19b   : > { %v1540_v45 = vsel %vm1372_vm9, %v6599_v46, %v6598_v42  ;;  %v1576_v4 = vadd.f32 %v1536_v1, %v6600_v10  ;;  %v1509_v33 = vmul.f32 %v6601_v41, %v1433_v14  ;;  %v1510_v55 = vmul.f32 %v5071_v47, %v1434_v9  ;;  %v5436_v9 = vld [vmem:[#allocation13 + $0x48] sm:$0xff] }
 0x19c   : > { %v6602_v23 = vmov %v6598_v42  ;;  %v1603_v59 = vmul.f32 0.5, %v6582_v40  ;;  %v2166_v6 = vadd.f32 %v2164_v34, %v2125_v29  ;;  %v1327_v57 = vrot.slane %v1326_v22, 4  ;;  %v6604_v29 = vld [vmem:[#allocation55_spill] sm:$0xff] }
 0x19d   : > { %v1544_v43 = vsel %vm1372_vm9, %v6602_v23, %v1543_v31  ;;  %v1338_v21 = vrot.slane %v1337_v58, 4  ;;  %v1577_v60 = vadd.f32 %v1576_v4, %v1540_v45  ;;  %v1541_v19 = vrot.slane %v6603_v5, 4  ;;  %v6608_v42 = vld [vmem:[#allocation59_spill] sm:$0xff] }
 0x19e   : > { %v1547_v28 = vrot.slane %v1510_v55, 4  ;;  %v1604_v35 = vmul.f32 0.5, %v6580_v13  ;;  %v1605_v47 = vadd.f32 0.5, %v1603_v59  ;;  %2167 = vst.msk [vmem:[#allocation11] sm:$0x3] %vm4140_vm5, %v2166_v6  ;;  %v1328_v53 = vadd.f32 %v1327_v57, %v1326_v22  ;;  %v6613_v6 = vld [vmem:[#allocation58_spill] sm:$0xff] }
 0x19f   : > { %v1339_v1 = vadd.f32 %v1338_v21, %v1337_v58  ;;  %v1578_v24 = vadd.f32 %v1577_v60, %v1544_v43  ;;  %v6605_v48 = vrot.slane %v6604_v29, 4  ;;  %v6607_v20 = vrot.slane %v6606_v17, 4  ;;  %v6611_v58 = vld [vmem:[#allocation78_spill] sm:$0xff] }
 0x1a0   : > { %v1957_v8 = vmul.f32 %v5436_v9, %v4967_v26  ;;  %v6609_v46 = vrot.slane %v6608_v42, 4  ;;  %v1548_v22 = vsel %vm1372_vm9, %v1543_v31, %v1547_v28  ;;  %v6612_v10 = vrot.slane %v6611_v58, 4  ;;  %v5580_v26 = vld [vmem:[#allocation12 + $0x48] sm:$0xff] }
 0x1a1   : > { %v1534_v14 = vsel %vm1372_vm9, %v6607_v20, %v6605_v48  ;;  %v6610_v45 = vmov %v6605_v48  ;;  %v1329_v41 = vrot.slane %v1328_v53, 2  ;;  %v1545_v55 = vrot.slane %v1509_v33, 4 }
 0x1a2   : > { %v1538_v34 = vsel %vm1372_vm9, %v6610_v45, %v6609_v46  ;;  %v1552_v4 = vsel %vm1372_vm9, %v1547_v28, %v6612_v10  ;;  %v1579_v23 = vadd.f32 %v1578_v24, %v1548_v22  ;;  %v1606_v43 = vadd.f32 0.5, %v1604_v35  ;;  %v5463_v24 = vpop.permute.xlu0 %2205 }
 0x1a3   : > { %v1607_v59 = vfloor.f32 %v1605_v47  ;;  %v1565_v57 = vadd.f32 %v1534_v14, %v6613_v6  ;;  %v1591_v21 = vsel %vm1225_vm4, %v5164_v49, %v5192_v62  ;;  %v1592_v31 = vsel %vm1225_vm4, %v5192_v62, %v5164_v49  ;;  %v5461_v47 = vpop.permute.xlu1 %2207  ;;  %v5467_v14 = vld [vmem:[#allocation13 + $0x40] sm:$0xff] }
 0x1a4   : > { %v1340_v60 = vrot.slane %v1339_v1, 2  ;;  %v6614_v5 = vmov %v6609_v46  ;;  %v1580_v28 = vadd.f32 %v1579_v23, %v1552_v4  ;;  %v1608_v35 = vfloor.f32 %v1606_v43 }
 0x1a5   : > { %v1542_v33 = vsel %vm1372_vm9, %v6614_v5, %v1541_v19  ;;  %v1609_v29 = vmul.f32 2.0, %v1607_v59  ;;  %v1566_v48 = vadd.f32 %v1565_v57, %v1538_v34  ;;  %v1593_v17 = vsub.f32 %v6582_v40, %v1592_v31  ;;  %v6615_v34 = vld [vmem:[#allocation67_spill] sm:$0xff]  ;;  %v6617_v57 = vld [vmem:[#allocation41_spill] sm:$0xff] }
 0x1a6   : > { %v1594_v20 = vsub.f32 %v6580_v13, %v1591_v21  ;;  %v1956_v62 = vmul.f32 %v5467_v14, %v4970_v2  ;;  %v1546_v49 = vsel %vm1372_vm9, %v1541_v19, %v1545_v55  ;;  %v1581_v42 = vrot.slane %v1580_v28, 4 }
 0x1a7   : > { %v1610_v46 = vmul.f32 2.0, %v1608_v35  ;;  %v1330_v45 = vadd.f32 %v1329_v41, %v1328_v53  ;;  %v1611_v22 = vsub.f32 %v6582_v40, %v1609_v29  ;;  %v1567_v58 = vadd.f32 %v1566_v48, %v1542_v33  ;;  %v6618_v35 = vld [vmem:[#allocation79_spill] sm:$0xff]  ;;  %v6620_v33 = vld [vmem:[#allocation48_spill] sm:$0xff] }
 0x1a8   : > { %v1596_v10 = vand.u32 2147483647, %v1594_v20  ;;  %v1341_v4 = vadd.f32 %v1340_v60, %v1339_v1  ;;  %v6616_v23 = vrot.slane %v6615_v34, 4  ;;  %v1582_v59 = vadd.f32 %v1581_v42, %v1580_v28  ;;  %v6619_v41 = vld [vmem:[#allocation103_spill] sm:$0xff]  ;;  %v5490_v28 = vpop.permute.xlu0 %2217 }
 0x1a9   : > { %v1612_v6 = vsub.f32 %v6580_v13, %v1610_v46  ;;  %v5478_v21 = vmul.f32 %v1957_v8, %v6617_v57  ;;  %v1613_v31 = vand.u32 2147483647, %v1611_v22  ;;  %v1568_v19 = vadd.f32 %v1567_v58, %v1546_v49 }
 0x1aa   : > { %v1550_v43 = vsel %vm1372_vm9, %v1545_v55, %v6616_v23  ;;  %v1595_v5 = vand.u32 2147483647, %v1593_v17  ;;  %v5481_v53 = vmul.f32 %v1956_v62, %v6618_v35  ;;  %v6621_v29 = vsub.f32 %v6619_v41, %v6620_v33  ;;  %v5488_v55 = vpop.permute.xlu1 %2219  ;;  %v5523_v41 = vld [vmem:[#allocation12 + $0x20] sm:$0xff] }
 0x1ab   : > { %v1583_v60 = vrot.slane %v1582_v59, 2  ;;  %v1614_v48 = vand.u32 2147483647, %v1612_v6  ;;  %v1331_v20 = vrot.slane %v1330_v45, 1  ;;  %v1569_v8 = vadd.f32 %v1568_v19, %v1550_v43 }
 0x1ac   : > { %v5486_v1 = vand.u32 2147483647, %v6621_v29  ;;  %vm1598_vm11 = vcmp.eq.f32.partialorder %v1596_v10, 4.0  ;;  %v1342_v17 = vrot.slane %v1341_v4, 1  ;;  %v1784_v62 = vsel %vm1783_vm3, %v5194_v11, %v5264_v0  ;;  %v5521_v19 = vpop.permute.xlu0 %1765 }
 0x1ad   : > { %v1584_v49 = vadd.f32 %v1583_v60, %v1582_v59  ;;  %vm1616_vm7 = vcmp.lt.f32.partialorder %v1614_v48, 0.5  ;;  %vm1615_vm15 = vcmp.lt.f32.partialorder %v1613_v31, 0.5  ;;  %v1570_v42 = vrot.slane %v1569_v8, 4 }
 0x1ae   : > { %vm1597_vm0 = vcmp.eq.f32.partialorder %v1595_v5, 4.0  ;;  %v1790_v46 = vsel %vm1783_vm3, %v5264_v0, %v5194_v11  ;;  %v3047_v10 = vsel %vm1598_vm11, 1.0, %v6488_v44  ;;  %vm2192_vm6 = vcmp.lt.s32.totalorder %v6397_v54, 12  ;;  %v5519_v31 = vpop.permute.xlu1 %1777 }
 0x1af   : > { %v1585_v58 = vrot.slane %v1584_v49, 1  ;;  %v5505_v34 = vsel %vm1616_vm7, 1.0, %v6488_v44  ;;  %v1571_v23 = vadd.f32 %v1570_v42, %v1569_v8  ;;  %v1785_v43 = vsel %vm1783_vm3, %v5223_v36, %v5266_v3  ;;  %v3264_v8 = vld [vmem:[#allocation12 + $0x30] sm:$0xff] }
 0x1b0   : > { %6622 = vst [vmem:[#allocation113_spill] sm:$0xff] %v5505_v34  ;;  %v1791_v11 = vsel %vm1783_vm3, %v5266_v3, %v5223_v36  ;;  %v1343_v0 = vadd.f32 %v1342_v17, %v1341_v4  ;;  %v5516_v6 = vsel %vm1615_vm15, 1.0, %v6488_v44  ;;  %v3046_v57 = vsel %vm1597_vm0, 1.0, %v6488_v44  ;;  %v3263_v4 = vld [vmem:[#allocation12 + $0x28] sm:$0xff] }
 0x1b1   : > { %v1586_v59 = vadd.f32 %v1585_v58, %v1584_v49  ;;  %6623 = vst [vmem:[#allocation97_spill] sm:$0xff] %v5516_v6  ;;  %v1332_v5 = vadd.f32 %v1331_v20, %v1330_v45  ;;  %v1572_v35 = vrot.slane %v1571_v23, 2  ;;  %v1832_v33 = vsub.f32 %v5523_v41, %v1790_v46  ;;  %v3265_v49 = vld [vmem:[#allocation12 + $0x38] sm:$0xff]  ;;  %v6624_v46 = vld [vmem:[#allocation111_spill] sm:$0xff] }
 0x1b2   : > { %v2193_v36 = vsel %vm2192_vm6, %v5299_v63, %v5327_v32  ;;  %v1623_v3 = vmul.f32 %v5505_v34, %v3047_v10  ;;  %v1833_v29 = vsub.f32 %v3263_v4, %v1784_v62  ;;  %v2199_v60 = vsel %vm2192_vm6, %v5327_v32, %v5299_v63  ;;  %v6627_v62 = vld [vmem:[#allocation63_spill] sm:$0xff] }
 0x1b3   : > { %v5539_v45 = vsel %vm1783_vm3, %v5225_v30, %v5345_v50  ;;  %v1573_v48 = vadd.f32 %v1572_v35, %v1571_v23  ;;  %v1622_v20 = vmul.f32 %v5516_v6, %v3046_v57  ;;  %v1834_v17 = vsub.f32 %v3264_v8, %v1791_v11  ;;  %v6625_v57 = vld [vmem:[#allocation64_spill] sm:$0xff] }
 0x1b4   : > { %v1835_v42 = vsub.f32 %v3265_v49, %v1785_v43  ;;  %v1627_v58 = vmul.f32 %v5505_v34, %v1586_v59  ;;  %v1625_v10 = vmul.f32 %v1623_v3, %v1343_v0  ;;  %v5548_v63 = vsel %vm1783_vm3, %v5345_v50, %v5225_v30  ;;  %v1813_v50 = vpop.permute.xlu1 %1812  ;;  %v1801_v59 = vpop.permute.xlu0 %1800 }
 0x1b5   : > { %v1574_v32 = vrot.slane %v1573_v48, 1  ;;  %v1624_v22 = vmul.f32 %v1622_v20, %v1332_v5  ;;  %v1844_v23 = vand.u32 2147483647, %v1832_v33  ;;  %v2194_v11 = vsel %vm2192_vm6, %v6625_v57, %v5335_v15 }
 0x1b6   : > { %v1845_v43 = vand.u32 2147483647, %v1833_v29  ;;  %v2242_v35 = vsub.f32 %v3263_v4, %v2193_v36  ;;  %v2200_v0 = vsel %vm2192_vm6, %v5335_v15, %v6625_v57  ;;  %v1821_v30 = vsel %vm1783_vm3, %v5364_v39, %v5395_v61  ;;  %v6626_v29 = vld [vmem:[#allocation83_spill] sm:$0xff] }
 0x1b7   : > { %v1575_v5 = vadd.f32 %v1574_v32, %v1573_v48  ;;  %v1846_v33 = vand.u32 2147483647, %v1834_v17  ;;  %v1847_v3 = vand.u32 2147483647, %v1835_v42  ;;  %v1827_v36 = vsel %vm1783_vm3, %v5395_v61, %v5364_v39  ;;  %v6628_v42 = vld [vmem:[#allocation46_spill] sm:$0xff]  ;;  %v6629_v32 = vld [vmem:[#allocation85_spill] sm:$0xff] }
 0x1b8   : > { %v1629_v4 = vadd.f32 %v1627_v58, %v1625_v10  ;;  %v1858_v20 = vmul.f32 %v1827_v36, %v6626_v29  ;;  %v1859_v15 = vmul.f32 %v1821_v30, %v6627_v62  ;;  %v1820_v57 = vsel %vm1783_vm3, %v5359_v56, %v5397_v37 }
 0x1b9   : > { %v1626_v34 = vmul.f32 %v5516_v6, %v1575_v5  ;;  %v2244_v48 = vsub.f32 %v3265_v49, %v2194_v11  ;;  %v1826_v17 = vsel %vm1783_vm3, %v5397_v37, %v5359_v56  ;;  %v1857_v39 = vmul.f32 %v1820_v57, %v6628_v42  ;;  %v6633_v42 = vld [vmem:[#allocation90_spill] sm:$0xff]  ;;  %v6647_v6 = vld [vmem:[#allocation27_spill] sm:$0xff] }
 0x1ba   : > { %v2243_v61 = vsub.f32 %v3264_v8, %v2200_v0  ;;  %v1870_v58 = vmul.f32 %v1858_v20, %v1846_v33  ;;  %v1871_v10 = vmul.f32 %v1859_v15, %v1847_v3  ;;  %v1856_v62 = vmul.f32 %v1826_v17, %v6629_v32  ;;  %v6631_v0 = vld [vmem:[#allocation71_spill] sm:$0xff]  ;;  %v1621_v20 = vld [vmem:[#allocation6] sm:$0x3] }
 0x1bb   : > { %v1628_v30 = vadd.f32 %v1626_v34, %v1624_v22  ;;  %v2241_v36 = vsub.f32 %v5523_v41, %v2199_v60  ;;  %v2254_v29 = vand.u32 2147483647, %v2242_v35  ;;  %v1869_v44 = vmul.f32 %v1857_v39, %v1845_v43  ;;  %v5592_v22 = vpop.permute.xlu1 %2186  ;;  %v5594_v34 = vpop.permute.xlu0 %2174  ;;  %v6632_v3 = vld [vmem:[#allocation75_spill] sm:$0xff] }
 0x1bc   : > { %v1837_v49 = vsub.f32 %v5580_v26, %v5539_v45  ;;  %v1868_v11 = vmul.f32 %v1856_v62, %v1844_v23  ;;  %v2230_v56 = vsel %vm2192_vm6, %v5461_v47, %v5488_v55  ;;  %v2236_v37 = vsel %vm2192_vm6, %v5488_v55, %v5461_v47  ;;  %v6630_v45 = vld [vmem:[#allocation88_spill] sm:$0xff]  ;;  %v5610_v15 = vld [vmem:[#allocation12 + $0x40] sm:$0xff] }
 0x1bd   : > { %v1632_v41 = vcombine.low %v1628_v30, %v1629_v4  ;;  %v2256_v60 = vand.u32 2147483647, %v2244_v48  ;;  %v5596_v8 = vadd.f32 %v1871_v10, %v1869_v44  ;;  %v2267_v23 = vmul.f32 %v2236_v37, %v6630_v45  ;;  %v5620_v62 = vld [vmem:[#allocation12 + $0x68] sm:$0xff] }
 0x1be   : > { %v2255_v43 = vand.u32 2147483647, %v2243_v61  ;;  %v1880_v35 = vadd.f32 %v1870_v58, %v1868_v11  ;;  %v2268_v5 = vmul.f32 %v2230_v56, %v6631_v0  ;;  %v2229_v33 = vsel %vm2192_vm6, %v5463_v24, %v5490_v28  ;;  %v6635_v58 = vld [vmem:[#allocation94_spill] sm:$0xff]  ;;  %6637 = vst [vmem:[#allocation35_spill] sm:$0xff] %v5620_v62  ;;  %v6639_v11 = vld [vmem:[#allocation96_spill] sm:$0xff] }
 0x1bf   : > { %v1639_v47 = vrot.slane %v1632_v41, %v6530_v51  ;;  %v2253_v55 = vand.u32 2147483647, %v2241_v36  ;;  %v2235_v44 = vsel %vm2192_vm6, %v5490_v28, %v5463_v24  ;;  %v2266_v4 = vmul.f32 %v2229_v33, %v6632_v3  ;;  %v3269_v24 = vld [vmem:[#allocation12 + $0x58] sm:$0xff]  ;;  %v5637_v0 = vld [vmem:[#allocation12 + $0x60] sm:$0xff] }
 0x1c0   : > { %v1836_v57 = vsub.f32 %v5610_v15, %v5548_v63  ;;  %v2279_v48 = vmul.f32 %v2267_v23, %v2255_v43  ;;  %v2280_v17 = vmul.f32 %v2268_v5, %v2256_v60  ;;  %v2265_v39 = vmul.f32 %v2235_v44, %v6633_v42  ;;  %v5633_v23 = vpop.permute.xlu1 %2221  ;;  %v5635_v43 = vpop.permute.xlu0 %2209  ;;  %6641 = vst [vmem:[#allocation100_spill] sm:$0xff] %v5637_v0 }
 0x1c1   : > { %v6634_v61 = vrot.slane %v5018_v18, 4  ;;  %v6636_v10 = vrot.slane %v6635_v58, 4  ;;  %v1935_v28 = vsub.f32 %v3269_v24, %v5620_v62  ;;  %v1646_v30 = vrot.slane %v1639_v47, %v6530_v51 }
 0x1c2   : > { %v2278_v36 = vmul.f32 %v2266_v4, %v2254_v29  ;;  %v6638_v63 = vrot.slane %v6624_v46, 4  ;;  %v6640_v56 = vrot.slane %v6639_v11, 4  ;;  %v2277_v41 = vmul.f32 %v2265_v39, %v2253_v55  ;;  %v3271_v29 = vld [vmem:[#allocation12 + $0x50] sm:$0xff]  ;;  %v6645_v39 = vld [vmem:[#allocation91_spill] sm:$0xff] }
 0x1c3   : > { %v2392_v32 = vsel %vm1372_vm9, %v6636_v10, %v6634_v61  ;;  %v1822_v60 = vsel %vm1783_vm3, %v1801_v59, %v1813_v50  ;;  %v1828_v45 = vsel %vm1783_vm3, %v1813_v50, %v1801_v59  ;;  %v1934_v5 = vsub.f32 %v3271_v29, %v5637_v0  ;;  %v6644_v4 = vld [vmem:[#allocation101_spill] sm:$0xff]  ;;  %v2324_v29 = vld [vmem:[#allocation12 + $0x68] sm:$0xf] }
 0x1c4   : > { %v2390_v37 = vsel %vm1372_vm9, %v6640_v56, %v6638_v63  ;;  %v1648_v33 = vadd.f32 %v1646_v30, %v1621_v20  ;;  %v1849_v47 = vand.u32 2147483647, %v1837_v49  ;;  %v5640_v44 = vadd.f32 %v2280_v17, %v2278_v36  ;;  %v3272_v59 = vld [vmem:[#allocation13 + $0x38] sm:$0xff]  ;;  %v3273_v10 = vld [vmem:[#allocation13 + $0x30] sm:$0xff]  ;;  %v3274_v49 = vld [vmem:[#allocation12 + $0x48] sm:$0xff] }
 0x1c5   : > { %v1848_v55 = vand.u32 2147483647, %v1836_v57  ;;  %v5642_v3 = vadd.f32 %v2279_v48, %v2277_v41  ;;  %v1860_v42 = vmul.f32 %v1828_v45, %v6644_v4  ;;  %v1861_v50 = vmul.f32 %v1822_v60, %v6645_v39  ;;  %v6646_v63 = vld [vmem:[#allocation34_spill] sm:$0xff]  ;;  %v6648_v20 = vld [vmem:[#allocation81_spill] sm:$0xff]  ;;  %v6649_v17 = vld [vmem:[#allocation56_spill] sm:$0xff] }
 0x1c6   : > { %6642 = vst [vmem:[#allocation105_spill] sm:$0xff] %v5640_v44  ;;  %v2422_v61 = vmul.f32 %v3272_v59, %v2392_v32  ;;  %v2421_v24 = vmul.f32 %v3273_v10, %v2390_v37  ;;  %v2395_v56 = vrot.slane %v6646_v63, 4  ;;  %v6266_v51 = vrot.slane %v6647_v6, 4  ;;  %1649 = vst.msk [vmem:[#allocation6] sm:$0x3] %vm4140_vm5, %v1648_v33  ;;  %v3275_v48 = vld [vmem:[#allocation12 + $0x40] sm:$0xff] }
 0x1c7   : > { %6643 = vst [vmem:[#allocation98_spill] sm:$0xff] %v5642_v3  ;;  %v2348_v57 = vsub.f32 %v3274_v49, %v6648_v20  ;;  %v2347_v30 = vsub.f32 %v3275_v48, %v6649_v17  ;;  %v1872_v36 = vmul.f32 %v1860_v42, %v1848_v55  ;;  %v1873_v41 = vmul.f32 %v1861_v50, %v1849_v47  ;;  %v6650_v32 = vld [vmem:[#allocation26_spill] sm:$0xff]  ;;  %v3277_v4 = vld [vmem:[#allocation12 + $0x68] sm:$0xff]  ;;  %v5659_v59 = vld [vmem:[#allocation12 + $0x70] sm:$0xff]  ;;  %v5670_v42 = vpop.permute.xlu0 %1767 }
 0x1c8   : > { %v5654_v60 = vadd.f32 %v6650_v32, %v5478_v21  ;;  %v1947_v37 = vand.u32 2147483647, %v1935_v28  ;;  %v5656_v45 = vld [vmem:[#allocation12 + $0x78] sm:$0xff]  ;;  %6652 = vst [vmem:[#allocation66_spill] sm:$0xff] %v5659_v59  ;;  %v3279_v33 = vld [vmem:[#allocation12 + $0x60] sm:$0xff]  ;;  %v2352_v55 = vsub.f32 %v2324_v29, %v6590_v38  ;;  %v5668_v28 = vpop.permute.xlu1 %1779  ;;  %v5676_v17 = vmul.f32 %v2421_v24, %v5486_v1  ;;  %v3281_v24 = vld [vmem:[#allocation13 + $0x50] sm:$0xff] }
 0x1c9   : > { %6651 = vst [vmem:[#allocation104_spill] sm:$0xff] %v5656_v45  ;;  %v1937_v39 = vsub.f32 %v3277_v4, %v5656_v45  ;;  %v1936_v10 = vsub.f32 %v3279_v33, %v5659_v59  ;;  %v2323_v49 = vld [vmem:[#allocation12 + $0x60] sm:$0xf]  ;;  %v1946_v20 = vand.u32 2147483647, %v1934_v5  ;;  %v5663_v47 = vadd.f32 %v1880_v35, %v1872_v36  ;;  %v3280_v29 = vld [vmem:[#allocation13 + $0x58] sm:$0xff] }
 0x1ca   : > { %v5666_v21 = vadd.f32 %v5596_v8, %v1873_v41  ;;  %v6655_v50 = vld [vmem:[#allocation102_spill] sm:$0xff]  ;;  %v6656_v32 = vrot.slane %v5018_v18, 4  ;;  %v6657_v38 = vrot.slane %v6624_v46, 4  ;;  %v2338_v35 = vld [vmem:[#allocation13 + $0x68] sm:$0xf]  ;;  %v6658_v36 = vld [vmem:[#allocation29_spill] sm:$0xff]  ;;  %v2351_v1 = vsub.f32 %v2323_v49, %v6587_v16 }
 0x1cb   : > { %6653 = vst [vmem:[#allocation28_spill] sm:$0xff] %v5663_v47  ;;  %v5673_v48 = vmul.f32 %v2422_v61, %v6655_v50  ;;  %v1959_v41 = vmul.f32 %v3280_v29, %v6658_v36  ;;  %v2362_v4 = vand.u32 2147483647, %v2348_v57  ;;  %v2361_v61 = vand.u32 2147483647, %v2347_v30  ;;  %v6659_v50 = vld [vmem:[#allocation38_spill] sm:$0xff] }
 0x1cc   : > { %6654 = vst [vmem:[#allocation115_spill] sm:$0xff] %v5666_v21  ;;  %v2396_v5 = vsel %vm1372_vm9, %v6656_v32, %v2395_v56  ;;  %v2394_v8 = vsel %vm1372_vm9, %v6657_v38, %v6266_v51  ;;  %v2337_v33 = vld [vmem:[#allocation13 + $0x60] sm:$0xf]  ;;  %v1958_v7 = vmul.f32 %v3281_v24, %v6659_v50  ;;  %v1949_v63 = vand.u32 2147483647, %v1937_v39  ;;  %v3282_v36 = vld [vmem:[#allocation13 + $0x68] sm:$0xff] }
 0x1cd   : > { %v1948_v32 = vand.u32 2147483647, %v1936_v10  ;;  %v6660_v45 = vld [vmem:[#allocation82_spill] sm:$0xff]  ;;  %v2424_v18 = vmul.f32 %v5436_v9, %v2396_v5  ;;  %v2423_v38 = vmul.f32 %v5467_v14, %v2394_v8  ;;  %v2366_v51 = vand.u32 2147483647, %v2352_v55  ;;  %v6662_v57 = vld [vmem:[#allocation60_spill] sm:$0xff] }
 0x1ce   : > { %v2399_v59 = vrot.slane %v6660_v45, 4  ;;  %v6661_v46 = vld [vmem:[#allocation62_spill] sm:$0xff]  ;;  %v1961_v30 = vmul.f32 %v3282_v36, %v6662_v57  ;;  %v6663_v44 = vld [vmem:[#allocation108_spill] sm:$0xff]  ;;  %v2365_v5 = vand.u32 2147483647, %v2351_v1  ;;  %v5705_v36 = vpop.permute.xlu1 %1814  ;;  %v1970_v57 = vmul.f32 %v1958_v7, %v1946_v20 }
 0x1cf   : > { %v2397_v21 = vrot.slane %v6661_v46, 4  ;;  %v3283_v47 = vld [vmem:[#allocation13 + $0x60] sm:$0xff]  ;;  %v2322_v3 = vld [vmem:[#allocation12 + $0x58] sm:$0xff]  ;;  %v6668_v9 = vld [vmem:[#allocation84_spill] sm:$0xff]  ;;  %v5707_v46 = vpop.permute.xlu0 %1802  ;;  %v2195_v7 = vsel %vm2192_vm6, %v5425_v52, %v5423_v12 }
 0x1d0   : > { %v1960_v16 = vmul.f32 %v3283_v47, %v6663_v44  ;;  %v2428_v49 = vmul.f32 %v2399_v59, %v2338_v35  ;;  %v6664_v50 = vld [vmem:[#allocation106_spill] sm:$0xff]  ;;  %v1976_v14 = vadd.f32 %v6668_v9, %v5481_v53  ;;  %v2467_v47 = vrot.slane %v5676_v17, 4  ;;  %v2321_v1 = vld [vmem:[#allocation12 + $0x50] sm:$0xff] }
 0x1d1   : > { %v6665_v39 = vrot.slane %v6664_v50, 4  ;;  %v6666_v10 = vld [vmem:[#allocation86_spill] sm:$0xff]  ;;  %v2427_v8 = vmul.f32 %v2397_v21, %v2337_v33  ;;  %v1971_v35 = vmul.f32 %v1959_v41, %v1947_v37  ;;  %v5711_v44 = vmul.f32 %v2424_v18, %v2362_v4 }
 0x1d2   : > { %v6667_v62 = vrot.slane %v6666_v10, 4  ;;  %v2400_v10 = vsel %vm1372_vm9, %v2395_v56, %v2399_v59  ;;  %v6669_v53 = vrot.slane %v6647_v6, 4  ;;  %v2350_v33 = vsub.f32 %v2322_v3, %v5392_v27 }
 0x1d3   : > { %v1973_v9 = vmul.f32 %v1961_v30, %v1949_v63  ;;  %v1972_v55 = vmul.f32 %v1960_v16, %v1948_v32  ;;  %v5719_v0 = vmul.f32 %v2428_v49, %v2366_v51  ;;  %v2426_v18 = vmul.f32 %v3280_v29, %v2400_v10 }
 0x1d4   : > { %v5700_v45 = vsel %vm1372_vm9, %v6667_v62, %v6665_v39  ;;  %v5713_v62 = vmul.f32 %v2423_v38, %v2361_v61  ;;  %v2398_v39 = vsel %vm1372_vm9, %v6669_v53, %v2397_v21  ;;  %v5725_v56 = vmul.f32 %v2427_v8, %v2365_v5  ;;  %v5748_v21 = vpop.permute.xlu0 %2176  ;;  %v3285_v61 = vld [vmem:[#allocation12 + $0x58] sm:$0xff] }
 0x1d5   : > { %v2201_v37 = vsel %vm2192_vm6, %v5423_v12, %v5425_v52  ;;  %v1793_v27 = vsel %vm1783_vm3, %v5519_v31, %v5521_v19  ;;  %v2425_v51 = vmul.f32 %v3281_v24, %v2398_v39  ;;  %v1787_v3 = vsel %vm1783_vm3, %v5521_v19, %v5519_v31  ;;  %v5746_v52 = vpop.permute.xlu1 %2188  ;;  %v3284_v19 = vld [vmem:[#allocation12 + $0x50] sm:$0xff] }
 0x1d6   : > { %v1988_v63 = vadd.f32 %v5654_v60, %v1971_v35  ;;  %v2349_v59 = vsub.f32 %v2321_v1, %v5386_v25  ;;  %v2246_v20 = vsub.f32 %v5580_v26, %v2195_v7  ;;  %v2202_v12 = vsel %vm2192_vm6, %v5592_v22, %v5594_v34 }
 0x1d7   : > { %v1977_v29 = vadd.f32 %v1976_v14, %v1970_v57  ;;  %v2364_v41 = vand.u32 2147483647, %v2350_v33  ;;  %v2481_v4 = vrot.slane %v5719_v0, 4  ;;  %v2245_v31 = vsub.f32 %v5610_v15, %v2201_v37 }
 0x1d8   : > { %v1838_v60 = vsub.f32 %v3284_v19, %v1793_v27  ;;  %v2012_v25 = vmul.f32 0.25, %v6582_v40  ;;  %v2479_v26 = vrot.slane %v5725_v56, 4  ;;  %v1839_v24 = vsub.f32 %v3285_v61, %v1787_v3  ;;  %v5776_v1 = vpop.permute.xlu0 %2211 }
 0x1d9   : > { %v2196_v32 = vsel %vm2192_vm6, %v5594_v34, %v5592_v22  ;;  %v2013_v38 = vmul.f32 0.25, %v6580_v13  ;;  %v2247_v57 = vsub.f32 %v3284_v19, %v2202_v12  ;;  %v2237_v15 = vsel %vm2192_vm6, %v5633_v23, %v5635_v43  ;;  %v5774_v39 = vpop.permute.xlu1 %2223 }
 0x1da   : > { %v1989_v0 = vadd.f32 %v1988_v63, %v1973_v9  ;;  %v2363_v30 = vand.u32 2147483647, %v2349_v59  ;;  %v5763_v16 = vand.u32 2147483647, %v2246_v20  ;;  %v2231_v49 = vsel %vm2192_vm6, %v5635_v43, %v5633_v23  ;;  %v6672_v63 = vld [vmem:[#allocation89_spill] sm:$0xff] }
 0x1db   : > { %v1978_v14 = vadd.f32 %v1977_v29, %v1972_v55  ;;  %v2440_v5 = vmul.f32 %v2426_v18, %v2364_v41  ;;  %v2257_v22 = vand.u32 2147483647, %v2245_v31  ;;  %v5769_v34 = vand.u32 2147483647, %v1838_v60  ;;  %v6673_v29 = vld [vmem:[#allocation107_spill] sm:$0xff]  ;;  %v6675_v41 = vld [vmem:[#allocation110_spill] sm:$0xff] }
 0x1dc   : > { %v2248_v8 = vsub.f32 %v3285_v61, %v2196_v32  ;;  %v2014_v35 = vadd.f32 0.5, %v2012_v25  ;;  %v5771_v10 = vand.u32 2147483647, %v1839_v24  ;;  %v2269_v53 = vmul.f32 %v2237_v15, %v6639_v11 }
 0x1dd   : > { %v2015_v33 = vadd.f32 0.5, %v2013_v38  ;;  %v2473_v9 = vrot.slane %v5711_v44, 4  ;;  %v5779_v7 = vand.u32 2147483647, %v2247_v57  ;;  %v2270_v23 = vmul.f32 %v2231_v49, %v6635_v58  ;;  %v5817_v57 = vpop.permute.xlu1 %1781 }
 0x1de   : > { %v1990_v43 = vrot.slane %v1989_v0, 4  ;;  %v2439_v55 = vmul.f32 %v2425_v51, %v2363_v30  ;;  %v1979_v18 = vrot.slane %v1978_v14, 4  ;;  %v6670_v37 = vrot.slane %v5673_v48, 4  ;;  %v6679_v30 = vld [vmem:[#allocation70_spill] sm:$0xff] }
 0x1df   : > { %v6671_v27 = vrot.slane %v6664_v50, 4  ;;  %v2477_v3 = vrot.slane %v2440_v5, 4  ;;  %v2506_v59 = vadd.f32 %v5700_v45, %v6672_v63  ;;  %v5789_v20 = vand.u32 2147483647, %v2248_v8  ;;  %v6680_v63 = vld [vmem:[#allocation74_spill] sm:$0xff] }
 0x1e0   : > { %v2016_v44 = vfloor.f32 %v2014_v35  ;;  %v2471_v12 = vrot.slane %v5713_v62, 4  ;;  %v6674_v58 = vrot.slane %v6673_v29, 4  ;;  %v6676_v51 = vrot.slane %v6675_v41, 4  ;;  %v6681_v41 = vld [vmem:[#allocation100_spill] sm:$0xff] }
 0x1e1   : > { %v2470_v11 = vsel %vm1372_vm9, %v6671_v27, %v6670_v37  ;;  %v1788_v50 = vsel %vm1783_vm3, %v5670_v42, %v5668_v28  ;;  %v1794_v45 = vsel %vm1783_vm3, %v5668_v28, %v5670_v42  ;;  %v2017_v19 = vfloor.f32 %v2015_v33  ;;  %v5819_v28 = vpop.permute.xlu0 %1769 }
 0x1e2   : > { %v2464_v31 = vsel %vm1372_vm9, %v6676_v51, %v6674_v58  ;;  %v6677_v60 = vmov %v6670_v37  ;;  %v1823_v25 = vsel %vm1783_vm3, %v5707_v46, %v5705_v36  ;;  %v2475_v61 = vrot.slane %v2439_v55, 4 }
 0x1e3   : > { %v2474_v62 = vsel %vm1372_vm9, %v6677_v60, %v2473_v9  ;;  %v2507_v24 = vadd.f32 %v2506_v59, %v2470_v11  ;;  %v6678_v32 = vmov %v6674_v58  ;;  %v1991_v42 = vadd.f32 %v1990_v43, %v1989_v0 }
 0x1e4   : > { %v2468_v38 = vsel %vm1372_vm9, %v6678_v32, %v2467_v47  ;;  %v1980_v48 = vadd.f32 %v1979_v18, %v1978_v14  ;;  %v2478_v15 = vsel %vm1372_vm9, %v2473_v9, %v2477_v3  ;;  %v2495_v49 = vadd.f32 %v2464_v31, %v6679_v30  ;;  %v6682_v31 = vld [vmem:[#allocation35_spill] sm:$0xff]  ;;  %v6683_v32 = vld [vmem:[#allocation98_spill] sm:$0xff] }
 0x1e5   : > { %v1829_v5 = vsel %vm1783_vm3, %v5705_v36, %v5707_v46  ;;  %v2018_v8 = vmul.f32 4.0, %v2016_v44  ;;  %v2472_v35 = vsel %vm1372_vm9, %v2467_v47, %v2471_v12  ;;  %v2508_v33 = vadd.f32 %v2507_v24, %v2474_v62  ;;  %v1805_v44 = vpop.permute.xlu0 %1804 }
 0x1e6   : > { %v2482_v55 = vsel %vm1372_vm9, %v2477_v3, %v2481_v4  ;;  %v2533_v0 = vmul.f32 0.16666667, %v6582_v40  ;;  %v2534_v14 = vmul.f32 0.16666667, %v6580_v13  ;;  %v2496_v9 = vadd.f32 %v2495_v49, %v2468_v38 }
 0x1e7   : > { %v2281_v43 = vmul.f32 %v2269_v53, %v2257_v22  ;;  %v2019_v18 = vmul.f32 4.0, %v2017_v19  ;;  %v2476_v37 = vsel %vm1372_vm9, %v2471_v12, %v2475_v61  ;;  %v2509_v27 = vadd.f32 %v2508_v33, %v2478_v15  ;;  %v1817_v53 = vpop.permute.xlu1 %1816  ;;  %v6685_v33 = vld [vmem:[#allocation28_spill] sm:$0xff] }
 0x1e8   : > { %v1862_v46 = vmul.f32 %v1829_v5, %v4970_v2  ;;  %v1992_v36 = vrot.slane %v1991_v42, 2  ;;  %v1981_v11 = vrot.slane %v1980_v48, 2  ;;  %v2497_v17 = vadd.f32 %v2496_v9, %v2472_v35  ;;  %v6688_v9 = vld [vmem:[#allocation93_spill] sm:$0xff] }
 0x1e9   : > { %v1863_v47 = vmul.f32 %v1823_v25, %v6680_v63  ;;  %v2020_v59 = vsub.f32 %v6582_v40, %v2018_v8  ;;  %v2480_v4 = vsel %vm1372_vm9, %v2475_v61, %v2479_v26  ;;  %v2510_v3 = vadd.f32 %v2509_v27, %v2482_v55  ;;  %v2179_v5 = vpop.permute.xlu0 %2178 }
 0x1ea   : > { %v2203_v22 = vsel %vm2192_vm6, %v5746_v52, %v5748_v21  ;;  %v2535_v2 = vadd.f32 0.5, %v2533_v0  ;;  %v2536_v12 = vadd.f32 0.5, %v2534_v14  ;;  %v2498_v29 = vadd.f32 %v2497_v17, %v2476_v37  ;;  %v6686_v0 = vld [vmem:[#allocation115_spill] sm:$0xff] }
 0x1eb   : > { %v2282_v58 = vmul.f32 %v2270_v23, %v5763_v16  ;;  %v1840_v51 = vsub.f32 %v6681_v41, %v1794_v45  ;;  %v1841_v19 = vsub.f32 %v6682_v31, %v1788_v50  ;;  %v2021_v56 = vsub.f32 %v6580_v13, %v2019_v18  ;;  %v2191_v49 = vpop.permute.xlu1 %2190 }
 0x1ec   : > { %v2197_v26 = vsel %vm2192_vm6, %v5748_v21, %v5746_v52  ;;  %v1993_v60 = vadd.f32 %v1992_v36, %v1991_v42  ;;  %v1982_v62 = vadd.f32 %v1981_v11, %v1980_v48  ;;  %v2499_v25 = vadd.f32 %v2498_v29, %v2480_v4 }
 0x1ed   : > { %v1874_v61 = vmul.f32 %v1862_v46, %v5769_v34  ;;  %v1875_v24 = vmul.f32 %v1863_v47, %v5771_v10  ;;  %v2249_v16 = vsub.f32 %v6681_v41, %v2203_v22  ;;  %v2022_v23 = vand.u32 2147483647, %v2020_v59  ;;  %v6684_v34 = vld [vmem:[#allocation105_spill] sm:$0xff] }
 0x1ee   : > { %v2232_v50 = vsel %vm2192_vm6, %v5776_v1, %v5774_v39  ;;  %v2238_v52 = vsel %vm2192_vm6, %v5774_v39, %v5776_v1  ;;  %v2537_v21 = vfloor.f32 %v2535_v2  ;;  %v2538_v45 = vfloor.f32 %v2536_v12  ;;  %v6687_v1 = vld [vmem:[#allocation111_spill] sm:$0xff] }
 0x1ef   : > { %v2290_v38 = vadd.f32 %v6683_v32, %v2281_v43  ;;  %v2301_v42 = vadd.f32 %v6684_v34, %v2282_v58  ;;  %v2250_v10 = vsub.f32 %v6682_v31, %v2197_v26  ;;  %v2023_v48 = vand.u32 2147483647, %v2021_v56  ;;  %v2226_v29 = vpop.permute.xlu1 %2225  ;;  %v2214_v58 = vpop.permute.xlu0 %2213 }
 0x1f0   : > { %v1852_v15 = vand.u32 2147483647, %v1840_v51  ;;  %v1853_v30 = vand.u32 2147483647, %v1841_v19  ;;  %v1994_v8 = vrot.slane %v1993_v60, 1  ;;  %v1983_v35 = vrot.slane %v1982_v62, 1 }
 0x1f1   : > { %v5867_v55 = vadd.f32 %v6685_v33, %v1874_v61  ;;  %v5870_v39 = vadd.f32 %v6686_v0, %v1875_v24  ;;  %v2271_v14 = vmul.f32 %v2238_v52, %v6687_v1  ;;  %v2272_v43 = vmul.f32 %v2232_v50, %v6688_v9  ;;  %v6691_v19 = vld [vmem:[#allocation104_spill] sm:$0xff] }
 0x1f2   : > { %v2261_v18 = vand.u32 2147483647, %v2249_v16  ;;  %vm2024_vm9 = vcmp.lt.f32.partialorder %v2022_v23, 0.5  ;;  %v2539_v37 = vmul.f32 6.0, %v2537_v21  ;;  %v2540_v27 = vmul.f32 6.0, %v2538_v45 }
 0x1f3   : > { %v2262_v46 = vand.u32 2147483647, %v2250_v10  ;;  %vm2025_vm12 = vcmp.lt.f32.partialorder %v2023_v48, 0.5  ;;  %v2511_v36 = vrot.slane %v2510_v3, 4  ;;  %v2500_v11 = vrot.slane %v2499_v25, 4  ;;  %v6694_v10 = vld [vmem:[#allocation34_spill] sm:$0xff] }
 0x1f4   : > { %v1789_v17 = vsel %vm1783_vm3, %v5819_v28, %v5817_v57  ;;  %v1795_v63 = vsel %vm1783_vm3, %v5817_v57, %v5819_v28  ;;  %v1995_v47 = vadd.f32 %v1994_v8, %v1993_v60  ;;  %v1984_v59 = vadd.f32 %v1983_v35, %v1982_v62  ;;  %v6693_v62 = vld [vmem:[#allocation29_spill] sm:$0xff] }
 0x1f5   : > { %v2283_v4 = vmul.f32 %v2271_v14, %v5779_v7  ;;  %v2284_v22 = vmul.f32 %v2272_v43, %v5789_v20  ;;  %v1824_v2 = vsel %vm1783_vm3, %v1805_v44, %v1817_v53  ;;  %v1830_v12 = vsel %vm1783_vm3, %v1817_v53, %v1805_v44  ;;  %v6690_v20 = vld [vmem:[#allocation66_spill] sm:$0xff]  ;;  %v1807_v14 = vpop.permute.xlu0 %1806 }
 0x1f6   : > { %v6689_v41 = vmov 0.0   ;;  %v2541_v28 = vsub.f32 %v6582_v40, %v2539_v37  ;;  %v2542_v7 = vsub.f32 %v6580_v13, %v2540_v27  ;;  %v1842_v31 = vsub.f32 %v6690_v20, %v1795_v63  ;;  %v6692_v53 = vld [vmem:[#allocation38_spill] sm:$0xff]  ;;  %v6696_v27 = vld [vmem:[#allocation60_spill] sm:$0xff] }
 0x1f7   : > { %v5890_v51 = vsel %vm2024_vm9, 1.0, %v6689_v41  ;;  %v5893_v57 = vsel %vm2025_vm12, 1.0, %v6689_v41  ;;  %v1843_v56 = vsub.f32 %v6691_v19, %v1789_v17  ;;  %v2512_v26 = vadd.f32 %v2511_v36, %v2510_v3 }
 0x1f8   : > { %v2501_v60 = vadd.f32 %v2500_v11, %v2499_v25  ;;  %v1864_v44 = vmul.f32 %v1830_v12, %v6692_v53  ;;  %v1865_v61 = vmul.f32 %v1824_v2, %v6693_v62  ;;  %v2233_v24 = vsel %vm2192_vm6, %v2214_v58, %v2226_v29 }
 0x1f9   : > { %v2239_v16 = vsel %vm2192_vm6, %v2226_v29, %v2214_v58  ;;  %v2291_v23 = vadd.f32 %v2290_v38, %v2283_v4  ;;  %v2302_v50 = vadd.f32 %v2301_v42, %v2284_v22  ;;  %v5906_v52 = vmul.f32 %v5893_v57, %v1995_v47  ;;  %v1819_v38 = vpop.permute.xlu1 %1818  ;;  %v2216_v2 = vpop.permute.xlu0 %2215 }
 0x1fa   : > { %v5909_v21 = vmul.f32 %v5890_v51, %v1984_v59  ;;  %v2198_v3 = vsel %vm2192_vm6, %v2179_v5, %v2191_v49  ;;  %v2204_v25 = vsel %vm2192_vm6, %v2191_v49, %v2179_v5  ;;  %v2543_v45 = vand.u32 2147483647, %v2541_v28  ;;  %v6695_v5 = vld [vmem:[#allocation108_spill] sm:$0xff] }
 0x1fb   : > { %v2544_v32 = vand.u32 2147483647, %v2542_v7  ;;  %v2273_v34 = vmul.f32 %v2239_v16, %v6647_v6  ;;  %v2274_v48 = vmul.f32 %v2233_v24, %v6694_v10  ;;  %v2513_v42 = vrot.slane %v2512_v26, 2  ;;  %v6697_v7 = vld [vmem:[#allocation62_spill] sm:$0xff] }
 0x1fc   : > { %v2502_v8 = vrot.slane %v2501_v60, 2  ;;  %v1854_v35 = vand.u32 2147483647, %v1842_v31  ;;  %v1855_v33 = vand.u32 2147483647, %v1843_v56  ;;  %v1876_v0 = vmul.f32 %v1864_v44, %v1852_v15  ;;  %v6698_v31 = vld [vmem:[#allocation82_spill] sm:$0xff] }
 0x1fd   : > { %v1877_v1 = vmul.f32 %v1865_v61, %v1853_v30  ;;  %v2251_v9 = vsub.f32 %v6690_v20, %v2204_v25  ;;  %v2252_v43 = vsub.f32 %v6691_v19, %v2198_v3  ;;  %v1825_v49 = vsel %vm1783_vm3, %v1807_v14, %v1819_v38  ;;  %v2228_v30 = vpop.permute.xlu1 %2227  ;;  %v1997_v24 = vpop.permute.xlu0 %1996 }
 0x1fe   : > { %v1831_v6 = vsel %vm1783_vm3, %v1819_v38, %v1807_v14  ;;  %v1867_v36 = vmul.f32 %v1825_v49, %v6696_v27  ;;  %vm2545_vm14 = vcmp.lt.f32.partialorder %v2543_v45, 0.5  ;;  %vm2546_vm1 = vcmp.lt.f32.partialorder %v2544_v32, 0.5 }
 0x1ff   : > { %v1866_v37 = vmul.f32 %v1831_v6, %v6695_v5  ;;  %v2285_v11 = vmul.f32 %v2273_v34, %v2261_v18  ;;  %v2286_v15 = vmul.f32 %v2274_v48, %v2262_v46  ;;  %v2514_v17 = vadd.f32 %v2513_v42, %v2512_v26 }
 0x200   : > { %v2503_v63 = vadd.f32 %v2502_v8, %v2501_v60  ;;  %v1883_v47 = vadd.f32 %v5867_v55, %v1876_v0  ;;  %v1894_v59 = vadd.f32 %v5870_v39, %v1877_v1  ;;  %v1879_v22 = vmul.f32 %v1867_v36, %v1855_v33 }
 0x201   : > { %v1878_v4 = vmul.f32 %v1866_v37, %v1854_v35  ;;  %v2263_v12 = vand.u32 2147483647, %v2251_v9  ;;  %v2264_v29 = vand.u32 2147483647, %v2252_v43  ;;  %v2234_v58 = vsel %vm2192_vm6, %v2216_v2, %v2228_v30  ;;  %v1999_v39 = vpop.permute.xlu1 %1998  ;;  %v2518_v9 = vpop.permute.xlu0 %2517 }
 0x202   : > { %v2240_v28 = vsel %vm2192_vm6, %v2228_v30, %v2216_v2  ;;  %v1895_v46 = vadd.f32 %v1894_v59, %v1879_v22  ;;  %v2276_v19 = vmul.f32 %v2234_v58, %v6698_v31  ;;  %v2292_v55 = vadd.f32 %v2291_v23, %v2285_v11 }
 0x203   : > { %v1884_v18 = vadd.f32 %v1883_v47, %v1878_v4  ;;  %v2275_v20 = vmul.f32 %v2240_v28, %v6697_v7  ;;  %v2303_v56 = vadd.f32 %v2302_v50, %v2286_v15  ;;  %v2515_v26 = vrot.slane %v2514_v17, 1 }
 0x204   : > { %v2504_v60 = vrot.slane %v2503_v63, 1  ;;  %v1896_v44 = vrot.slane %v1895_v46, 4  ;;  %v2288_v61 = vmul.f32 %v2276_v19, %v2264_v29  ;;  %v2000_v16 = vsel %vm1783_vm3, %v1997_v24, %v1999_v39 }
 0x205   : > { %v1885_v53 = vrot.slane %v1884_v18, 4  ;;  %v2287_v62 = vmul.f32 %v2275_v20, %v2263_v12  ;;  %v2001_v3 = vsel %vm1783_vm3, %v1999_v39, %v1997_v24  ;;  %v5939_v25 = vsel %vm2545_vm14, 1.0, %v6689_v41  ;;  %v2520_v8 = vpop.permute.xlu1 %2519 }
 0x206   : > { %v5943_v23 = vsel %vm2546_vm1, 1.0, %v6689_v41  ;;  %v1897_v34 = vadd.f32 %v1896_v44, %v1895_v46  ;;  %v2304_v48 = vadd.f32 %v2303_v56, %v2288_v61  ;;  %v2002_v38 = vsub.f32 %v6582_v40, %v2001_v3  ;;  %v6699_v3 = vld [vmem:[#allocation40_spill] sm:$0xff] }
 0x207   : > { %v1886_v50 = vadd.f32 %v1885_v53, %v1884_v18  ;;  %v2293_v10 = vadd.f32 %v2292_v55, %v2287_v62  ;;  %v2003_v42 = vsub.f32 %v6580_v13, %v2000_v16  ;;  %v2516_v35 = vadd.f32 %v2515_v26, %v2514_v17 }
 0x208   : > { %v2505_v33 = vadd.f32 %v2504_v60, %v2503_v63  ;;  %v1898_v1 = vrot.slane %v1897_v34, 2  ;;  %v2305_v14 = vrot.slane %v2304_v48, 4  ;;  %v2004_v43 = vand.u32 2147483647, %v2002_v38 }
 0x209   : > { %v1887_v0 = vrot.slane %v1886_v50, 2  ;;  %v2294_v45 = vrot.slane %v2293_v10, 4  ;;  %v2005_v32 = vand.u32 2147483647, %v2003_v42  ;;  %v2521_v49 = vsel %vm2192_vm6, %v2518_v9, %v2520_v8 }
 0x20a   : > { %v2522_v6 = vsel %vm2192_vm6, %v2520_v8, %v2518_v9  ;;  %v1899_v37 = vadd.f32 %v1898_v1, %v1897_v34  ;;  %v2306_v36 = vadd.f32 %v2305_v14, %v2304_v48  ;;  %vm2006_vm4 = vcmp.eq.f32.partialorder %v2004_v43, 8.0  ;;  %v2030_v34 = vld [vmem:[#allocation7] sm:$0x3]  ;;  %v2551_v8 = vld [vmem:[#allocation8] sm:$0x3] }
 0x20b   : > { %v1888_v5 = vadd.f32 %v1887_v0, %v1886_v50  ;;  %v2295_v27 = vadd.f32 %v2294_v45, %v2293_v10  ;;  %vm2007_vm2 = vcmp.eq.f32.partialorder %v2005_v32, 8.0  ;;  %v2523_v11 = vsub.f32 %v6582_v40, %v2522_v6  ;;  %v6701_v0 = vld [vmem:[#allocation23_spill] sm:$0xff] (!%p3070_p11)  ;;  %v2635_v14 = vld [vmem:[#allocation4] sm:$0x3] (!%p3070_p11)  ;;  %v2610_v9 = vld [vmem:[#allocation3] sm:$0x3] (!%p3070_p11) }
 0x20c   : > { %v2524_v15 = vsub.f32 %v6580_v13, %v2521_v49  ;;  %v2307_v17 = vrot.slane %v2306_v36, 2  ;;  %v1900_v47 = vrot.slane %v1899_v37, 1  ;;  %v3056_v59 = vsel %vm2006_vm4, 1.0, %v6689_v41  ;;  %v2674_v43 = vld [vmem:[#allocation5] sm:$0x3] (!%p3070_p11) }
 0x20d   : > { %v2296_v30 = vrot.slane %v2295_v27, 2  ;;  %v1889_v63 = vrot.slane %v1888_v5, 1  ;;  %v3057_v4 = vsel %vm2007_vm2, 1.0, %v6689_v41  ;;  %v2525_v54 = vand.u32 2147483647, %v2523_v11  ;;  %v6702_v32 = vld [vmem:[#allocation113_spill] sm:$0xff] (!%p3070_p11) }
 0x20e   : > { %v2526_v22 = vand.u32 2147483647, %v2524_v15  ;;  %v2308_v12 = vadd.f32 %v2307_v17, %v2306_v36  ;;  %v1901_v58 = vadd.f32 %v1900_v47, %v1899_v37  ;;  %v2031_v28 = vmul.f32 %v5890_v51, %v3056_v59  ;;  %v6703_v49 = vld [vmem:[#allocation97_spill] sm:$0xff] (!%p3070_p11) }
 0x20f   : > { %v2297_v2 = vadd.f32 %v2296_v30, %v2295_v27  ;;  %v1890_v29 = vadd.f32 %v1889_v63, %v1888_v5  ;;  %v2032_v40 = vmul.f32 %v5893_v57, %v3057_v4  ;;  %vm2527_vm10 = vcmp.eq.f32.partialorder %v2525_v54, 12.0  ;;  %v2744_v59 = vld [vmem:[#allocation6] sm:$0x3] (!%p3070_p11) }
 0x210   : > { %vm2528_vm8 = vcmp.eq.f32.partialorder %v2526_v22, 12.0  ;;  %v2309_v18 = vrot.slane %v2308_v12, 1  ;;  %v3066_v46 = vsel %vm2527_vm10, 1.0, %v6689_v41  ;;  %v2557_v26 = vmul.f32 %v5943_v23, %v2516_v35 }
 0x211   : > { %v2298_v13 = vrot.slane %v2297_v2, 1  ;;  %v3067_v7 = vsel %vm2528_vm8, 1.0, %v6689_v41  ;;  %v2033_v20 = vmul.f32 %v2031_v28, %v1890_v29  ;;  %v2034_v31 = vmul.f32 %v2032_v40, %v1901_v58  ;;  %v6704_v40 = vld [vmem:[#allocation40_spill] sm:$0xff] (!%p3070_p11) }
 0x212   : > { %v2552_v19 = vmul.f32 %v5939_v25, %v3066_v46  ;;  %v2553_v55 = vmul.f32 %v5943_v23, %v3067_v7  ;;  %v2310_v39 = vadd.f32 %v2309_v18, %v2308_v12  ;;  %v2556_v60 = vmul.f32 %v5939_v25, %v2505_v33  ;;  %v2584_v33 = vld [vmem:[#allocation2] sm:$0x3] (!%p3070_p11)  ;;  %v2700_v46 = vld [vmem:[#allocation9] sm:$0x3] (!%p3070_p11) }
 0x213   : > { %v2299_v56 = vadd.f32 %v2298_v13, %v2297_v2  ;;  %v2037_v53 = vadd.f32 %v5909_v21, %v2033_v20  ;;  %v2038_v44 = vadd.f32 %v5906_v52, %v2034_v31  ;;  %v5975_v1 = vsub.s32 (!%p3070_p11), 0, %v6701_v0 }
 0x214   : > { %v2555_v61 = vmul.f32 %v2553_v55, %v2310_v39  ;;  %v5978_v45 = vsub.s32 (!%p3070_p11), 1, %v6701_v0  ;;  %v2703_v6 = vcombine.low (!%p3070_p11), %v6703_v49, %v6702_v32  ;;  %v2775_v5 = vcombine.low (!%p3070_p11), %v5890_v51, %v5893_v57 }
 0x215   : > { %v2554_v62 = vmul.f32 %v2552_v19, %v2299_v56  ;;  %v2041_v24 = vcombine.low %v2037_v53, %v2038_v44  ;;  %v2847_v37 = vcombine.low (!%p3070_p11), %v5939_v25, %v5943_v23  ;;  %v2589_v27 = vrot.slane (!%p3070_p11), %v2584_v33, %v5975_v1  ;;  %v2772_v53 = vld [vmem:[#allocation10] sm:$0x3] (!%p3070_p11) }
 0x216   : > { %v2559_v16 = vadd.f32 %v2557_v26, %v2555_v61  ;;  %v2593_v36 = vrot.slane (!%p3070_p11), %v2584_v33, %v5978_v45  ;;  %v2640_v11 = vrot.slane (!%p3070_p11), %v2635_v14, %v5975_v1  ;;  %v2644_v15 = vrot.slane (!%p3070_p11), %v2635_v14, %v5978_v45 }
 0x217   : > { %v2558_v41 = vadd.f32 %v2556_v60, %v2554_v62  ;;  %v2048_v50 = vrot.slane %v2041_v24, %v6699_v3  ;;  %v2615_v30 = vrot.slane (!%p3070_p11), %v2610_v9, %v5975_v1  ;;  %v2619_v17 = vrot.slane (!%p3070_p11), %v2610_v9, %v5978_v45  ;;  %v2844_v24 = vld [vmem:[#allocation11] sm:$0x3] (!%p3070_p11) }
 0x218   : > { %v2679_v63 = vrot.slane (!%p3070_p11), %v2674_v43, %v5975_v1  ;;  %v2683_v47 = vrot.slane (!%p3070_p11), %v2674_v43, %v5978_v45  ;;  %v2597_v51 = vsel (!%p3070_p11), %vm2596_vm13, %v2589_v27, 0.0  ;;  %v2598_v57 = vsel (!%p3070_p11), %vm2596_vm13, %v2593_v36, 0.0 }
 0x219   : > { %v2562_v10 = vcombine.low %v2558_v41, %v2559_v16  ;;  %v2055_v48 = vrot.slane %v2048_v50, %v6699_v3  ;;  %v2647_v25 = vsel (!%p3070_p11), %vm2596_vm13, %v2640_v11, 0.0  ;;  %v2648_v23 = vsel (!%p3070_p11), %vm2596_vm13, %v2644_v15, 0.0 }
 0x21a   : > { %v2599_v4 = vadd.f32 (!%p3070_p11), %v2598_v57, %v2597_v51  ;;  %v2649_v54 = vadd.f32 (!%p3070_p11), %v2648_v23, %v2647_v25  ;;  %v2622_v22 = vsel (!%p3070_p11), %vm2596_vm13, %v2615_v30, 0.0  ;;  %v2623_v2 = vsel (!%p3070_p11), %vm2596_vm13, %v2619_v17, 0.0 }
 0x21b   : > { %v2569_v38 = vrot.slane %v2562_v10, %v6699_v3  ;;  %v2057_v42 = vadd.f32 %v2055_v48, %v2030_v34  ;;  %2583 = sbr.rel (%p3070_p11) target bundleno = 787 (0x313), region = 48  ;;  %v2624_v29 = vadd.f32 (!%p3070_p11), %v2623_v2, %v2622_v22  ;;  %v2686_v58 = vsel (!%p3070_p11), %vm2596_vm13, %v2679_v63, 0.0 }
 0x21c   : > { %v2687_v28 = vsel (!%p3070_p11), %vm2596_vm13, %v2683_v47, 0.0  ;;  %v2710_v13 = vrot.slane (!%p3070_p11), %v2703_v6, %v6704_v40  ;;  %2600 = vadd.xlane.f32.xlu0 (!%p3070_p11), %v2599_v4  ;;  %2650 = vadd.xlane.f32.xlu1 (!%p3070_p11), %v2649_v54  ;;  %v2749_v7 = vrot.slane (!%p3070_p11), %v2744_v59, %v5975_v1  ;;  %v2753_v20 = vrot.slane (!%p3070_p11), %v2744_v59, %v5978_v45 }
 0x21d   : > { %v2576_v35 = vrot.slane %v2569_v38, %v6699_v3  ;;  %2058 = vst.msk [vmem:[#allocation7] sm:$0x3] %vm4140_vm5, %v2057_v42  ;;  %v2688_v18 = vadd.f32 (!%p3070_p11), %v2687_v28, %v2686_v58  ;;  %v2782_v55 = vrot.slane (!%p3070_p11), %v2775_v5, %v6704_v40  ;;  %v2854_v44 = vrot.slane (!%p3070_p11), %v2847_v37, %v6704_v40 }
 0x21e   : > { %v2717_v19 = vrot.slane (!%p3070_p11), %v2710_v13, %v6704_v40  ;;  %v2756_v26 = vsel (!%p3070_p11), %vm2596_vm13, %v2749_v7, 0.0  ;;  %v2757_v60 = vsel (!%p3070_p11), %vm2596_vm13, %v2753_v20, 0.0 }
 0x21f   : > { %v2578_v52 = vadd.f32 %v2576_v35, %v2551_v8  ;;  %v2789_v61 = vrot.slane (!%p3070_p11), %v2782_v55, %v6704_v40  ;;  %v2758_v16 = vadd.f32 (!%p3070_p11), %v2757_v60, %v2756_v26  ;;  %v2861_v34 = vrot.slane (!%p3070_p11), %v2854_v44, %v6704_v40 }
 0x220   : > { %v2719_v62 = vmul.f32 (!%p3070_p11), %v2717_v19, %v2700_v46  ;;  %2625 = vadd.xlane.f32.xlu0 (!%p3070_p11), %v2624_v29  ;;  %2689 = vadd.xlane.f32.xlu1 (!%p3070_p11), %v2688_v18 }
 0x221   : > { %2579 = vst.msk [vmem:[#allocation8] sm:$0x3] %vm4140_vm5, %v2578_v52  ;;  %v2791_v38 = vmul.f32 (!%p3070_p11), %v2789_v61, %v2772_v53  ;;  %v2863_v8 = vmul.f32 (!%p3070_p11), %v2861_v34, %v2844_v24 }
 0x222   : > { %v2724_v10 = vrot.slane %v2719_v62, %v5975_v1  ;;  %v2728_v48 = vrot.slane %v2719_v62, %v5978_v45 }
 0x223   : > { %v2796_v52 = vrot.slane %v2791_v38, %v5975_v1  ;;  %v2800_v33 = vrot.slane %v2791_v38, %v5978_v45  ;;  %v2868_v9 = vrot.slane %v2863_v8, %v5975_v1  ;;  %v2872_v43 = vrot.slane %v2863_v8, %v5978_v45 }
 0x224   : > { %v2816_v12 = vld [vmem:[#allocation7] sm:$0x3]  ;;  %v2731_v35 = vsel %vm2596_vm13, %v2724_v10, 0.0  ;;  %v2732_v21 = vsel %vm2596_vm13, %v2728_v48, 0.0  ;;  %2759 = vadd.xlane.f32.xlu1 %v2758_v16 }
 0x225   : > { %v2821_v56 = vrot.slane %v2816_v12, %v5975_v1  ;;  %v2825_v39 = vrot.slane %v2816_v12, %v5978_v45  ;;  %v2733_v0 = vadd.f32 %v2732_v21, %v2731_v35  ;;  %v2803_v32 = vsel %vm2596_vm13, %v2796_v52, 0.0 }
 0x226   : > { %v2804_v49 = vsel %vm2596_vm13, %v2800_v33, 0.0  ;;  %v2875_v27 = vsel %vm2596_vm13, %v2868_v9, 0.0  ;;  %v2876_v36 = vsel %vm2596_vm13, %v2872_v43, 0.0 }
 0x227   : > { %v2828_v3 = vsel %vm2596_vm13, %v2821_v56, 0.0  ;;  %v2829_v50 = vsel %vm2596_vm13, %v2825_v39, 0.0  ;;  %2734 = vadd.xlane.f32.xlu0 %v2733_v0  ;;  %v2805_v37 = vadd.f32 %v2804_v49, %v2803_v32 }
 0x228   : > { %v2888_v31 = vld [vmem:[#allocation8] sm:$0x3]  ;;  %v2830_v14 = vadd.f32 %v2829_v50, %v2828_v3 }
 0x229   : > { %v2893_v41 = vrot.slane %v2888_v31, %v5975_v1  ;;  %v2897_v42 = vrot.slane %v2888_v31, %v5978_v45  ;;  %v2877_v1 = vadd.f32 %v2876_v36, %v2875_v27 }
 0x22a   : > { %2831 = vadd.xlane.f32.xlu1 %v2830_v14 }
 0x22b   : > { %v2900_v6 = vsel %vm2596_vm13, %v2893_v41, 0.0  ;;  %v2901_v5 = vsel %vm2596_vm13, %v2897_v42, 0.0  ;;  %2806 = vadd.xlane.f32.xlu0 %v2805_v37 }
 0x22c   : > { %v2902_v11 = vadd.f32 %v2901_v5, %v2900_v6 }
 0x22e   : > { %2903 = vadd.xlane.f32.xlu1 %v2902_v11 }
 0x22f   : > { %2878 = vadd.xlane.f32.xlu0 %v2877_v1 }
 0x2a9   : > { %v2601_v45 = vpop.xlane.xlu0 %2600  ;;  %v2651_v15 = vpop.xlane.xlu1 %2650 }
 0x2aa   : > { %v2602_v30 = vrot.slane %v2601_v45, 4  ;;  %v2652_v17 = vrot.slane %v2651_v15, 4 }
 0x2ac   : > { %v2603_v63 = vadd.f32 %v2602_v30, %v2601_v45  ;;  %v2653_v47 = vadd.f32 %v2652_v17, %v2651_v15 }
 0x2ad   : > { %v2626_v51 = vpop.xlane.xlu0 %2625  ;;  %v2690_v57 = vpop.xlane.xlu1 %2689 }
 0x2ae   : > { %v2604_v25 = vrot.slane %v2603_v63, 2  ;;  %v2654_v23 = vrot.slane %v2653_v47, 2  ;;  %v2627_v59 = vrot.slane %v2626_v51, 4  ;;  %v2691_v4 = vrot.slane %v2690_v57, 4 }
 0x2b0   : > { %v2628_v54 = vadd.f32 %v2627_v59, %v2626_v51  ;;  %v2692_v22 = vadd.f32 %v2691_v4, %v2690_v57  ;;  %v2605_v2 = vadd.f32 %v2604_v25, %v2603_v63  ;;  %v2655_v12 = vadd.f32 %v2654_v23, %v2653_v47 }
 0x2b1   : > { %v2760_v29 = vpop.xlane.xlu1 %2759 }
 0x2b2   : > { %v2629_v58 = vrot.slane %v2628_v54, 2  ;;  %v2693_v28 = vrot.slane %v2692_v22, 2  ;;  %v2761_v40 = vrot.slane %v2760_v29, 4  ;;  %v2606_v13 = vrot.slane %v2605_v2, 1 }
 0x2b3   : > { %v2656_v46 = vrot.slane %v2655_v12, 1 }
 0x2b4   : > { %v2735_v18 = vpop.xlane.xlu0 %2734  ;;  %v2762_v20 = vadd.f32 %v2761_v40, %v2760_v29  ;;  %v2607_v31 = vadd.f32 %v2606_v13, %v2605_v2  ;;  %v2630_v19 = vadd.f32 %v2629_v58, %v2628_v54  ;;  %v2694_v56 = vadd.f32 %v2693_v28, %v2692_v22 }
 0x2b5   : > { %v2736_v7 = vrot.slane %v2735_v18, 4  ;;  %v2657_v62 = vadd.f32 %v2656_v46, %v2655_v12 }
 0x2b6   : > { %v2763_v26 = vrot.slane %v2762_v20, 2  ;;  %3086 = vpush %v2607_v31  ;;  %v2631_v53 = vrot.slane %v2630_v19, 1  ;;  %v2695_v61 = vrot.slane %v2694_v56, 1 }
 0x2b7   : > { %v2832_v55 = vpop.xlane.xlu1 %2831  ;;  %v2737_v39 = vadd.f32 %v2736_v7, %v2735_v18 }
 0x2b8   : > { %v2833_v60 = vrot.slane %v2832_v55, 4  ;;  %v2807_v44 = vpop.xlane.xlu0 %2806  ;;  %v2632_v3 = vadd.f32 %v2631_v53, %v2630_v19  ;;  %v2696_v50 = vadd.f32 %v2695_v61, %v2694_v56  ;;  %v2764_v34 = vadd.f32 %v2763_v26, %v2762_v20 }
 0x2b9   : > { %v2738_v24 = vrot.slane %v2737_v39, 2  ;;  %v2808_v41 = vrot.slane %v2807_v44, 4 }
 0x2ba   : > { %v2834_v16 = vadd.f32 %v2833_v60, %v2832_v55  ;;  %3088 = vpush %v2632_v3  ;;  %v2765_v21 = vrot.slane %v2764_v34, 1 }
 0x2bb   : > { %v2904_v10 = vpop.xlane.xlu1 %2903  ;;  %v2809_v48 = vadd.f32 %v2808_v41, %v2807_v44  ;;  %v2739_v42 = vadd.f32 %v2738_v24, %v2737_v39  ;;  %3090 = vpush %v2657_v62 }
 0x2bc   : > { %v2835_v38 = vrot.slane %v2834_v16, 2  ;;  %v2905_v8 = vrot.slane %v2904_v10, 4  ;;  %v2879_v35 = vpop.xlane.xlu0 %2878  ;;  %3092 = vpush %v2696_v50  ;;  %v2766_v9 = vadd.f32 %v2765_v21, %v2764_v34 }
 0x2bd   : > { %v2810_v52 = vrot.slane %v2809_v48, 2  ;;  %v2880_v33 = vrot.slane %v2879_v35, 4  ;;  %v2740_v0 = vrot.slane %v2739_v42, 1 }
 0x2be   : > { %v2906_v14 = vadd.f32 %v2905_v8, %v2904_v10  ;;  %v2836_v43 = vadd.f32 %v2835_v38, %v2834_v16  ;;  %v6705_v16 = vld [vmem:[#allocation36_spill] sm:$0xff] }
 0x2bf   : > { %v2881_v32 = vadd.f32 %v2880_v33, %v2879_v35  ;;  %v2741_v49 = vadd.f32 %v2740_v0, %v2739_v42  ;;  %v2811_v6 = vadd.f32 %v2810_v52, %v2809_v48  ;;  %vm2921_vm3 = vcmp.eq.s32.totalorder %v6705_v16, 2 }
 0x2c0   : > { %v2907_v5 = vrot.slane %v2906_v14, 2  ;;  %v2837_v37 = vrot.slane %v2836_v43, 1  ;;  %vm2920_vm7 = vcmp.eq.s32.totalorder %v6705_v16, 1  ;;  %vm2919_vm15 = vcmp.eq.s32.totalorder %v6705_v16, 0 }
 0x2c1   : > { %v2882_v27 = vrot.slane %v2881_v32, 2  ;;  %3094 = vpush %v2741_v49  ;;  %v2812_v36 = vrot.slane %v2811_v6, 1 }
 0x2c2   : > { %v2908_v11 = vadd.f32 %v2907_v5, %v2906_v14  ;;  %3096 = vpush %v2766_v9  ;;  %v2838_v1 = vadd.f32 %v2837_v37, %v2836_v43 }
 0x2c3   : > { %v2883_v45 = vadd.f32 %v2882_v27, %v2881_v32  ;;  %v2813_v15 = vadd.f32 %v2812_v36, %v2811_v6 }
 0x2c4   : > { %v2909_v30 = vrot.slane %v2908_v11, 1 }
 0x2c5   : > { %3098 = vpush %v2813_v15  ;;  %v2884_v17 = vrot.slane %v2883_v45, 1 }
 0x2c6   : > { %3100 = vpush %v2838_v1  ;;  %v2910_v63 = vadd.f32 %v2909_v30, %v2908_v11 }
 0x2c7   : > { %v2885_v47 = vadd.f32 %v2884_v17, %v2883_v45 }
 0x2c9   : > { %3102 = vpush %v2885_v47 }
 0x2ca   : > { %3104 = vpush %v2910_v63 }
 0x2e7   : > { %s3087_s15 = spop %3086 }
 0x2e8   : > { %v2609_v51 = vstv %s3087_s15 }
 0x2e9   : > { %3286 = vrcp.f32 %v2609_v51 }
 0x2eb   : > { %s3089_s16 = spop %3088 }
 0x2ec   : > { %s3091_s20 = spop %3090  ;;  %v2634_v23 = vstv %s3089_s16 }
 0x2ed   : > { %s3093_s21 = spop %3092  ;;  %v2659_v22 = vstv %s3091_s20 }
 0x2ee   : > { %v2698_v7 = vstv %s3093_s21 }
 0x2f2   : > { %s3095_s22 = spop %3094 }
 0x2f3   : > { %v2743_v57 = vstv %s3095_s22  ;;  %v3287_v25 = vpop.eup %3286  ;;  %s3097_s23 = spop %3096 }
 0x2f4   : > { %3288 = vrcp.f32 %v2743_v57  ;;  %v2661_v59 = vmul.f32 %v3287_v25, %v2634_v23  ;;  %v2662_v12 = vmul.f32 %v3287_v25, %v2659_v22  ;;  %v2768_v13 = vstv %s3097_s23 }
 0x2f5   : > { %v2699_v31 = vmul.f32 %v3287_v25, %v2698_v7 }
 0x2f6   : > { %s3099_s25 = spop %3098  ;;  %v2663_v4 = vmul.f32 0.85, %v2661_v59 }
 0x2f7   : > { %v2815_v54 = vstv %s3099_s25  ;;  %s3101_s27 = spop %3100 }
 0x2f8   : > { %3290 = vrcp.f32 %v2815_v54  ;;  %v2664_v2 = vmul.f32 %v2663_v4, %v2661_v59  ;;  %v2840_v20 = vstv %s3101_s27 }
 0x2fa   : > { %s3103_s28 = spop %3102  ;;  %v2665_v29 = vsub.f32 %v2662_v12, %v2664_v2 }
 0x2fb   : > { %v2887_v58 = vstv %s3103_s28  ;;  %s3105_s30 = spop %3104 }
 0x2fc   : > { %3292 = vrcp.f32 %v2887_v58  ;;  %v2666_v28 = vmax.f32 %v2665_v29, 0.0  ;;  %v2912_v55 = vstv %s3105_s30 }
 0x2fe   : > { %v3289_v40 = vpop.eup %3288  ;;  %3294 = vrsqrt.f32 %v2666_v28  ;;  %vm2669_vm5 = vcmp.eq.f32.partialorder %v2666_v28, inf  ;;  %v2672_v61 = vand.u32 2147483648, %v2666_v28  ;;  %vm2671_vm11 = vcmp.eq.f32.partialorder %v2666_v28, 0.0 }
 0x2ff   : > { %v2770_v18 = vmul.f32 %v3289_v40, %v2768_v13 }
 0x301   : > { %v2771_v56 = vadd.f32 %v2770_v18, %v2699_v31 }
 0x302   : > { %v3291_v46 = vpop.eup %3290 }
 0x303   : > { %v2842_v19 = vmul.f32 %v3291_v46, %v2840_v20 }
 0x305   : > { %v2843_v26 = vadd.f32 %v2842_v19, %v2771_v56 }
 0x306   : > { %v3293_v39 = vpop.eup %3292 }
 0x307   : > { %v2914_v60 = vmul.f32 %v3293_v39, %v2912_v55 }
 0x308   : > { %v3295_v53 = vpop.eup %3294 }
 0x309   : > { %v2915_v44 = vadd.f32 %v2914_v60, %v2843_v26  ;;  %v2668_v62 = vmul.f32 %v3295_v53, %v2666_v28 }
 0x30b   : > { %v2917_v24 = vmul.f32 0.5, %v2915_v44  ;;  %v2670_v41 = vsel %vm2669_vm5, %v2666_v28, %v2668_v62 }
 0x30c   : > { %v2673_v3 = vsel %vm2671_vm11, %v2672_v61, %v2670_v41 }
 0x30d   : > { %v2916_v50 = vmul.f32 10.0, %v2673_v3  ;;  %v2922_v34 = vsel %vm2921_vm3, %v2917_v24, 0.0 }
 0x30f   : > { %v2918_v10 = vadd.f32 %v2917_v24, %v2916_v50  ;;  %v2923_v48 = vsel %vm2920_vm7, %v2916_v50, %v2922_v34 }
 0x311   : > { %v2924_v38 = vsel %vm2919_vm15, %v2918_v10, %v2923_v48 }
 0x312   : > { %2925 = vst [vmem:[#allocation19] sm:$0x1] %v2924_v38 }
 0x313 PF: > { %p3112_p13 = scmp.eq.s32.totalorder %s3470_s13, 2  ;;  %s3435_s3 = smov [#allocation19]  }
 0x314   : > { %s2933_s6 = sshll.u32 %s3435_s3, 4  ;;  %s2934_s6 = int_to_ptr.vmem [resolvable:$true] %s2933_s6 }
 0x315   : > { %s3352_s24 = scalar_lea.vmem %s2934_s6, 16  ;;  %s3358_s18 = scalar_lea.vmem %s2934_s6, 32 }
 0x316   : > { %p3353_p0 = scmp.ne.s32.totalorder %s2934_s6, %s3352_s24  ;;  %p3359_p9 = scmp.lt.s32.totalorder %s2934_s6, %s2934_s6 }
 0x317   : > { %p3360_p2 = scmp.lt.s32.totalorder %s3358_s18, %s3352_s24 }
 0x318   : > { %p3354_p1 = pnand %p3353_p0, %p3112_p13 }
 0x319   : > { %p3361_p5 = por %p3360_p2, %p3359_p9 }
 0x31a   : > { %p3355_p12 = pneg %p3354_p1 }
 0x31c   : > { %p3362_p7 = pnand %p3361_p5, %p3355_p12 }
 0x31e   : > { %3365 = shalt.err (!%p3362_p7)
}
 0x31f   : > { %s3366_s7 = scalar_lea.hbm %s6073_s2, 16 }
 0x320   : > { %p3367_p3 = scmp.ne.s32.totalorder %s6073_s2, %s3366_s7  ;;  %p3372_p4 = scmp.lt.u32.totalorder %s3366_s7, %s6073_s2 }
 0x322   : > { %p3368_p8 = pnand %p3367_p3, %p3112_p13 }
 0x324   : > { %p3369_p10 = pneg %p3368_p8 }
 0x326   : > { %p3374_p6 = pnand %p3372_p4, %p3369_p10 }
 0x328   : > { %3377 = shalt.err (!%p3374_p6)
}
 0x329   : > { %3109 = dma.vmem_to_hbm [thread:$0]  (%p3112_p13), %s2934_s6, 16, %s6073_s2, [#allocation16]  }
 0x32a   : > { %3403 = dma.done.wait (%p3112_p13), [#allocation16], 16  }
 0x32b   : > { %3405 = vsyncadd (%p3112_p13), [#allocation16], 4294967280 }
 0x32c PF: > { %p16_p11 = scmp.ge.s32.totalorder %s3473_s14, 5   ;;  %s6706_s9 = smov %s3412_s10 }
 0x32d   : > { %s6707_s10 = smov %s3416_s11  ;;  %s6708_s11 = smov %s3483_s17 }
 0x32e   : > { %s6709_s12 = smov %s3473_s14  ;;  %18 = sbr.rel (!%p16_p11) target bundleno = 6 (0x6), region = 90 }
 0x335   :  { %2946 = vsyncpa [#allocation15], 1 }
 0x336   :  { %2948 = vsyncpa [#allocation15 + $0x1], 1 }
 0x337   :  { %2949 = vsyncpa [#allocation18], 1 }
 0x338   :  { %2951 = vsyncpa [#allocation18 + $0x1], 1 }
 0x339   :  { %2952 = vsyncpa [#allocation16], 1 }
 0x33a   :  { %2954 = vsyncpa [#allocation16 + $0x1], 1 }

</bundles_post_ra>
